<compile_context>
chip_gen: v7x
topology: tpu7x:2x2x1
jax: 0.10.0
libtpu: 0.0.40
codegen_flags: <defaults>
</compile_context>

<pallas_src>
import functools

import jax
import jax.numpy as jnp
from jax.experimental import pallas as pl
from jax.experimental.pallas import tpu as pltpu

INPUT_DIM = 28 * 28          # 784
PAD_DIM = 7 * 128            # 896, lane-dense padding of the feature dim
H_DIM = 16
Z_DIM = 2


def vae_kernel(x_ref, eps_ref,
               we1_ref, be1_ref, we2_ref, be2_ref, we3_ref, be3_ref,
               wmulv_ref, bmulv_ref, wz_ref, bz_ref,
               wd1_ref, bd1_ref, wd2_ref, bd2_ref, wd3_ref, bd3_ref,
               out_ref, mulv_ref):
    f32 = jnp.float32
    bf16 = jnp.bfloat16

    x = x_ref[...]                                                  # (TB, 896) bf16

    # --- encoder: Linear+ReLU, Linear+ReLU, Linear ---
    h = jnp.dot(x, we1_ref[...], preferred_element_type=f32) + be1_ref[...]
    h = jnp.maximum(h, 0.0)
    h = jnp.dot(h.astype(bf16), we2_ref[...], preferred_element_type=f32) + be2_ref[...]
    h = jnp.maximum(h, 0.0)
    h = jnp.dot(h, we3_ref[...], preferred_element_type=f32) + be3_ref[...]   # (TB, 16) f32

    # --- bottleneck: fused [mu | logvar] projection (16 -> 2*Z_DIM), f32 ---
    mulv = jnp.dot(h, wmulv_ref[...], preferred_element_type=f32) + bmulv_ref[...]
    mu = mulv[:, :Z_DIM]
    logvar = mulv[:, Z_DIM:]
    z = mu + jnp.exp(0.5 * logvar) * eps_ref[...]                   # (TB, 2) f32

    # --- fc3 (2 -> 16) on the VPU: K=2 would waste a full MXU pass ---
    d = z[:, 0:1] * wz_ref[0:1, :] + z[:, 1:2] * wz_ref[1:2, :] + bz_ref[...]

    # --- decoder: Linear+ReLU, Linear+ReLU, Linear+Sigmoid ---
    d = jnp.dot(d, wd1_ref[...], preferred_element_type=f32) + bd1_ref[...]
    d = jnp.maximum(d, 0.0)
    d = jnp.dot(d.astype(bf16), wd2_ref[...], preferred_element_type=f32) + bd2_ref[...]
    d = jnp.maximum(d, 0.0)
    d = jnp.dot(d.astype(bf16), wd3_ref[...], preferred_element_type=f32) + bd3_ref[...]

    out_ref[...] = jax.nn.sigmoid(d).astype(out_ref.dtype)          # (TB, 896) bf16
    mulv_ref[...] = mulv                                            # (TB, 4) f32


def _resident_spec(shape):
    """Whole-array block with a constant index_map: stays resident across the grid."""
    nd = len(shape)
    return pl.BlockSpec(shape, lambda i: (0,) * nd)


def _pack_params(params):
    """Pad / cast / fuse the natural-layout f32 params for the kernel."""
    (w1, b1, w2, b2, w3, b3, wmu, bmu, wlv, blv,
     wz, bz, wd1, bd1, wd2, bd2, wd3, bd3) = params
    bf16 = jnp.bfloat16

    w1p = jnp.zeros((PAD_DIM, 256), jnp.float32).at[:INPUT_DIM, :].set(w1).astype(bf16)
    wd3p = jnp.zeros((256, PAD_DIM), jnp.float32).at[:, :INPUT_DIM].set(wd3).astype(bf16)
    bd3p = jnp.zeros((1, PAD_DIM), jnp.float32).at[:, :INPUT_DIM].set(bd3)
    wmulv = jnp.concatenate([wmu, wlv], axis=1)     # (16, 2*Z_DIM)
    bmulv = jnp.concatenate([bmu, blv], axis=1)     # (1, 2*Z_DIM)

    return [
        w1p, b1,
        w2.astype(bf16), b2,
        w3, b3,
        wmulv, bmulv,
        wz, bz,
        wd1, bd1,
        wd2.astype(bf16), bd2,
        wd3p, bd3p,
    ]


@functools.partial(jax.jit, static_argnames=("block_b",))
def vae_forward(x, eps, params, *, block_b=128):
    """x: (B, 784) f32, eps: (B, Z_DIM) f32, params: flat list of (w, b) f32 arrays.

    Returns (recon bf16 (B,784), mu f32 (B,2), logvar f32 (B,2)).
    """
    B = x.shape[0]
    TB = block_b
    n_steps = pl.cdiv(B, TB)
    B_pad = n_steps * TB

    kp = _pack_params(params)

    # Pad batch to a multiple of TB and features to 896 (lane-dense); zero padding
    # contributes nothing because the padded weight rows/cols are zero.
    x_p = jnp.zeros((B_pad, PAD_DIM), jnp.bfloat16).at[:B, :INPUT_DIM].set(
        x.astype(jnp.bfloat16))
    eps_p = jnp.zeros((B_pad, Z_DIM), jnp.float32).at[:B, :].set(eps)

    inputs = [x_p, eps_p] + kp

    out_shapes = (
        jax.ShapeDtypeStruct((B_pad, PAD_DIM), jnp.bfloat16),     # recon (padded)
        jax.ShapeDtypeStruct((B_pad, 2 * Z_DIM), jnp.float32),    # [mu | logvar]
    )

    in_specs = [
        pl.BlockSpec((TB, PAD_DIM), lambda i: (i, 0)),            # x tile (streamed)
        pl.BlockSpec((TB, Z_DIM), lambda i: (i, 0)),              # eps tile (streamed)
    ] + [_resident_spec(p.shape) for p in kp]                     # weights resident

    out_specs = (
        pl.BlockSpec((TB, PAD_DIM), lambda i: (i, 0)),
        pl.BlockSpec((TB, 2 * Z_DIM), lambda i: (i, 0)),
    )

    recon_p, mulv = pl.pallas_call(
        vae_kernel,
        out_shape=out_shapes,
        grid=(n_steps,),
        in_specs=in_specs,
        out_specs=out_specs,
        compiler_params=pltpu.CompilerParams(
            dimension_semantics=("parallel",),        # shard batch over TCs on v7x
            vmem_limit_bytes=16 << 20,                # right-sized; footprint ~3 MiB
        ),
    )(*inputs)

    recon = recon_p[:B, :INPUT_DIM]
    mu = mulv[:B, :Z_DIM]
    logvar = mulv[:B, Z_DIM:]
    return recon, mu, logvar


def init_params(key):
    """Deterministic init mimicking torch.nn.Linear default (uniform +-1/sqrt(fan_in)).

    Weights stored as (in, out); biases as (1, out); all f32 (the kernel wrapper
    casts / pads / fuses them as needed).
    """
    layer_dims = [
        (INPUT_DIM, 256),  # encoder[0]
        (256, 64),         # encoder[2]
        (64, H_DIM),       # encoder[4]
        (H_DIM, Z_DIM),    # fc1 (mu)
        (H_DIM, Z_DIM),    # fc2 (logvar)
        (Z_DIM, H_DIM),    # fc3
        (H_DIM, 64),       # decoder[0]
        (64, 256),         # decoder[2]
        (256, INPUT_DIM),  # decoder[4]
    ]
    params = []
    for (fan_in, fan_out) in layer_dims:
        key, kw, kb = jax.random.split(key, 3)
        bound = 1.0 / jnp.sqrt(fan_in)
        w = jax.random.uniform(kw, (fan_in, fan_out), jnp.float32, -bound, bound)
        b = jax.random.uniform(kb, (1, fan_out), jnp.float32, -bound, bound)
        params += [w, b]
    return params


if __name__ == "__main__":
    key = jax.random.PRNGKey(0)
    k_params, k_x, k_eps = jax.random.split(key, 3)

    # B=200 exercises both the batch-padding path (pads to 256) and a multi-step grid.
    B = 200
    params = init_params(k_params)
    x = jax.random.uniform(k_x, (B, INPUT_DIM), jnp.float32)   # flattened 28x28 images
    # TODO(synk): torch.randn inside reparameterize() is replaced by an explicit
    # noise input so the kernel stays deterministic/stateless.
    eps = jax.random.normal(k_eps, (B, Z_DIM), jnp.float32)

    recon, mu, logvar = vae_forward(x, eps, params, block_b=128)
    jax.block_until_ready((recon, mu, logvar))

    # Pure-JAX f32 reference (bf16 streaming => loosened tolerances).
    def ref_forward(x, eps, params):
        (w1, b1, w2, b2, w3, b3, wmu, bmu, wlv, blv,
         wz, bz, wd1, bd1, wd2, bd2, wd3, bd3) = params
        h = jnp.maximum(x @ w1 + b1, 0.0)
        h = jnp.maximum(h @ w2 + b2, 0.0)
        h = h @ w3 + b3
        mu_r = h @ wmu + bmu
        lv_r = h @ wlv + blv
        z = mu_r + jnp.exp(0.5 * lv_r) * eps
        d = z @ wz + bz
        d = jnp.maximum(d @ wd1 + bd1, 0.0)
        d = jnp.maximum(d @ wd2 + bd2, 0.0)
        d = jax.nn.sigmoid(d @ wd3 + bd3)
        return d, mu_r, lv_r

    r_ref, mu_ref_v, lv_ref_v = ref_forward(x, eps, params)
    assert recon.shape == (B, INPUT_DIM) and mu.shape == (B, Z_DIM) and logvar.shape == (B, Z_DIM)
    assert jnp.max(jnp.abs(recon.astype(jnp.float32) - r_ref)) < 5e-2, "reconstruction mismatch"
    assert jnp.max(jnp.abs(mu - mu_ref_v)) < 5e-2, "mu mismatch"
    assert jnp.max(jnp.abs(logvar - lv_ref_v)) < 5e-2, "logvar mismatch"

    print("KERNEL_OK")
</pallas_src>

<mosaic_0001>
module attributes {stable_mosaic.version = 11 : i64} {
  func.func @vae_kernel(%arg0: i32, %arg1: memref<128x896xbf16, #tpu.memory_space<vmem>>, %arg2: memref<128x2xf32, #tpu.memory_space<vmem>>, %arg3: memref<896x256xbf16, #tpu.memory_space<vmem>>, %arg4: memref<1x256xf32, #tpu.memory_space<vmem>>, %arg5: memref<256x64xbf16, #tpu.memory_space<vmem>>, %arg6: memref<1x64xf32, #tpu.memory_space<vmem>>, %arg7: memref<64x16xf32, #tpu.memory_space<vmem>>, %arg8: memref<1x16xf32, #tpu.memory_space<vmem>>, %arg9: memref<16x4xf32, #tpu.memory_space<vmem>>, %arg10: memref<1x4xf32, #tpu.memory_space<vmem>>, %arg11: memref<2x16xf32, #tpu.memory_space<vmem>>, %arg12: memref<1x16xf32, #tpu.memory_space<vmem>>, %arg13: memref<16x64xf32, #tpu.memory_space<vmem>>, %arg14: memref<1x64xf32, #tpu.memory_space<vmem>>, %arg15: memref<64x256xbf16, #tpu.memory_space<vmem>>, %arg16: memref<1x256xf32, #tpu.memory_space<vmem>>, %arg17: memref<256x896xbf16, #tpu.memory_space<vmem>>, %arg18: memref<1x896xf32, #tpu.memory_space<vmem>>, %arg19: memref<128x896xbf16, #tpu.memory_space<vmem>>, %arg20: memref<128x4xf32, #tpu.memory_space<vmem>>) attributes {dimension_semantics = [#tpu.dimension_semantics<parallel>], iteration_bounds = array<i64: 2>, scalar_prefetch = 0 : i64, scratch_operands = 0 : i64, tpu.core_type = #tpu.core_type<tc>, window_params = [{transform_indices = @transform_0, window_bounds = array<i64: 128, 896>}, {transform_indices = @transform_1, window_bounds = array<i64: 128, 2>}, {pipeline_mode = #tpu.pipeline_mode<synchronous>, transform_indices = @transform_2, window_bounds = array<i64: 896, 256>}, {pipeline_mode = #tpu.pipeline_mode<synchronous>, transform_indices = @transform_3, window_bounds = array<i64: 1, 256>}, {pipeline_mode = #tpu.pipeline_mode<synchronous>, transform_indices = @transform_4, window_bounds = array<i64: 256, 64>}, {pipeline_mode = #tpu.pipeline_mode<synchronous>, transform_indices = @transform_5, window_bounds = array<i64: 1, 64>}, {pipeline_mode = #tpu.pipeline_mode<synchronous>, transform_indices = @transform_6, window_bounds = array<i64: 64, 16>}, {pipeline_mode = #tpu.pipeline_mode<synchronous>, transform_indices = @transform_7, window_bounds = array<i64: 1, 16>}, {pipeline_mode = #tpu.pipeline_mode<synchronous>, transform_indices = @transform_8, window_bounds = array<i64: 16, 4>}, {pipeline_mode = #tpu.pipeline_mode<synchronous>, transform_indices = @transform_9, window_bounds = array<i64: 1, 4>}, {pipeline_mode = #tpu.pipeline_mode<synchronous>, transform_indices = @transform_10, window_bounds = array<i64: 2, 16>}, {pipeline_mode = #tpu.pipeline_mode<synchronous>, transform_indices = @transform_11, window_bounds = array<i64: 1, 16>}, {pipeline_mode = #tpu.pipeline_mode<synchronous>, transform_indices = @transform_12, window_bounds = array<i64: 16, 64>}, {pipeline_mode = #tpu.pipeline_mode<synchronous>, transform_indices = @transform_13, window_bounds = array<i64: 1, 64>}, {pipeline_mode = #tpu.pipeline_mode<synchronous>, transform_indices = @transform_14, window_bounds = array<i64: 64, 256>}, {pipeline_mode = #tpu.pipeline_mode<synchronous>, transform_indices = @transform_15, window_bounds = array<i64: 1, 256>}, {pipeline_mode = #tpu.pipeline_mode<synchronous>, transform_indices = @transform_16, window_bounds = array<i64: 256, 896>}, {pipeline_mode = #tpu.pipeline_mode<synchronous>, transform_indices = @transform_17, window_bounds = array<i64: 1, 896>}, {transform_indices = @transform_18, window_bounds = array<i64: 128, 896>}, {transform_indices = @transform_19, window_bounds = array<i64: 128, 4>}]} {
    %c0 = arith.constant 0 : index
    %c0_0 = arith.constant 0 : index
    %0 = vector.load %arg1[%c0, %c0_0] : memref<128x896xbf16, #tpu.memory_space<vmem>>, vector<128x896xbf16>
    %c0_1 = arith.constant 0 : index
    %c0_2 = arith.constant 0 : index
    %1 = vector.load %arg3[%c0_1, %c0_2] : memref<896x256xbf16, #tpu.memory_space<vmem>>, vector<896x256xbf16>
    %cst = arith.constant dense<0.000000e+00> : vector<128x256xf32>
    %2 = tpu.matmul %0, %1, %cst {dimension_numbers = #tpu.dot_dimension_numbers<[1], [0], [0], [1], [0, 0, 1, 1], [], []>} : vector<128x896xbf16>, vector<896x256xbf16>, vector<128x256xf32> -> vector<128x256xf32>
    %c0_3 = arith.constant 0 : index
    %c0_4 = arith.constant 0 : index
    %3 = vector.load %arg4[%c0_3, %c0_4] : memref<1x256xf32, #tpu.memory_space<vmem>>, vector<1x256xf32>
    %4 = vector.broadcast %3 : vector<1x256xf32> to vector<128x256xf32>
    %5 = arith.addf %2, %4 : vector<128x256xf32>
    %cst_5 = arith.constant 0.000000e+00 : f32
    %6 = vector.broadcast %cst_5 : f32 to vector<128x256xf32>
    %7 = arith.maximumf %5, %6 : vector<128x256xf32>
    %8 = arith.truncf %7 : vector<128x256xf32> to vector<128x256xbf16>
    %c0_6 = arith.constant 0 : index
    %c0_7 = arith.constant 0 : index
    %9 = vector.load %arg5[%c0_6, %c0_7] : memref<256x64xbf16, #tpu.memory_space<vmem>>, vector<256x64xbf16>
    %cst_8 = arith.constant dense<0.000000e+00> : vector<128x64xf32>
    %10 = tpu.matmul %8, %9, %cst_8 {dimension_numbers = #tpu.dot_dimension_numbers<[1], [0], [0], [1], [0, 0, 1, 1], [], []>} : vector<128x256xbf16>, vector<256x64xbf16>, vector<128x64xf32> -> vector<128x64xf32>
    %c0_9 = arith.constant 0 : index
    %c0_10 = arith.constant 0 : index
    %11 = vector.load %arg6[%c0_9, %c0_10] : memref<1x64xf32, #tpu.memory_space<vmem>>, vector<1x64xf32>
    %12 = vector.broadcast %11 : vector<1x64xf32> to vector<128x64xf32>
    %13 = arith.addf %10, %12 : vector<128x64xf32>
    %cst_11 = arith.constant 0.000000e+00 : f32
    %14 = vector.broadcast %cst_11 : f32 to vector<128x64xf32>
    %15 = arith.maximumf %13, %14 : vector<128x64xf32>
    %c0_12 = arith.constant 0 : index
    %c0_13 = arith.constant 0 : index
    %16 = vector.load %arg7[%c0_12, %c0_13] : memref<64x16xf32, #tpu.memory_space<vmem>>, vector<64x16xf32>
    %cst_14 = arith.constant dense<0.000000e+00> : vector<128x16xf32>
    %17 = tpu.matmul %15, %16, %cst_14 {dimension_numbers = #tpu.dot_dimension_numbers<[1], [0], [0], [1], [0, 0, 1, 1], [], []>} : vector<128x64xf32>, vector<64x16xf32>, vector<128x16xf32> -> vector<128x16xf32>
    %c0_15 = arith.constant 0 : index
    %c0_16 = arith.constant 0 : index
    %18 = vector.load %arg8[%c0_15, %c0_16] : memref<1x16xf32, #tpu.memory_space<vmem>>, vector<1x16xf32>
    %19 = vector.broadcast %18 : vector<1x16xf32> to vector<128x16xf32>
    %20 = arith.addf %17, %19 : vector<128x16xf32>
    %c0_17 = arith.constant 0 : index
    %c0_18 = arith.constant 0 : index
    %21 = vector.load %arg9[%c0_17, %c0_18] : memref<16x4xf32, #tpu.memory_space<vmem>>, vector<16x4xf32>
    %cst_19 = arith.constant dense<0.000000e+00> : vector<128x4xf32>
    %22 = tpu.matmul %20, %21, %cst_19 {dimension_numbers = #tpu.dot_dimension_numbers<[1], [0], [0], [1], [0, 0, 1, 1], [], []>} : vector<128x16xf32>, vector<16x4xf32>, vector<128x4xf32> -> vector<128x4xf32>
    %c0_20 = arith.constant 0 : index
    %c0_21 = arith.constant 0 : index
    %23 = vector.load %arg10[%c0_20, %c0_21] : memref<1x4xf32, #tpu.memory_space<vmem>>, vector<1x4xf32>
    %24 = vector.broadcast %23 : vector<1x4xf32> to vector<128x4xf32>
    %25 = arith.addf %22, %24 : vector<128x4xf32>
    %26 = vector.extract_strided_slice %25 {offsets = [0, 0], sizes = [128, 2], strides = [1, 1]} : vector<128x4xf32> to vector<128x2xf32>
    %27 = vector.extract_strided_slice %25 {offsets = [0, 2], sizes = [128, 2], strides = [1, 1]} : vector<128x4xf32> to vector<128x2xf32>
    %cst_22 = arith.constant 5.000000e-01 : f32
    %28 = vector.broadcast %cst_22 : f32 to vector<128x2xf32>
    %29 = arith.mulf %28, %27 : vector<128x2xf32>
    %30 = math.exp %29 : vector<128x2xf32>
    %c0_23 = arith.constant 0 : index
    %c0_24 = arith.constant 0 : index
    %31 = vector.load %arg2[%c0_23, %c0_24] : memref<128x2xf32, #tpu.memory_space<vmem>>, vector<128x2xf32>
    %32 = arith.mulf %30, %31 : vector<128x2xf32>
    %33 = arith.addf %26, %32 : vector<128x2xf32>
    %34 = vector.extract_strided_slice %33 {offsets = [0, 0], sizes = [128, 1], strides = [1, 1]} : vector<128x2xf32> to vector<128x1xf32>
    %c0_25 = arith.constant 0 : index
    %c0_26 = arith.constant 0 : index
    %35 = vector.load %arg11[%c0_25, %c0_26] : memref<2x16xf32, #tpu.memory_space<vmem>>, vector<1x16xf32>
    %36 = vector.broadcast %34 : vector<128x1xf32> to vector<128x16xf32>
    %37 = vector.broadcast %35 : vector<1x16xf32> to vector<128x16xf32>
    %38 = arith.mulf %36, %37 : vector<128x16xf32>
    %39 = vector.extract_strided_slice %33 {offsets = [0, 1], sizes = [128, 1], strides = [1, 1]} : vector<128x2xf32> to vector<128x1xf32>
    %c1 = arith.constant 1 : index
    %c0_27 = arith.constant 0 : index
    %40 = vector.load %arg11[%c1, %c0_27] : memref<2x16xf32, #tpu.memory_space<vmem>>, vector<1x16xf32>
    %41 = vector.broadcast %39 : vector<128x1xf32> to vector<128x16xf32>
    %42 = vector.broadcast %40 : vector<1x16xf32> to vector<128x16xf32>
    %43 = arith.mulf %41, %42 : vector<128x16xf32>
    %44 = arith.addf %38, %43 : vector<128x16xf32>
    %c0_28 = arith.constant 0 : index
    %c0_29 = arith.constant 0 : index
    %45 = vector.load %arg12[%c0_28, %c0_29] : memref<1x16xf32, #tpu.memory_space<vmem>>, vector<1x16xf32>
    %46 = vector.broadcast %45 : vector<1x16xf32> to vector<128x16xf32>
    %47 = arith.addf %44, %46 : vector<128x16xf32>
    %c0_30 = arith.constant 0 : index
    %c0_31 = arith.constant 0 : index
    %48 = vector.load %arg13[%c0_30, %c0_31] : memref<16x64xf32, #tpu.memory_space<vmem>>, vector<16x64xf32>
    %cst_32 = arith.constant dense<0.000000e+00> : vector<128x64xf32>
    %49 = tpu.matmul %47, %48, %cst_32 {dimension_numbers = #tpu.dot_dimension_numbers<[1], [0], [0], [1], [0, 0, 1, 1], [], []>} : vector<128x16xf32>, vector<16x64xf32>, vector<128x64xf32> -> vector<128x64xf32>
    %c0_33 = arith.constant 0 : index
    %c0_34 = arith.constant 0 : index
    %50 = vector.load %arg14[%c0_33, %c0_34] : memref<1x64xf32, #tpu.memory_space<vmem>>, vector<1x64xf32>
    %51 = vector.broadcast %50 : vector<1x64xf32> to vector<128x64xf32>
    %52 = arith.addf %49, %51 : vector<128x64xf32>
    %cst_35 = arith.constant 0.000000e+00 : f32
    %53 = vector.broadcast %cst_35 : f32 to vector<128x64xf32>
    %54 = arith.maximumf %52, %53 : vector<128x64xf32>
    %55 = arith.truncf %54 : vector<128x64xf32> to vector<128x64xbf16>
    %c0_36 = arith.constant 0 : index
    %c0_37 = arith.constant 0 : index
    %56 = vector.load %arg15[%c0_36, %c0_37] : memref<64x256xbf16, #tpu.memory_space<vmem>>, vector<64x256xbf16>
    %cst_38 = arith.constant dense<0.000000e+00> : vector<128x256xf32>
    %57 = tpu.matmul %55, %56, %cst_38 {dimension_numbers = #tpu.dot_dimension_numbers<[1], [0], [0], [1], [0, 0, 1, 1], [], []>} : vector<128x64xbf16>, vector<64x256xbf16>, vector<128x256xf32> -> vector<128x256xf32>
    %c0_39 = arith.constant 0 : index
    %c0_40 = arith.constant 0 : index
    %58 = vector.load %arg16[%c0_39, %c0_40] : memref<1x256xf32, #tpu.memory_space<vmem>>, vector<1x256xf32>
    %59 = vector.broadcast %58 : vector<1x256xf32> to vector<128x256xf32>
    %60 = arith.addf %57, %59 : vector<128x256xf32>
    %cst_41 = arith.constant 0.000000e+00 : f32
    %61 = vector.broadcast %cst_41 : f32 to vector<128x256xf32>
    %62 = arith.maximumf %60, %61 : vector<128x256xf32>
    %63 = arith.truncf %62 : vector<128x256xf32> to vector<128x256xbf16>
    %c0_42 = arith.constant 0 : index
    %c0_43 = arith.constant 0 : index
    %64 = vector.load %arg17[%c0_42, %c0_43] : memref<256x896xbf16, #tpu.memory_space<vmem>>, vector<256x896xbf16>
    %cst_44 = arith.constant dense<0.000000e+00> : vector<128x896xf32>
    %65 = tpu.matmul %63, %64, %cst_44 {dimension_numbers = #tpu.dot_dimension_numbers<[1], [0], [0], [1], [0, 0, 1, 1], [], []>} : vector<128x256xbf16>, vector<256x896xbf16>, vector<128x896xf32> -> vector<128x896xf32>
    %c0_45 = arith.constant 0 : index
    %c0_46 = arith.constant 0 : index
    %66 = vector.load %arg18[%c0_45, %c0_46] : memref<1x896xf32, #tpu.memory_space<vmem>>, vector<1x896xf32>
    %67 = vector.broadcast %66 : vector<1x896xf32> to vector<128x896xf32>
    %68 = arith.addf %65, %67 : vector<128x896xf32>
    %69 = arith.negf %68 : vector<128x896xf32>
    %70 = math.exp %69 : vector<128x896xf32>
    %cst_47 = arith.constant 1.000000e+00 : f32
    %71 = vector.broadcast %cst_47 : f32 to vector<128x896xf32>
    %72 = arith.addf %71, %70 : vector<128x896xf32>
    %73 = arith.divf %71, %72 : vector<128x896xf32>
    %74 = arith.truncf %73 : vector<128x896xf32> to vector<128x896xbf16>
    %c0_48 = arith.constant 0 : index
    %c0_49 = arith.constant 0 : index
    %75 = vector.load %arg19[%c0_48, %c0_49] : memref<128x896xbf16, #tpu.memory_space<vmem>>, vector<128x896xbf16>
    tpu.vector_store %arg19[%c0_48, %c0_49], %74 {strides = array<i32>} : memref<128x896xbf16, #tpu.memory_space<vmem>>, vector<128x896xbf16>,
    %c0_50 = arith.constant 0 : index
    %c0_51 = arith.constant 0 : index
    %76 = vector.load %arg20[%c0_50, %c0_51] : memref<128x4xf32, #tpu.memory_space<vmem>>, vector<128x4xf32>
    tpu.vector_store %arg20[%c0_50, %c0_51], %25 {strides = array<i32>} : memref<128x4xf32, #tpu.memory_space<vmem>>, vector<128x4xf32>,
    return
  }
  func.func @transform_0(%arg0: i32) -> (i32, i32) {
    %c0_i32 = arith.constant 0 : i32
    %c0_i32_0 = arith.constant 0 : i32
    return %arg0, %c0_i32 : i32, i32
  }
  func.func @transform_1(%arg0: i32) -> (i32, i32) {
    %c0_i32 = arith.constant 0 : i32
    %c0_i32_0 = arith.constant 0 : i32
    return %arg0, %c0_i32 : i32, i32
  }
  func.func @transform_2(%arg0: i32) -> (i32, i32) {
    %c0_i32 = arith.constant 0 : i32
    %c0_i32_0 = arith.constant 0 : i32
    %c0_i32_1 = arith.constant 0 : i32
    return %c0_i32, %c0_i32_0 : i32, i32
  }
  func.func @transform_3(%arg0: i32) -> (i32, i32) {
    %c0_i32 = arith.constant 0 : i32
    %c0_i32_0 = arith.constant 0 : i32
    %c0_i32_1 = arith.constant 0 : i32
    return %c0_i32, %c0_i32_0 : i32, i32
  }
  func.func @transform_4(%arg0: i32) -> (i32, i32) {
    %c0_i32 = arith.constant 0 : i32
    %c0_i32_0 = arith.constant 0 : i32
    %c0_i32_1 = arith.constant 0 : i32
    return %c0_i32, %c0_i32_0 : i32, i32
  }
  func.func @transform_5(%arg0: i32) -> (i32, i32) {
    %c0_i32 = arith.constant 0 : i32
    %c0_i32_0 = arith.constant 0 : i32
    %c0_i32_1 = arith.constant 0 : i32
    return %c0_i32, %c0_i32_0 : i32, i32
  }
  func.func @transform_6(%arg0: i32) -> (i32, i32) {
    %c0_i32 = arith.constant 0 : i32
    %c0_i32_0 = arith.constant 0 : i32
    %c0_i32_1 = arith.constant 0 : i32
    return %c0_i32, %c0_i32_0 : i32, i32
  }
  func.func @transform_7(%arg0: i32) -> (i32, i32) {
    %c0_i32 = arith.constant 0 : i32
    %c0_i32_0 = arith.constant 0 : i32
    %c0_i32_1 = arith.constant 0 : i32
    return %c0_i32, %c0_i32_0 : i32, i32
  }
  func.func @transform_8(%arg0: i32) -> (i32, i32) {
    %c0_i32 = arith.constant 0 : i32
    %c0_i32_0 = arith.constant 0 : i32
    %c0_i32_1 = arith.constant 0 : i32
    return %c0_i32, %c0_i32_0 : i32, i32
  }
  func.func @transform_9(%arg0: i32) -> (i32, i32) {
    %c0_i32 = arith.constant 0 : i32
    %c0_i32_0 = arith.constant 0 : i32
    %c0_i32_1 = arith.constant 0 : i32
    return %c0_i32, %c0_i32_0 : i32, i32
  }
  func.func @transform_10(%arg0: i32) -> (i32, i32) {
    %c0_i32 = arith.constant 0 : i32
    %c0_i32_0 = arith.constant 0 : i32
    %c0_i32_1 = arith.constant 0 : i32
    return %c0_i32, %c0_i32_0 : i32, i32
  }
  func.func @transform_11(%arg0: i32) -> (i32, i32) {
    %c0_i32 = arith.constant 0 : i32
    %c0_i32_0 = arith.constant 0 : i32
    %c0_i32_1 = arith.constant 0 : i32
    return %c0_i32, %c0_i32_0 : i32, i32
  }
  func.func @transform_12(%arg0: i32) -> (i32, i32) {
    %c0_i32 = arith.constant 0 : i32
    %c0_i32_0 = arith.constant 0 : i32
    %c0_i32_1 = arith.constant 0 : i32
    return %c0_i32, %c0_i32_0 : i32, i32
  }
  func.func @transform_13(%arg0: i32) -> (i32, i32) {
    %c0_i32 = arith.constant 0 : i32
    %c0_i32_0 = arith.constant 0 : i32
    %c0_i32_1 = arith.constant 0 : i32
    return %c0_i32, %c0_i32_0 : i32, i32
  }
  func.func @transform_14(%arg0: i32) -> (i32, i32) {
    %c0_i32 = arith.constant 0 : i32
    %c0_i32_0 = arith.constant 0 : i32
    %c0_i32_1 = arith.constant 0 : i32
    return %c0_i32, %c0_i32_0 : i32, i32
  }
  func.func @transform_15(%arg0: i32) -> (i32, i32) {
    %c0_i32 = arith.constant 0 : i32
    %c0_i32_0 = arith.constant 0 : i32
    %c0_i32_1 = arith.constant 0 : i32
    return %c0_i32, %c0_i32_0 : i32, i32
  }
  func.func @transform_16(%arg0: i32) -> (i32, i32) {
    %c0_i32 = arith.constant 0 : i32
    %c0_i32_0 = arith.constant 0 : i32
    %c0_i32_1 = arith.constant 0 : i32
    return %c0_i32, %c0_i32_0 : i32, i32
  }
  func.func @transform_17(%arg0: i32) -> (i32, i32) {
    %c0_i32 = arith.constant 0 : i32
    %c0_i32_0 = arith.constant 0 : i32
    %c0_i32_1 = arith.constant 0 : i32
    return %c0_i32, %c0_i32_0 : i32, i32
  }
  func.func @transform_18(%arg0: i32) -> (i32, i32) {
    %c0_i32 = arith.constant 0 : i32
    %c0_i32_0 = arith.constant 0 : i32
    return %arg0, %c0_i32 : i32, i32
  }
  func.func @transform_19(%arg0: i32) -> (i32, i32) {
    %c0_i32 = arith.constant 0 : i32
    %c0_i32_0 = arith.constant 0 : i32
    return %arg0, %c0_i32 : i32, i32
  }
}

</mosaic_0001>

<bundles_post_ra>
// kernel: vae_forward.1
= control target key start
LH: loop header
LB: loop body
LE: loop exit
PB: predicated region body
PF: predicated region fallthrough
CT: control target
= control target key end

     0   :  { %s10212_s0 = inlined_call_operand.vmem [shape: bf16[256,896], index: 0, kind: input, shape index: {}]   ;;  %s10213_s1 = inlined_call_operand.vmem [shape: f32[256,2], index: 1, kind: input, shape index: {}]   ;;  %s10214_s2 = inlined_call_operand.vmem [shape: bf16[896,256], index: 2, kind: input, shape index: {}]   ;;  %s10215_s3 = inlined_call_operand.vmem [shape: f32[1,256], index: 3, kind: input, shape index: {}]   ;;  %s10216_s4 = inlined_call_operand.vmem [shape: bf16[256,64], index: 4, kind: input, shape index: {}]   ;;  %s10217_s5 = inlined_call_operand.vmem [shape: f32[1,64], index: 5, kind: input, shape index: {}]   ;;  %s10218_s6 = inlined_call_operand.vmem [shape: f32[64,16], index: 6, kind: input, shape index: {}]   ;;  %s10219_s7 = inlined_call_operand.vmem [shape: f32[1,16], index: 7, kind: input, shape index: {}]   ;;  %s10220_s8 = inlined_call_operand.vmem [shape: f32[16,4], index: 8, kind: input, shape index: {}]   ;;  %s10221_s9 = inlined_call_operand.vmem [shape: f32[1,4], index: 9, kind: input, shape index: {}]   ;;  %s10222_s10 = inlined_call_operand.vmem [shape: f32[2,16], index: 10, kind: input, shape index: {}]   ;;  %s10223_s11 = inlined_call_operand.vmem [shape: f32[1,16], index: 11, kind: input, shape index: {}]   ;;  %s10224_s12 = inlined_call_operand.vmem [shape: f32[16,64], index: 12, kind: input, shape index: {}]   ;;  %s10225_s13 = inlined_call_operand.vmem [shape: f32[1,64], index: 13, kind: input, shape index: {}]   ;;  %s10226_s14 = inlined_call_operand.vmem [shape: bf16[64,256], index: 14, kind: input, shape index: {}]   ;;  %s10227_s15 = inlined_call_operand.vmem [shape: f32[1,256], index: 15, kind: input, shape index: {}]   ;;  %s10228_s16 = inlined_call_operand.vmem [shape: bf16[256,896], index: 16, kind: input, shape index: {}]   ;;  %s10229_s17 = inlined_call_operand.vmem [shape: f32[1,896], index: 17, kind: input, shape index: {}]   ;;  %s10230_s18 = inlined_call_operand.vmem [shape: bf16[256,896], index: 18, kind: output, shape index: {0}]   ;;  %s10231_s19 = inlined_call_operand.vmem [shape: f32[256,4], index: 19, kind: output, shape index: {1}]  }
   0x1   :  { %10233 = sst [smem:[#allocation2_spill]] %s10212_s0  ;;  %s8291_s0 = smov 0  }
   0x2   :  { %10234 = sst [smem:[#allocation3_spill]] %s10213_s1 }
   0x3   :  { %10235 = sst [smem:[#allocation4_spill]] %s10214_s2 }
   0x4   :  { %10236 = sst [smem:[#allocation5_spill]] %s10215_s3 }
   0x5 LB: > { %s6150_s30 = sadd.s32 4294967295, %s8185_s0   ;;  %p6154_p0 = scmp.ge.s32.totalorder %s8185_s0, 1  ;;  %s8185_s0 = sphi %s8291_s0, %s30_s0  }
   0x6   : > { %p553_p1 = scmp.lt.s32.totalorder %s8185_s0, 3 }
   0x8   : > { %p554_p2 = pnand %p6154_p0, %p553_p1 }
   0x9   : > { %s10237_s1 = sld [smem:[#allocation4_spill]] (!%p554_p2)  ;;  %s6155_s28 = sshll.u32 (!%p554_p2), %s6150_s30, 4  ;;  %vm2447_vm0 = vcmask (!%p554_p2), 523264   ;;  %vm2650_vm1 = vcmask (!%p554_p2), 130048   ;;  %vm6029_vm2 = vcmask (!%p554_p2), 31744  }
   0xa   : > { %557 = sbr.rel (%p554_p2) target bundleno = 2321 (0x911), region = 92  ;;  %p622_p3 = scmp.lt.s32.totalorder (!%p554_p2), %s6155_s28, 31 }
   0xb   : > { %s10238_s23 = sld [smem:[#allocation2_spill]] (!%p554_p2)  ;;  %s10239_s22 = sld [smem:[#allocation5_spill]] (!%p554_p2) }
   0xf   : > { %v7262_v0 = vld [vmem:[%s10237_s1 + $0x4] ss:$8 sps:$4 sm:$0xff] (!%p554_p2)   ;;  %v7264_v1 = vld [vmem:[%s10237_s1] ss:$8 sps:$4 sm:$0xff] (!%p554_p2)   ;;  %v7265_v2 = vld [vmem:[%s10237_s1 + $0x14] ss:$8 sps:$4 sm:$0xff] (!%p554_p2)  }
  0x10   : > { %1684 = vmatprep.subr.bf16.mxu0 (!%p554_p2), %v7262_v0  ;;  %v7267_v3 = vld [vmem:[%s10237_s1 + $0x10] ss:$8 sps:$4 sm:$0xff] (!%p554_p2)   ;;  %v7268_v4 = vld [vmem:[%s10237_s1 + $0x24] ss:$8 sps:$4 sm:$0xff] (!%p554_p2)   ;;  %v7270_v5 = vld [vmem:[%s10237_s1 + $0x20] ss:$8 sps:$4 sm:$0xff] (!%p554_p2)  }
  0x11   : > { %1685 = vmatpush1.bf16.msra.mxu0 %v7264_v1  ;;  %v7271_v6 = vld [vmem:[%s10237_s1 + $0x34] ss:$8 sps:$4 sm:$0xff]   ;;  %v7273_v7 = vld [vmem:[%s10237_s1 + $0x30] ss:$8 sps:$4 sm:$0xff]   ;;  %s10242_s28 = smov (!%p622_p3, %s6155_s28), 31 }
  0x12   : > { %1686 = vmatprep.subr.bf16.mxu0 %v7265_v2  ;;  %v7274_v8 = vld [vmem:[%s10237_s1 + $0x44] ss:$8 sps:$4 sm:$0xff]   ;;  %v7276_v9 = vld [vmem:[%s10237_s1 + $0x40] ss:$8 sps:$4 sm:$0xff]   ;;  %s7224_s26 = smul.u32 28, %s10242_s28  ;;  %s6158_s29 = sshll.u32 %s10242_s28, 3 }
  0x13   : > { %v7277_v10 = vld [vmem:[%s10237_s1 + $0x54] ss:$8 sps:$4 sm:$0xff]   ;;  %v7279_v11 = vld [vmem:[%s10237_s1 + $0x50] ss:$8 sps:$4 sm:$0xff]   ;;  %v7280_v12 = vld [vmem:[%s10237_s1 + $0x64] ss:$8 sps:$4 sm:$0xff]   ;;  %s8927_s21 = scalar_lea.vmem %s10231_s19, %s6158_s29 }
  0x14   : > { %s8343_s30 = scalar_lea.vmem %s10238_s23, %s7224_s26  ;;  %v7282_v14 = vld [vmem:[%s10237_s1 + $0x60] ss:$8 sps:$4 sm:$0xff]   ;;  %v7283_v15 = vld [vmem:[%s10237_s1 + $0x74] ss:$8 sps:$4 sm:$0xff]   ;;  %v7285_v16 = vld [vmem:[%s10237_s1 + $0x70] ss:$8 sps:$4 sm:$0xff]   ;;  %s9804_s25 = scalar_lea.vmem %s10230_s18, %s7224_s26 }
  0x15   : > { %1687 = vmatpush1.bf16.msra.mxu0 %v7267_v3  ;;  %v7312_v13 = vld [vmem:[%s8343_s30 + $0x4] ss:$28 sps:$4 sm:$0xff]   ;;  %v7289_v19 = vld [vmem:[%s10237_s1 + $0x94] ss:$8 sps:$4 sm:$0xff]   ;;  %v7291_v20 = vld [vmem:[%s10237_s1 + $0x90] ss:$8 sps:$4 sm:$0xff]  }
  0x16   : > { %1688 = vmatprep.subr.bf16.mxu0 %v7268_v4  ;;  %1716 = vmatprep.mubr.bf16.mxu0 %v7312_v13  ;;  %v7286_v17 = vld [vmem:[%s10237_s1 + $0x84] ss:$8 sps:$4 sm:$0xff]   ;;  %v7288_v18 = vld [vmem:[%s10237_s1 + $0x80] ss:$8 sps:$4 sm:$0xff]   ;;  %v7295_v23 = vld [vmem:[%s10237_s1 + $0xb4] ss:$8 sps:$4 sm:$0xff]  }
  0x17   : > { %v7292_v21 = vld [vmem:[%s10237_s1 + $0xa4] ss:$8 sps:$4 sm:$0xff]   ;;  %v7294_v22 = vld [vmem:[%s10237_s1 + $0xa0] ss:$8 sps:$4 sm:$0xff]   ;;  %v7297_v24 = vld [vmem:[%s10237_s1 + $0xb0] ss:$8 sps:$4 sm:$0xff]  }
  0x18   : > { %v7298_v25 = vld [vmem:[%s10237_s1 + $0xc4] ss:$8 sps:$4 sm:$0xff]   ;;  %v7300_v26 = vld [vmem:[%s10237_s1 + $0xc0] ss:$8 sps:$4 sm:$0xff]   ;;  %v7301_v27 = vld [vmem:[%s10237_s1 + $0xd4] ss:$8 sps:$4 sm:$0xff]  }
  0x19   : > { %1689 = vmatpush1.bf16.msra.mxu0 %v7270_v5  ;;  %v7303_v28 = vld [vmem:[%s10237_s1 + $0xd0] ss:$8 sps:$4 sm:$0xff]   ;;  %v7304_v29 = vld [vmem:[%s10237_s1 + $0xe4] ss:$8 sps:$4 sm:$0xff]   ;;  %v7306_v30 = vld [vmem:[%s10237_s1 + $0xe0] ss:$8 sps:$4 sm:$0xff]  }
  0x1a   : > { %1690 = vmatprep.subr.bf16.mxu0 %v7271_v6  ;;  %v7307_v31 = vld [vmem:[%s10237_s1 + $0xf4] ss:$8 sps:$4 sm:$0xff]   ;;  %v7309_v32 = vld [vmem:[%s10237_s1 + $0xf0] ss:$8 sps:$4 sm:$0xff]   ;;  %v7315_v33 = vld [vmem:[%s10237_s1 + $0x104] ss:$8 sps:$4 sm:$0xff]  }
  0x1b   : > { %v7310_v34 = vld [vmem:[%s8343_s30] ss:$28 sps:$4 sm:$0xff]   ;;  %v7316_v38 = vld [vmem:[%s10237_s1 + $0x110] ss:$8 sps:$4 sm:$0xff]   ;;  %v7324_v39 = vld [vmem:[%s10237_s1 + $0x124] ss:$8 sps:$4 sm:$0xff]  }
  0x1c   : > { %v7313_v35 = vld [vmem:[%s10237_s1 + $0x100] ss:$8 sps:$4 sm:$0xff]   ;;  %v7319_v36 = vld [vmem:[%s8343_s30 + $0x3c] ss:$28 sps:$4 sm:$0xff]   ;;  %v7328_v42 = vld [vmem:[%s8343_s30 + $0x74] ss:$28 sps:$4 sm:$0xff]  }
  0x1d   : > { %1691 = vmatpush1.bf16.msra.mxu0 %v7273_v7  ;;  %v7318_v37 = vld [vmem:[%s10237_s1 + $0x114] ss:$8 sps:$4 sm:$0xff]   ;;  %v7322_v41 = vld [vmem:[%s10237_s1 + $0x120] ss:$8 sps:$4 sm:$0xff]   ;;  %v7325_v44 = vld [vmem:[%s10237_s1 + $0x130] ss:$8 sps:$4 sm:$0xff]  }
  0x1e   : > { %1692 = vmatprep.subr.bf16.mxu0 %v7274_v8  ;;  %v7321_v40 = vld [vmem:[%s8343_s30 + $0x38] ss:$28 sps:$4 sm:$0xff]   ;;  %v7333_v45 = vld [vmem:[%s10237_s1 + $0x144] ss:$8 sps:$4 sm:$0xff]   ;;  %v7331_v47 = vld [vmem:[%s10237_s1 + $0x140] ss:$8 sps:$4 sm:$0xff]  }
  0x1f   : > { %v7327_v43 = vld [vmem:[%s10237_s1 + $0x134] ss:$8 sps:$4 sm:$0xff]   ;;  %v7330_v46 = vld [vmem:[%s8343_s30 + $0x70] ss:$28 sps:$4 sm:$0xff]   ;;  %v7339_v52 = vld [vmem:[%s8343_s30 + $0xa8] ss:$28 sps:$4 sm:$0xff]  }
  0x20   : > { %v7337_v48 = vld [vmem:[%s8343_s30 + $0xac] ss:$28 sps:$4 sm:$0xff]   ;;  %v7336_v49 = vld [vmem:[%s10237_s1 + $0x154] ss:$8 sps:$4 sm:$0xff]   ;;  %v7334_v50 = vld [vmem:[%s10237_s1 + $0x150] ss:$8 sps:$4 sm:$0xff]  }
  0x21   : > { %1693 = vmatpush1.bf16.msra.mxu0 %v7276_v9  ;;  %v7342_v51 = vld [vmem:[%s10237_s1 + $0x164] ss:$8 sps:$4 sm:$0xff]   ;;  %v7340_v53 = vld [vmem:[%s10237_s1 + $0x160] ss:$8 sps:$4 sm:$0xff]   ;;  %v7345_v55 = vld [vmem:[%s10237_s1 + $0x174] ss:$8 sps:$4 sm:$0xff]  }
  0x22   : > { %1694 = vmatprep.subr.bf16.mxu0 %v7277_v10  ;;  %v7346_v54 = vld [vmem:[%s8343_s30 + $0xe4] ss:$28 sps:$4 sm:$0xff]   ;;  %v7343_v56 = vld [vmem:[%s10237_s1 + $0x170] ss:$8 sps:$4 sm:$0xff]   ;;  %v7354_v61 = vld [vmem:[%s10237_s1 + $0x194] ss:$8 sps:$4 sm:$0xff]  }
  0x23   : > { %v7351_v57 = vld [vmem:[%s10237_s1 + $0x184] ss:$8 sps:$4 sm:$0xff]   ;;  %v7348_v58 = vld [vmem:[%s8343_s30 + $0xe0] ss:$28 sps:$4 sm:$0xff]   ;;  %v7352_v62 = vld [vmem:[%s10237_s1 + $0x190] ss:$8 sps:$4 sm:$0xff]  }
  0x24   : > { %v7349_v59 = vld [vmem:[%s10237_s1 + $0x180] ss:$8 sps:$4 sm:$0xff]   ;;  %v7355_v60 = vld [vmem:[%s8343_s30 + $0x11c] ss:$28 sps:$4 sm:$0xff]   ;;  %v7360_v63 = vld [vmem:[%s10237_s1 + $0x1a4] ss:$8 sps:$4 sm:$0xff]  }
  0x25   : > { %1695 = vmatpush1.bf16.msra.mxu0 %v7279_v11  ;;  %v7357_v0 = vld [vmem:[%s8343_s30 + $0x118] ss:$28 sps:$4 sm:$0xff]   ;;  %v7358_v1 = vld [vmem:[%s10237_s1 + $0x1a0] ss:$8 sps:$4 sm:$0xff]   ;;  %v7369_v5 = vld [vmem:[%s10237_s1 + $0x1c4] ss:$8 sps:$4 sm:$0xff]  }
  0x26   : > { %1696 = vmatprep.subr.bf16.mxu0 %v7280_v12  ;;  %v7364_v2 = vld [vmem:[%s8343_s30 + $0x154] ss:$28 sps:$4 sm:$0xff]   ;;  %v7367_v7 = vld [vmem:[%s10237_s1 + $0x1c0] ss:$8 sps:$4 sm:$0xff]   ;;  %v7378_v11 = vld [vmem:[%s10237_s1 + $0x1e4] ss:$8 sps:$4 sm:$0xff]  }
  0x27   : > { %v7363_v3 = vld [vmem:[%s10237_s1 + $0x1b4] ss:$8 sps:$4 sm:$0xff]   ;;  %v7361_v4 = vld [vmem:[%s10237_s1 + $0x1b0] ss:$8 sps:$4 sm:$0xff]   ;;  %v7373_v8 = vld [vmem:[%s8343_s30 + $0x18c] ss:$28 sps:$4 sm:$0xff]  }
  0x28   : > { %v7366_v6 = vld [vmem:[%s8343_s30 + $0x150] ss:$28 sps:$4 sm:$0xff]   ;;  %v7372_v9 = vld [vmem:[%s10237_s1 + $0x1d4] ss:$8 sps:$4 sm:$0xff]   ;;  %v7375_v12 = vld [vmem:[%s8343_s30 + $0x188] ss:$28 sps:$4 sm:$0xff]  }
  0x29   : > { %1697 = vmatpush1.bf16.msra.mxu0 %v7282_v14  ;;  %v7370_v10 = vld [vmem:[%s10237_s1 + $0x1d0] ss:$8 sps:$4 sm:$0xff]   ;;  %v7376_v13 = vld [vmem:[%s10237_s1 + $0x1e0] ss:$8 sps:$4 sm:$0xff]   ;;  %s8188_s23 = smov 2  }
  0x2a   : > { %1698 = vmatprep.subr.bf16.mxu0 %v7283_v15  ;;  %v7384_v14 = vld [vmem:[%s8343_s30 + $0xc] ss:$28 sps:$4 sm:$0xff]   ;;  %v7381_v15 = vld [vmem:[%s10237_s1 + $0x1f4] ss:$8 sps:$4 sm:$0xff]  }
  0x2d   : > { %1699 = vmatpush1.bf16.msra.mxu0 %v7285_v16  ;;  %v7379_v16 = vld [vmem:[%s10237_s1 + $0x1f0] ss:$8 sps:$4 sm:$0xff]  }
  0x2e   : > { %1700 = vmatprep.subr.bf16.mxu0 %v7286_v17  ;;  %v7387_v17 = vld [vmem:[%s10237_s1 + $0x204] ss:$8 sps:$4 sm:$0xff]  }
  0x31   : > { %1701 = vmatpush1.bf16.msra.mxu0 %v7288_v18  ;;  %v7382_v18 = vld [vmem:[%s8343_s30 + $0x8] ss:$28 sps:$4 sm:$0xff]  }
  0x32   : > { %1702 = vmatprep.subr.bf16.mxu0 %v7289_v19  ;;  %v8187_v19 = vmov 0  }
  0x33   : > { %7237 = vset.pattern.permute.xlu1 %v8187_v19 }
  0x35   : > { %1703 = vmatpush1.bf16.msra.mxu0 %v7291_v20  ;;  %v7385_v20 = vld [vmem:[%s10237_s1 + $0x200] ss:$8 sps:$4 sm:$0xff]  }
  0x36   : > { %1704 = vmatprep.subr.bf16.mxu0 %v7292_v21  ;;  %v7391_v21 = vld [vmem:[%s8343_s30 + $0x44] ss:$28 sps:$4 sm:$0xff]  }
  0x39   : > { %1705 = vmatpush1.bf16.msra.mxu0 %v7294_v22  ;;  %v7390_v22 = vld [vmem:[%s10237_s1 + $0x214] ss:$8 sps:$4 sm:$0xff]  }
  0x3a   : > { %1706 = vmatprep.subr.bf16.mxu0 %v7295_v23  ;;  %v7388_v23 = vld [vmem:[%s10237_s1 + $0x210] ss:$8 sps:$4 sm:$0xff]  }
  0x3d   : > { %1707 = vmatpush1.bf16.msra.mxu0 %v7297_v24  ;;  %v7396_v24 = vld [vmem:[%s10237_s1 + $0x224] ss:$8 sps:$4 sm:$0xff]  }
  0x3e   : > { %1708 = vmatprep.subr.bf16.mxu0 %v7298_v25  ;;  %v7393_v25 = vld [vmem:[%s8343_s30 + $0x40] ss:$28 sps:$4 sm:$0xff]  }
  0x41   : > { %1709 = vmatpush1.bf16.msra.mxu0 %v7300_v26  ;;  %v7394_v26 = vld [vmem:[%s10237_s1 + $0x220] ss:$8 sps:$4 sm:$0xff]  }
  0x42   : > { %1710 = vmatprep.subr.bf16.mxu0 %v7301_v27  ;;  %v7400_v27 = vld [vmem:[%s8343_s30 + $0x7c] ss:$28 sps:$4 sm:$0xff]  }
  0x45   : > { %1711 = vmatpush1.bf16.msra.mxu0 %v7303_v28  ;;  %v7399_v28 = vld [vmem:[%s10237_s1 + $0x234] ss:$8 sps:$4 sm:$0xff]  }
  0x46   : > { %1712 = vmatprep.subr.bf16.mxu0 %v7304_v29  ;;  %v7397_v29 = vld [vmem:[%s10237_s1 + $0x230] ss:$8 sps:$4 sm:$0xff]  }
  0x49   : > { %1713 = vmatpush1.bf16.msra.mxu0 %v7306_v30  ;;  %v7405_v30 = vld [vmem:[%s10237_s1 + $0x244] ss:$8 sps:$4 sm:$0xff]  }
  0x4a   : > { %1714 = vmatprep.subr.bf16.mxu0 %v7307_v31  ;;  %v7402_v31 = vld [vmem:[%s8343_s30 + $0x78] ss:$28 sps:$4 sm:$0xff]  }
  0x4d   : > { %1715 = vmatpush1.bf16.msra.mxu0 %v7309_v32  ;;  %v7403_v32 = vld [vmem:[%s10237_s1 + $0x240] ss:$8 sps:$4 sm:$0xff]  }
  0x4e   : > { %1797 = vmatprep.subr.bf16.mxu0 %v7315_v33  ;;  %v7409_v33 = vld [vmem:[%s8343_s30 + $0xb4] ss:$28 sps:$4 sm:$0xff]  }
  0x50   : > { %1717 = vmatmul.mubr.bf16.vlgmr.msra.gmra.mrb[0].mxu0 %v7310_v34  ;;  %v7408_v34 = vld [vmem:[%s10237_s1 + $0x254] ss:$8 sps:$4 sm:$0xff]  }
  0x51   : > { %1798 = vmatpush1.bf16.msra.mxu0 %v7313_v35  ;;  %1726 = vmatprep.mubr.bf16.mxu0 %v7319_v36  ;;  %v7406_v35 = vld [vmem:[%s10237_s1 + $0x250] ss:$8 sps:$4 sm:$0xff]   ;;  %v7414_v36 = vld [vmem:[%s10237_s1 + $0x264] ss:$8 sps:$4 sm:$0xff]  }
  0x52   : > { %1799 = vmatprep.subr.bf16.mxu0 %v7318_v37  ;;  %v7411_v37 = vld [vmem:[%s8343_s30 + $0xb0] ss:$28 sps:$4 sm:$0xff]  }
  0x55   : > { %1800 = vmatpush1.bf16.msra.mxu0 %v7316_v38  ;;  %v7412_v38 = vld [vmem:[%s10237_s1 + $0x260] ss:$8 sps:$4 sm:$0xff]  }
  0x56   : > { %1801 = vmatprep.subr.bf16.mxu0 %v7324_v39  ;;  %v7418_v39 = vld [vmem:[%s8343_s30 + $0xec] ss:$28 sps:$4 sm:$0xff]  }
  0x58   : > { %1727 = vmatmul.mubr.bf16.gmra.mrb[4].mxu0 %v7321_v40  ;;  %v7417_v40 = vld [vmem:[%s10237_s1 + $0x274] ss:$8 sps:$4 sm:$0xff]  }
  0x59   : > { %1802 = vmatpush1.bf16.msra.mxu0 %v7322_v41  ;;  %1736 = vmatprep.mubr.bf16.mxu0 %v7328_v42  ;;  %v7415_v41 = vld [vmem:[%s10237_s1 + $0x270] ss:$8 sps:$4 sm:$0xff]   ;;  %v7423_v42 = vld [vmem:[%s10237_s1 + $0x284] ss:$8 sps:$4 sm:$0xff]  }
  0x5a   : > { %1803 = vmatprep.subr.bf16.mxu0 %v7327_v43  ;;  %v7420_v43 = vld [vmem:[%s8343_s30 + $0xe8] ss:$28 sps:$4 sm:$0xff]  }
  0x5d   : > { %1804 = vmatpush1.bf16.msra.mxu0 %v7325_v44  ;;  %v7421_v44 = vld [vmem:[%s10237_s1 + $0x280] ss:$8 sps:$4 sm:$0xff]  }
  0x5e   : > { %1805 = vmatprep.subr.bf16.mxu0 %v7333_v45  ;;  %v7427_v45 = vld [vmem:[%s8343_s30 + $0x124] ss:$28 sps:$4 sm:$0xff]  }
  0x60   : > { %1737 = vmatmul.mubr.bf16.gmra.mrb[8].mxu0 %v7330_v46  ;;  %v7426_v46 = vld [vmem:[%s10237_s1 + $0x294] ss:$8 sps:$4 sm:$0xff]  }
  0x61   : > { %1806 = vmatpush1.bf16.msra.mxu0 %v7331_v47  ;;  %1746 = vmatprep.mubr.bf16.mxu0 %v7337_v48  ;;  %v7424_v47 = vld [vmem:[%s10237_s1 + $0x290] ss:$8 sps:$4 sm:$0xff]   ;;  %v7432_v48 = vld [vmem:[%s10237_s1 + $0x2a4] ss:$8 sps:$4 sm:$0xff]  }
  0x62   : > { %1807 = vmatprep.subr.bf16.mxu0 %v7336_v49  ;;  %v7429_v49 = vld [vmem:[%s8343_s30 + $0x120] ss:$28 sps:$4 sm:$0xff]  }
  0x65   : > { %1808 = vmatpush1.bf16.msra.mxu0 %v7334_v50  ;;  %v7430_v50 = vld [vmem:[%s10237_s1 + $0x2a0] ss:$8 sps:$4 sm:$0xff]  }
  0x66   : > { %1809 = vmatprep.subr.bf16.mxu0 %v7342_v51  ;;  %v7436_v51 = vld [vmem:[%s8343_s30 + $0x15c] ss:$28 sps:$4 sm:$0xff]  }
  0x68   : > { %1747 = vmatmul.mubr.bf16.gmra.mrb[12].mxu0 %v7339_v52  ;;  %v7435_v52 = vld [vmem:[%s10237_s1 + $0x2b4] ss:$8 sps:$4 sm:$0xff]  }
  0x69   : > { %1810 = vmatpush1.bf16.msra.mxu0 %v7340_v53  ;;  %1756 = vmatprep.mubr.bf16.mxu0 %v7346_v54  ;;  %v7433_v53 = vld [vmem:[%s10237_s1 + $0x2b0] ss:$8 sps:$4 sm:$0xff]   ;;  %v7441_v54 = vld [vmem:[%s10237_s1 + $0x2c4] ss:$8 sps:$4 sm:$0xff]  }
  0x6a   : > { %1811 = vmatprep.subr.bf16.mxu0 %v7345_v55  ;;  %v7438_v55 = vld [vmem:[%s8343_s30 + $0x158] ss:$28 sps:$4 sm:$0xff]  }
  0x6d   : > { %1812 = vmatpush1.bf16.msra.mxu0 %v7343_v56  ;;  %v7439_v56 = vld [vmem:[%s10237_s1 + $0x2c0] ss:$8 sps:$4 sm:$0xff]  }
  0x6e   : > { %1813 = vmatprep.subr.bf16.mxu0 %v7351_v57  ;;  %v7445_v57 = vld [vmem:[%s8343_s30 + $0x194] ss:$28 sps:$4 sm:$0xff]  }
  0x70   : > { %1757 = vmatmul.mubr.bf16.gmra.mrb[16].mxu0 %v7348_v58  ;;  %v7444_v58 = vld [vmem:[%s10237_s1 + $0x2d4] ss:$8 sps:$4 sm:$0xff]  }
  0x71   : > { %1814 = vmatpush1.bf16.msra.mxu0 %v7349_v59  ;;  %1766 = vmatprep.mubr.bf16.mxu0 %v7355_v60  ;;  %v7442_v59 = vld [vmem:[%s10237_s1 + $0x2d0] ss:$8 sps:$4 sm:$0xff]   ;;  %v7450_v60 = vld [vmem:[%s10237_s1 + $0x2e4] ss:$8 sps:$4 sm:$0xff]  }
  0x72   : > { %1815 = vmatprep.subr.bf16.mxu0 %v7354_v61  ;;  %v7447_v61 = vld [vmem:[%s8343_s30 + $0x190] ss:$28 sps:$4 sm:$0xff]  }
  0x75   : > { %1816 = vmatpush1.bf16.msra.mxu0 %v7352_v62  ;;  %v7448_v62 = vld [vmem:[%s10237_s1 + $0x2e0] ss:$8 sps:$4 sm:$0xff]  }
  0x76   : > { %1817 = vmatprep.subr.bf16.mxu0 %v7360_v63  ;;  %v7456_v63 = vld [vmem:[%s8343_s30 + $0x14] ss:$28 sps:$4 sm:$0xff]  }
  0x78   : > { %1767 = vmatmul.mubr.bf16.gmra.mrb[20].mxu0 %v7357_v0  ;;  %v7453_v0 = vld [vmem:[%s10237_s1 + $0x2f4] ss:$8 sps:$4 sm:$0xff]  }
  0x79   : > { %1818 = vmatpush1.bf16.msra.mxu0 %v7358_v1  ;;  %1776 = vmatprep.mubr.bf16.mxu0 %v7364_v2  ;;  %v7510_v1 = vld [vmem:[%s10216_s4 + $0x40] sm:$0xff]  }
  0x7a   : > { %1819 = vmatprep.subr.bf16.mxu0 %v7363_v3  ;;  %v7511_v2 = vld [vmem:[%s10216_s4] sm:$0xff]   ;;  %v7512_v3 = vld [vmem:[%s10216_s4 + $0x48] sm:$0xff]   ;;  %6772 = vmatprep.subr.bf16.mxu1 %v7510_v1 }
  0x7b   : > { %6773 = vmatpush3.bf16.msra.mxu1 %v7511_v2 }
  0x7c   : > { %6774 = vmatprep.subr.bf16.mxu1 %v7512_v3 }
  0x7d   : > { %1820 = vmatpush1.bf16.msra.mxu0 %v7361_v4  ;;  %v7451_v4 = vld [vmem:[%s10237_s1 + $0x2f0] ss:$8 sps:$4 sm:$0xff]  }
  0x7e   : > { %1821 = vmatprep.subr.bf16.mxu0 %v7369_v5  ;;  %v7459_v5 = vld [vmem:[%s10237_s1 + $0x304] ss:$8 sps:$4 sm:$0xff]  }
  0x80   : > { %1777 = vmatmul.mubr.bf16.gmra.mrb[24].mxu0 %v7366_v6  ;;  %v7513_v6 = vld [vmem:[%s10216_s4 + $0x8] sm:$0xff]  }
  0x81   : > { %1822 = vmatpush1.bf16.msra.mxu0 %v7367_v7  ;;  %1786 = vmatprep.mubr.bf16.mxu0 %v7373_v8  ;;  %v7454_v7 = vld [vmem:[%s8343_s30 + $0x10] ss:$28 sps:$4 sm:$0xff]  }
  0x82   : > { %1823 = vmatprep.subr.bf16.mxu0 %v7372_v9  ;;  %v7514_v8 = vld [vmem:[%s10216_s4 + $0x50] sm:$0xff]   ;;  %v7457_v9 = vld [vmem:[%s10237_s1 + $0x300] ss:$8 sps:$4 sm:$0xff]   ;;  %6775 = vmatpush3.bf16.msra.mxu1 %v7513_v6 }
  0x83   : > { %6776 = vmatprep.subr.bf16.mxu1 %v7514_v8 }
  0x85   : > { %1824 = vmatpush1.bf16.msra.mxu0 %v7370_v10  ;;  %v7460_v10 = vld [vmem:[%s8343_s30 + $0x4c] ss:$28 sps:$4 sm:$0xff]  }
  0x86   : > { %1825 = vmatprep.subr.bf16.mxu0 %v7378_v11  ;;  %v7465_v11 = vld [vmem:[%s10237_s1 + $0x314] ss:$8 sps:$4 sm:$0xff]  }
  0x88   : > { %1787 = vmatmul.mubr.bf16.gmra.mrb[28].mxu0 %v7375_v12  ;;  %v7515_v12 = vld [vmem:[%s10216_s4 + $0x10] sm:$0xff]  }
  0x89   : > { %1826 = vmatpush1.bf16.msra.mxu0 %v7376_v13  ;;  %1829 = vmatprep.mubr.bf16.mxu0 %v7384_v14  ;;  %v7516_v13 = vld [vmem:[%s10216_s4 + $0x58] sm:$0xff]  }
  0x8a   : > { %1827 = vmatprep.subr.bf16.mxu0 %v7381_v15  ;;  %v7463_v14 = vld [vmem:[%s10237_s1 + $0x310] ss:$8 sps:$4 sm:$0xff]   ;;  %v7471_v15 = vld [vmem:[%s10237_s1 + $0x324] ss:$8 sps:$4 sm:$0xff]   ;;  %6777 = vmatpush3.bf16.msra.mxu1 %v7515_v12 }
  0x8b   : > { %6778 = vmatprep.subr.bf16.mxu1 %v7516_v13 }
  0x8d   : > { %1828 = vmatpush1.bf16.msra.mxu0 %v7379_v16  ;;  %v7517_v16 = vld [vmem:[%s10216_s4 + $0x18] sm:$0xff]  }
  0x8e   : > { %1910 = vmatprep.subr.bf16.mxu0 %v7387_v17  ;;  %v7462_v17 = vld [vmem:[%s8343_s30 + $0x48] ss:$28 sps:$4 sm:$0xff]   ;;  %6779 = vmatpush3.bf16.msra.mxu1 %v7517_v16  ;;  %v2434_v16 = vld [vmem:[%s10218_s6 + $0x10] sm:$0xff] }
  0x90   : > { %1830 = vmatmul.mubr.bf16.vlgmr.msra.gmra.mrb[0].mxu0 %v7382_v18  ;;  %v7518_v18 = vld [vmem:[%s10216_s4 + $0x60] sm:$0xff]  }
  0x91   : > { %1911 = vmatpush1.bf16.msra.mxu0 %v7385_v20  ;;  %1839 = vmatprep.mubr.bf16.mxu0 %v7391_v21  ;;  %v7466_v20 = vld [vmem:[%s8343_s30 + $0x84] ss:$28 sps:$4 sm:$0xff]  }
  0x92   : > { %1912 = vmatprep.subr.bf16.mxu0 %v7390_v22  ;;  %v7469_v21 = vld [vmem:[%s10237_s1 + $0x320] ss:$8 sps:$4 sm:$0xff]   ;;  %v7477_v22 = vld [vmem:[%s10237_s1 + $0x334] ss:$8 sps:$4 sm:$0xff]   ;;  %6780 = vmatprep.subr.bf16.mxu1 %v7518_v18 }
  0x95   : > { %1913 = vmatpush1.bf16.msra.mxu0 %v7388_v23  ;;  %v7519_v23 = vld [vmem:[%s10216_s4 + $0x20] sm:$0xff]  }
  0x96   : > { %1914 = vmatprep.subr.bf16.mxu0 %v7396_v24  ;;  %v7520_v24 = vld [vmem:[%s10216_s4 + $0x68] sm:$0xff]   ;;  %6781 = vmatpush3.bf16.msra.mxu1 %v7519_v23 }
  0x97   : > { %6782 = vmatprep.subr.bf16.mxu1 %v7520_v24 }
  0x98   : > { %1840 = vmatmul.mubr.bf16.gmra.mrb[4].mxu0 %v7393_v25  ;;  %v7475_v25 = vld [vmem:[%s10237_s1 + $0x330] ss:$8 sps:$4 sm:$0xff]  }
  0x99   : > { %1915 = vmatpush1.bf16.msra.mxu0 %v7394_v26  ;;  %1849 = vmatprep.mubr.bf16.mxu0 %v7400_v27  ;;  %v7483_v26 = vld [vmem:[%s10237_s1 + $0x344] ss:$8 sps:$4 sm:$0xff]   ;;  %v7468_v27 = vld [vmem:[%s8343_s30 + $0x80] ss:$28 sps:$4 sm:$0xff]  }
  0x9a   : > { %1916 = vmatprep.subr.bf16.mxu0 %v7399_v28  ;;  %v7472_v28 = vld [vmem:[%s8343_s30 + $0xbc] ss:$28 sps:$4 sm:$0xff]  }
  0x9d   : > { %1917 = vmatpush1.bf16.msra.mxu0 %v7397_v29  ;;  %v7481_v29 = vld [vmem:[%s10237_s1 + $0x340] ss:$8 sps:$4 sm:$0xff]  }
  0x9e   : > { %1918 = vmatprep.subr.bf16.mxu0 %v7405_v30  ;;  %v7489_v30 = vld [vmem:[%s10237_s1 + $0x354] ss:$8 sps:$4 sm:$0xff]  }
  0xa0   : > { %1850 = vmatmul.mubr.bf16.gmra.mrb[8].mxu0 %v7402_v31  ;;  %v7487_v31 = vld [vmem:[%s10237_s1 + $0x350] ss:$8 sps:$4 sm:$0xff]  }
  0xa1   : > { %1919 = vmatpush1.bf16.msra.mxu0 %v7403_v32  ;;  %1859 = vmatprep.mubr.bf16.mxu0 %v7409_v33  ;;  %v7495_v32 = vld [vmem:[%s10237_s1 + $0x364] ss:$8 sps:$4 sm:$0xff]   ;;  %v7474_v33 = vld [vmem:[%s8343_s30 + $0xb8] ss:$28 sps:$4 sm:$0xff]  }
  0xa2   : > { %1920 = vmatprep.subr.bf16.mxu0 %v7408_v34  ;;  %v7478_v34 = vld [vmem:[%s8343_s30 + $0xf4] ss:$28 sps:$4 sm:$0xff]  }
  0xa5   : > { %1921 = vmatpush1.bf16.msra.mxu0 %v7406_v35  ;;  %v7493_v35 = vld [vmem:[%s10237_s1 + $0x360] ss:$8 sps:$4 sm:$0xff]  }
  0xa6   : > { %1922 = vmatprep.subr.bf16.mxu0 %v7414_v36  ;;  %v7501_v36 = vld [vmem:[%s10237_s1 + $0x374] ss:$8 sps:$4 sm:$0xff]  }
  0xa8   : > { %1860 = vmatmul.mubr.bf16.gmra.mrb[12].mxu0 %v7411_v37  ;;  %v7499_v37 = vld [vmem:[%s10237_s1 + $0x370] ss:$8 sps:$4 sm:$0xff]  }
  0xa9   : > { %1923 = vmatpush1.bf16.msra.mxu0 %v7412_v38  ;;  %1869 = vmatprep.mubr.bf16.mxu0 %v7418_v39  ;;  %v7480_v38 = vld [vmem:[%s8343_s30 + $0xf0] ss:$28 sps:$4 sm:$0xff]  }
  0xaa   : > { %1924 = vmatprep.subr.bf16.mxu0 %v7417_v40  ;;  %v7484_v39 = vld [vmem:[%s8343_s30 + $0x12c] ss:$28 sps:$4 sm:$0xff]  }
  0xab   : > { %v7486_v40 = vld [vmem:[%s8343_s30 + $0x128] ss:$28 sps:$4 sm:$0xff]  }
  0xad   : > { %1925 = vmatpush1.bf16.msra.mxu0 %v7415_v41  ;;  %v7490_v41 = vld [vmem:[%s8343_s30 + $0x164] ss:$28 sps:$4 sm:$0xff]  }
  0xae   : > { %1926 = vmatprep.subr.bf16.mxu0 %v7423_v42  ;;  %v7492_v42 = vld [vmem:[%s8343_s30 + $0x160] ss:$28 sps:$4 sm:$0xff]  }
  0xb0   : > { %1870 = vmatmul.mubr.bf16.gmra.mrb[16].mxu0 %v7420_v43  ;;  %v7496_v43 = vld [vmem:[%s8343_s30 + $0x19c] ss:$28 sps:$4 sm:$0xff]  }
  0xb1   : > { %1927 = vmatpush1.bf16.msra.mxu0 %v7421_v44  ;;  %1879 = vmatprep.mubr.bf16.mxu0 %v7427_v45  ;;  %v7498_v44 = vld [vmem:[%s8343_s30 + $0x198] ss:$28 sps:$4 sm:$0xff]  }
  0xb2   : > { %1928 = vmatprep.subr.bf16.mxu0 %v7426_v46  ;;  %v7502_v45 = vld [vmem:[%s8343_s30 + $0x18] ss:$28 sps:$4 sm:$0xff]   ;;  %v7503_v46 = vld [vmem:[%s8343_s30 + $0x50] ss:$28 sps:$4 sm:$0xff]  }
  0xb5   : > { %1929 = vmatpush1.bf16.msra.mxu0 %v7424_v47  ;;  %v7504_v47 = vld [vmem:[%s8343_s30 + $0x88] ss:$28 sps:$4 sm:$0xff]  }
  0xb6   : > { %1930 = vmatprep.subr.bf16.mxu0 %v7432_v48  ;;  %v7505_v48 = vld [vmem:[%s8343_s30 + $0xc0] ss:$28 sps:$4 sm:$0xff]  }
  0xb8   : > { %1880 = vmatmul.mubr.bf16.gmra.mrb[20].mxu0 %v7429_v49  ;;  %v7506_v49 = vld [vmem:[%s8343_s30 + $0xf8] ss:$28 sps:$4 sm:$0xff]  }
  0xb9   : > { %1931 = vmatpush1.bf16.msra.mxu0 %v7430_v50  ;;  %1889 = vmatprep.mubr.bf16.mxu0 %v7436_v51  ;;  %v7507_v50 = vld [vmem:[%s8343_s30 + $0x130] ss:$28 sps:$4 sm:$0xff]   ;;  %v7508_v51 = vld [vmem:[%s8343_s30 + $0x168] ss:$28 sps:$4 sm:$0xff]  }
  0xba   : > { %1932 = vmatprep.subr.bf16.mxu0 %v7435_v52  ;;  %v7509_v52 = vld [vmem:[%s8343_s30 + $0x1a0] ss:$28 sps:$4 sm:$0xff]  }
  0xbd   : > { %1933 = vmatpush1.bf16.msra.mxu0 %v7433_v53  ;;  %v7521_v53 = vld [vmem:[%s10216_s4 + $0x28] sm:$0xff]  }
  0xbe   : > { %1934 = vmatprep.subr.bf16.mxu0 %v7441_v54  ;;  %6783 = vmatpush3.bf16.msra.mxu1 %v7521_v53  ;;  %v7522_v54 = vld [vmem:[%s10216_s4 + $0x70] sm:$0xff]  }
  0xbf   : > { %6784 = vmatprep.subr.bf16.mxu1 %v7522_v54 }
  0xc0   : > { %1890 = vmatmul.mubr.bf16.gmra.mrb[24].mxu0 %v7438_v55  ;;  %v7523_v55 = vld [vmem:[%s10216_s4 + $0x30] sm:$0xff]  }
  0xc1   : > { %1935 = vmatpush1.bf16.msra.mxu0 %v7439_v56  ;;  %1899 = vmatprep.mubr.bf16.mxu0 %v7445_v57  ;;  %v7524_v56 = vld [vmem:[%s10216_s4 + $0x78] sm:$0xff]  }
  0xc2   : > { %1936 = vmatprep.subr.bf16.mxu0 %v7444_v58  ;;  %6785 = vmatpush3.bf16.msra.mxu1 %v7523_v55  ;;  %v7525_v57 = vld [vmem:[%s10216_s4 + $0x38] sm:$0xff]   ;;  %v2432_v58 = vld [vmem:[%s10218_s6] sm:$0xff] }
  0xc3   : > { %6786 = vmatprep.subr.bf16.mxu1 %v7524_v56 }
  0xc5   : > { %1937 = vmatpush1.bf16.msra.mxu0 %v7442_v59  ;;  %v2433_v59 = vld [vmem:[%s10218_s6 + $0x8] sm:$0xff] }
  0xc6   : > { %1938 = vmatprep.subr.bf16.mxu0 %v7450_v60  ;;  %6787 = vmatpush3.bf16.msra.mxu1 %v7525_v57  ;;  %v7056_v60 = vpack.c.bf16 %v2433_v59, %v2432_v58 }
  0xc8   : > { %1900 = vmatmul.mubr.bf16.gmra.mrb[28].mxu0 %v7447_v61  ;;  %7057 = vmatprep.subr.bf16.mxu1 %v7056_v60  ;;  %v826_v61 = vlaneseq }
  0xc9   : > { %1939 = vmatpush1.bf16.msra.mxu0 %v7448_v62  ;;  %1942 = vmatprep.mubr.bf16.mxu0 %v7456_v63 }
  0xca   : > { %1940 = vmatprep.subr.bf16.mxu0 %v7453_v0  ;;  %v8764_v62 = vshrl.u32 %v826_v61, 7  ;;  %v824_v0 = vld [vmem:[%s10239_s22] sm:$0x3]  ;;  %s10240_s22 = sld [smem:[#allocation3_spill]] }
  0xcc   : > { %v8767_v63 = vsub.s32 0, %v8764_v62  ;;  %v8773_v1 = vsub.s32 1, %v8764_v62 }
  0xcd   : > { %1941 = vmatpush1.bf16.msra.mxu0 %v7451_v4 }
  0xce   : > { %2023 = vmatprep.subr.bf16.mxu0 %v7459_v5  ;;  %v8776_v2 = vrot.slane %v824_v0, %v8767_v63  ;;  %v8779_v3 = vrot.slane %v824_v0, %v8773_v1 }
  0xd0   : > { %1943 = vmatmul.mubr.bf16.vlgmr.msra.gmra.mrb[0].mxu0 %v7454_v7  ;;  %s8880_s2 = scalar_lea.vmem %s10240_s22, %s6158_s29  ;;  %s8190_s29 = smov 126  }
  0xd1   : > { %2024 = vmatpush1.bf16.msra.mxu0 %v7457_v9  ;;  %1952 = vmatprep.mubr.bf16.mxu0 %v7460_v10 }
  0xd2   : > { %2025 = vmatprep.subr.bf16.mxu0 %v7465_v11 }
  0xd5   : > { %2026 = vmatpush1.bf16.msra.mxu0 %v7463_v14 }
  0xd6   : > { %2027 = vmatprep.subr.bf16.mxu0 %v7471_v15 }
  0xd8   : > { %1953 = vmatmul.mubr.bf16.gmra.mrb[4].mxu0 %v7462_v17  ;;  %v2435_v17 = vld [vmem:[%s10218_s6 + $0x18] sm:$0xff] }
  0xd9   : > { %1962 = vmatprep.mubr.bf16.mxu0 %v7466_v20  ;;  %2028 = vmatpush1.bf16.msra.mxu0 %v7469_v21  ;;  %v7060_v24 = vpack.c.bf16 %v2435_v17, %v2434_v16 }
  0xda   : > { %2029 = vmatprep.subr.bf16.mxu0 %v7477_v22 }
  0xdd   : > { %2030 = vmatpush1.bf16.msra.mxu0 %v7475_v25 }
  0xde   : > { %2031 = vmatprep.subr.bf16.mxu0 %v7483_v26 }
  0xe0   : > { %1963 = vmatmul.mubr.bf16.gmra.mrb[8].mxu0 %v7468_v27  ;;  %v2436_v27 = vld [vmem:[%s10218_s6 + $0x20] sm:$0xff] }
  0xe1   : > { %1972 = vmatprep.mubr.bf16.mxu0 %v7472_v28  ;;  %2032 = vmatpush1.bf16.msra.mxu0 %v7481_v29  ;;  %v2437_v28 = vld [vmem:[%s10218_s6 + $0x28] sm:$0xff] }
  0xe2   : > { %2033 = vmatprep.subr.bf16.mxu0 %v7489_v30 }
  0xe5   : > { %2034 = vmatpush1.bf16.msra.mxu0 %v7487_v31 }
  0xe6   : > { %2035 = vmatprep.subr.bf16.mxu0 %v7495_v32 }
  0xe8   : > { %1973 = vmatmul.mubr.bf16.gmra.mrb[12].mxu0 %v7474_v33 }
  0xe9   : > { %1982 = vmatprep.mubr.bf16.mxu0 %v7478_v34  ;;  %2036 = vmatpush1.bf16.msra.mxu0 %v7493_v35  ;;  %v7064_v34 = vpack.c.bf16 %v2437_v28, %v2436_v27 }
  0xea   : > { %2037 = vmatprep.subr.bf16.mxu0 %v7501_v36 }
  0xed   : > { %2038 = vmatpush1.bf16.msra.mxu0 %v7499_v37  ;;  %v2438_v37 = vld [vmem:[%s10218_s6 + $0x30] sm:$0xff] }
  0xf0   : > { %1983 = vmatmul.mubr.bf16.gmra.mrb[16].mxu0 %v7480_v38  ;;  %v2439_v38 = vld [vmem:[%s10218_s6 + $0x38] sm:$0xff] }
  0xf1   : > { %1992 = vmatprep.mubr.bf16.mxu0 %v7484_v39 }
  0xf8   : > { %1993 = vmatmul.mubr.bf16.gmra.mrb[20].mxu0 %v7486_v40 }
  0xf9   : > { %2002 = vmatprep.mubr.bf16.mxu0 %v7490_v41 }
 0x100   : > { %2003 = vmatmul.mubr.bf16.gmra.mrb[24].mxu0 %v7492_v42 }
 0x101   : > { %2012 = vmatprep.mubr.bf16.mxu0 %v7496_v43 }
 0x108   : > { %2013 = vmatmul.mubr.bf16.gmra.mrb[28].mxu0 %v7498_v44  ;;  %v7068_v44 = vpack.c.bf16 %v2439_v38, %v2438_v37 }
 0x109   : > { %2055 = vmatprep.mubr.bf16.mxu0 %v8187_v19 }
 0x110   : > { %2056 = vmatmul.mubr.bf16.vlgmr.msra.gmra.mrb[0].mxu0 %v7502_v45 }
 0x111   : > { %2065 = vmatprep.mubr.bf16.mxu0 %v8187_v19 }
 0x118   : > { %2066 = vmatmul.mubr.bf16.gmra.mrb[4].mxu0 %v7503_v46 }
 0x119   : > { %2075 = vmatprep.mubr.bf16.mxu0 %v8187_v19 }
 0x120   : > { %2076 = vmatmul.mubr.bf16.gmra.mrb[8].mxu0 %v7504_v47 }
 0x121   : > { %2085 = vmatprep.mubr.bf16.mxu0 %v8187_v19 }
 0x128   : > { %2086 = vmatmul.mubr.bf16.gmra.mrb[12].mxu0 %v7505_v48 }
 0x129   : > { %2095 = vmatprep.mubr.bf16.mxu0 %v8187_v19 }
 0x130   : > { %2096 = vmatmul.mubr.bf16.gmra.mrb[16].mxu0 %v7506_v49 }
 0x131   : > { %2105 = vmatprep.mubr.bf16.mxu0 %v8187_v19 }
 0x138   : > { %2106 = vmatmul.mubr.bf16.gmra.mrb[20].mxu0 %v7507_v50 }
 0x139   : > { %2115 = vmatprep.mubr.bf16.mxu0 %v8187_v19 }
 0x140   : > { %2116 = vmatmul.mubr.bf16.gmra.mrb[24].mxu0 %v7508_v51 }
 0x141   : > { %2125 = vmatprep.mubr.bf16.mxu0 %v8187_v19 }
 0x148   : > { %2126 = vmatmul.mubr.bf16.gmra.mrb[28].mxu0 %v7509_v52 }
 0x1e3   : > { %v2057_v4 = vpop.f32.mrb[0].mxu0 }
 0x1e4   : > { %v7096_v5 = vadd.f32 %v2057_v4, %v8776_v2  ;;  %v2059_v6 = vpop.f32.mrb[1].mxu0 }
 0x1e5   : > { %v7097_v7 = vadd.f32 %v2059_v6, %v8779_v3  ;;  %v2061_v8 = vpop.f32.mrb[2].mxu0 }
 0x1e6   : > { %v7098_v9 = vadd.f32 %v2061_v8, %v8776_v2  ;;  %v2063_v10 = vpop.f32.mrb[3].mxu0  ;;  %v2136_v12 = vmax.f32 %v7096_v5, 0.0 }
 0x1e7   : > { %v7099_v11 = vadd.f32 %v2063_v10, %v8779_v3  ;;  %v2137_v14 = vmax.f32 %v7097_v7, 0.0 }
 0x1e8   : > { %v2138_v13 = vmax.f32 %v7098_v9, 0.0 }
 0x1e9   : > { %v2139_v15 = vmax.f32 %v7099_v11, 0.0 }
 0x1ea   : > { %v2168_v18 = vpack.c.bf16 %v2138_v13, %v2136_v12 }
 0x1eb   : > { %v2067_v20 = vpop.f32.mrb[4].mxu0  ;;  %v2169_v21 = vpack.c.bf16 %v2139_v15, %v2137_v14 }
 0x1ec   : > { %v7100_v22 = vadd.f32 %v2067_v20, %v8776_v2  ;;  %v2069_v23 = vpop.f32.mrb[5].mxu0 }
 0x1ed   : > { %v7101_v25 = vadd.f32 %v2069_v23, %v8779_v3  ;;  %v2071_v26 = vpop.f32.mrb[6].mxu0  ;;  %2351 = vmatprep.mubr.bf16.mxu1 %v2169_v21 }
 0x1ee   : > { %v7102_v29 = vadd.f32 %v2071_v26, %v8776_v2  ;;  %v2073_v30 = vpop.f32.mrb[7].mxu0  ;;  %2352 = vmatmul.mubr.bf16.vlgmr.msra.gmra.mrb[0].mxu1 %v2168_v18  ;;  %v2140_v32 = vmax.f32 %v7100_v22, 0.0 }
 0x1ef   : > { %v7103_v31 = vadd.f32 %v2073_v30, %v8779_v3  ;;  %7059 = vmatpush3.bf16.msra.mxu1 %v7056_v60  ;;  %v2141_v35 = vmax.f32 %v7101_v25, 0.0 }
 0x1f0   : > { %v2142_v33 = vmax.f32 %v7102_v29, 0.0  ;;  %7061 = vmatprep.subr.bf16.mxu1 %v7060_v24 }
 0x1f1   : > { %v2143_v36 = vmax.f32 %v7103_v31, 0.0 }
 0x1f2   : > { %v2170_v39 = vpack.c.bf16 %v2142_v33, %v2140_v32 }
 0x1f3   : > { %v2171_v40 = vpack.c.bf16 %v2143_v36, %v2141_v35  ;;  %v2077_v41 = vpop.f32.mrb[8].mxu0  ;;  %7063 = vmatpush3.bf16.msra.mxu1 %v7060_v24 }
 0x1f4   : > { %v7104_v42 = vadd.f32 %v2077_v41, %v8776_v2  ;;  %v2079_v43 = vpop.f32.mrb[9].mxu0  ;;  %7065 = vmatprep.subr.bf16.mxu1 %v7064_v34 }
 0x1f5   : > { %v7105_v45 = vadd.f32 %v2079_v43, %v8779_v3  ;;  %v2081_v46 = vpop.f32.mrb[10].mxu0  ;;  %2359 = vmatprep.mubr.bf16.mxu1 %v2171_v40 }
 0x1f6   : > { %v7106_v47 = vadd.f32 %v2081_v46, %v8776_v2  ;;  %v2083_v48 = vpop.f32.mrb[11].mxu0  ;;  %2360 = vmatmul.mubr.bf16.gmra.mrb[4].mxu1 %v2170_v39  ;;  %v2144_v50 = vmax.f32 %v7104_v42, 0.0 }
 0x1f7   : > { %v7107_v49 = vadd.f32 %v2083_v48, %v8779_v3  ;;  %7067 = vmatpush3.bf16.msra.mxu1 %v7064_v34  ;;  %v2145_v52 = vmax.f32 %v7105_v45, 0.0 }
 0x1f8   : > { %v2146_v51 = vmax.f32 %v7106_v47, 0.0  ;;  %7069 = vmatprep.subr.bf16.mxu1 %v7068_v44 }
 0x1f9   : > { %v2147_v53 = vmax.f32 %v7107_v49, 0.0 }
 0x1fa   : > { %v2172_v54 = vpack.c.bf16 %v2146_v51, %v2144_v50 }
 0x1fb   : > { %v2173_v55 = vpack.c.bf16 %v2147_v53, %v2145_v52  ;;  %v2087_v56 = vpop.f32.mrb[12].mxu0  ;;  %7071 = vmatpush3.bf16.msra.mxu1 %v7068_v44 }
 0x1fc   : > { %v7108_v57 = vadd.f32 %v2087_v56, %v8776_v2  ;;  %v2089_v58 = vpop.f32.mrb[13].mxu0 }
 0x1fd   : > { %v7109_v59 = vadd.f32 %v2089_v58, %v8779_v3  ;;  %v2091_v60 = vpop.f32.mrb[14].mxu0  ;;  %2367 = vmatprep.mubr.bf16.mxu1 %v2173_v55 }
 0x1fe   : > { %v7110_v61 = vadd.f32 %v2091_v60, %v8776_v2  ;;  %v2093_v0 = vpop.f32.mrb[15].mxu0  ;;  %2368 = vmatmul.mubr.bf16.gmra.mrb[8].mxu1 %v2172_v54  ;;  %v2148_v5 = vmax.f32 %v7108_v57, 0.0 }
 0x1ff   : > { %v7111_v4 = vadd.f32 %v2093_v0, %v8779_v3  ;;  %v2149_v7 = vmax.f32 %v7109_v59, 0.0 }
 0x200   : > { %v2150_v6 = vmax.f32 %v7110_v61, 0.0 }
 0x201   : > { %v2151_v8 = vmax.f32 %v7111_v4, 0.0 }
 0x202   : > { %v2174_v9 = vpack.c.bf16 %v2150_v6, %v2148_v5 }
 0x203   : > { %v2175_v10 = vpack.c.bf16 %v2151_v8, %v2149_v7  ;;  %v2097_v11 = vpop.f32.mrb[16].mxu0 }
 0x204   : > { %v7112_v12 = vadd.f32 %v2097_v11, %v8776_v2  ;;  %v2099_v13 = vpop.f32.mrb[17].mxu0 }
 0x205   : > { %v7113_v14 = vadd.f32 %v2099_v13, %v8779_v3  ;;  %v2101_v15 = vpop.f32.mrb[18].mxu0  ;;  %2375 = vmatprep.mubr.bf16.mxu1 %v2175_v10 }
 0x206   : > { %v7114_v16 = vadd.f32 %v2101_v15, %v8776_v2  ;;  %v2103_v17 = vpop.f32.mrb[19].mxu0  ;;  %2376 = vmatmul.mubr.bf16.gmra.mrb[12].mxu1 %v2174_v9  ;;  %v2152_v20 = vmax.f32 %v7112_v12, 0.0  ;;  %v2641_v9 = vld [vmem:[%s10220_s8] sm:$0xff] }
 0x207   : > { %v7115_v18 = vadd.f32 %v2103_v17, %v8779_v3  ;;  %v2153_v22 = vmax.f32 %v7113_v14, 0.0 }
 0x208   : > { %v2154_v21 = vmax.f32 %v7114_v16, 0.0 }
 0x209   : > { %v2155_v23 = vmax.f32 %v7115_v18, 0.0 }
 0x20a   : > { %v2176_v24 = vpack.c.bf16 %v2154_v21, %v2152_v20 }
 0x20b   : > { %v2177_v25 = vpack.c.bf16 %v2155_v23, %v2153_v22  ;;  %v2107_v26 = vpop.f32.mrb[20].mxu0 }
 0x20c   : > { %v7116_v27 = vadd.f32 %v2107_v26, %v8776_v2  ;;  %v2109_v28 = vpop.f32.mrb[21].mxu0 }
 0x20d   : > { %v7117_v29 = vadd.f32 %v2109_v28, %v8779_v3  ;;  %v2111_v30 = vpop.f32.mrb[22].mxu0  ;;  %2383 = vmatprep.mubr.bf16.mxu1 %v2177_v25 }
 0x20e   : > { %v7118_v31 = vadd.f32 %v2111_v30, %v8776_v2  ;;  %v2113_v32 = vpop.f32.mrb[23].mxu0  ;;  %2384 = vmatmul.mubr.bf16.gmra.mrb[16].mxu1 %v2176_v24  ;;  %v2156_v34 = vmax.f32 %v7116_v27, 0.0 }
 0x20f   : > { %v7119_v33 = vadd.f32 %v2113_v32, %v8779_v3  ;;  %v2157_v36 = vmax.f32 %v7117_v29, 0.0 }
 0x210   : > { %v2158_v35 = vmax.f32 %v7118_v31, 0.0 }
 0x211   : > { %v2159_v37 = vmax.f32 %v7119_v33, 0.0 }
 0x212   : > { %v2178_v38 = vpack.c.bf16 %v2158_v35, %v2156_v34 }
 0x213   : > { %v2179_v39 = vpack.c.bf16 %v2159_v37, %v2157_v36  ;;  %v2117_v40 = vpop.f32.mrb[24].mxu0 }
 0x214   : > { %v7120_v41 = vadd.f32 %v2117_v40, %v8776_v2  ;;  %v2119_v42 = vpop.f32.mrb[25].mxu0 }
 0x215   : > { %v7121_v43 = vadd.f32 %v2119_v42, %v8779_v3  ;;  %v2121_v44 = vpop.f32.mrb[26].mxu0  ;;  %2391 = vmatprep.mubr.bf16.mxu1 %v2179_v39 }
 0x216   : > { %v7122_v45 = vadd.f32 %v2121_v44, %v8776_v2  ;;  %v2123_v46 = vpop.f32.mrb[27].mxu0  ;;  %2392 = vmatmul.mubr.bf16.gmra.mrb[20].mxu1 %v2178_v38  ;;  %v2160_v48 = vmax.f32 %v7120_v41, 0.0 }
 0x217   : > { %v7123_v47 = vadd.f32 %v2123_v46, %v8779_v3  ;;  %v2161_v50 = vmax.f32 %v7121_v43, 0.0 }
 0x218   : > { %v2162_v49 = vmax.f32 %v7122_v45, 0.0 }
 0x219   : > { %v2163_v51 = vmax.f32 %v7123_v47, 0.0 }
 0x21a   : > { %v2180_v52 = vpack.c.bf16 %v2162_v49, %v2160_v48 }
 0x21b   : > { %v2181_v53 = vpack.c.bf16 %v2163_v51, %v2161_v50  ;;  %v2127_v54 = vpop.f32.mrb[28].mxu0 }
 0x21c   : > { %v7124_v55 = vadd.f32 %v2127_v54, %v8776_v2  ;;  %v2129_v56 = vpop.f32.mrb[29].mxu0 }
 0x21d   : > { %v7125_v57 = vadd.f32 %v2129_v56, %v8779_v3  ;;  %v2131_v58 = vpop.f32.mrb[30].mxu0  ;;  %2399 = vmatprep.mubr.bf16.mxu1 %v2181_v53 }
 0x21e   : > { %v7126_v59 = vadd.f32 %v2131_v58, %v8776_v2  ;;  %v2133_v60 = vpop.f32.mrb[31].mxu0  ;;  %2400 = vmatmul.mubr.bf16.gmra.mrb[24].mxu1 %v2180_v52  ;;  %v2164_v0 = vmax.f32 %v7124_v55, 0.0  ;;  %v2642_v2 = vld [vmem:[%s10220_s8 + $0x8] sm:$0xff] }
 0x21f   : > { %v7127_v61 = vadd.f32 %v2133_v60, %v8779_v3  ;;  %v2165_v5 = vmax.f32 %v7125_v57, 0.0  ;;  %v7072_v10 = vpack.c.bf16 %v2642_v2, %v2641_v9  ;;  %v8840_v3 = vld [vmem:[%s10217_s5] ss:$0 sm:$0xff] }
 0x220   : > { %v2166_v4 = vmax.f32 %v7126_v59, 0.0 }
 0x221   : > { %v2167_v6 = vmax.f32 %v7127_v61, 0.0  ;;  %7073 = vmatprep.subr.bf16.mxu1 %v7072_v10 }
 0x222   : > { %v2182_v7 = vpack.c.bf16 %v2166_v4, %v2164_v0 }
 0x223   : > { %v2183_v8 = vpack.c.bf16 %v2167_v6, %v2165_v5 }
 0x225   : > { %2407 = vmatprep.mubr.bf16.mxu1 %v2183_v8 }
 0x226   : > { %2408 = vmatmul.mubr.bf16.gmra.mrb[28].mxu1 %v2182_v7 }
 0x2c1   : > { %v6788_v11 = vpop.f32.mrb[0].mxu1 }
 0x2c2   : > { %v6789_v12 = vpop.f32.mrb[1].mxu1 }
 0x2c3   : > { %v6790_v13 = vadd.f32 %v6789_v12, %v6788_v11  ;;  %v6791_v14 = vpop.f32.mrb[2].mxu1 }
 0x2c4   : > { %v6792_v15 = vpop.f32.mrb[3].mxu1 }
 0x2c5   : > { %v2354_v16 = vadd.f32 %v6790_v13, %v8840_v3  ;;  %v6793_v17 = vadd.f32 %v6792_v15, %v6791_v14 }
 0x2c7   : > { %v2416_v18 = vmax.f32 %v2354_v16, 0.0  ;;  %v2357_v20 = vadd.f32 %v6793_v17, %v8840_v3 }
 0x2c9   : > { %v2417_v21 = vmax.f32 %v2357_v20, 0.0  ;;  %v6794_v22 = vpop.f32.mrb[4].mxu1  ;;  %6976 = vmatprep.mubr.msk.f32.mxu1 %vm2447_vm0, %v2416_v18 }
 0x2ca   : > { %v6795_v23 = vpop.f32.mrb[5].mxu1 }
 0x2cb   : > { %v6796_v24 = vadd.f32 %v6795_v23, %v6794_v22  ;;  %v6797_v25 = vpop.f32.mrb[6].mxu1  ;;  %6977 = vmatmul.mubr.msk.f32.vlgmr.msra.gmra.mrb[32].mxu1 %vm2447_vm0, %v2417_v21 }
 0x2cc   : > { %v6798_v26 = vpop.f32.mrb[7].mxu1  ;;  %7075 = vmatpush3.bf16.msra.mxu1 %v7072_v10 }
 0x2cd   : > { %v2362_v27 = vadd.f32 %v6796_v24, %v8840_v3  ;;  %v6799_v28 = vadd.f32 %v6798_v26, %v6797_v25 }
 0x2cf   : > { %v2418_v29 = vmax.f32 %v2362_v27, 0.0  ;;  %v2365_v30 = vadd.f32 %v6799_v28, %v8840_v3 }
 0x2d1   : > { %v2419_v31 = vmax.f32 %v2365_v30, 0.0  ;;  %v6800_v32 = vpop.f32.mrb[8].mxu1  ;;  %6979 = vmatprep.mubr.msk.f32.mxu1 %vm2447_vm0, %v2418_v29 }
 0x2d2   : > { %v6801_v33 = vpop.f32.mrb[9].mxu1 }
 0x2d3   : > { %v6802_v34 = vadd.f32 %v6801_v33, %v6800_v32  ;;  %v6803_v35 = vpop.f32.mrb[10].mxu1  ;;  %6980 = vmatmul.mubr.msk.f32.gmra.mrb[34].mxu1 %vm2447_vm0, %v2419_v31  ;;  %v2894_v33 = vld [vmem:[%s8880_s2 + $0x10] sm:$0xff] }
 0x2d4   : > { %v6804_v36 = vpop.f32.mrb[11].mxu1  ;;  %2928 = vrot.lane.b32.xlu1 %v2894_v33, %s8188_s23 }
 0x2d5   : > { %v2370_v37 = vadd.f32 %v6802_v34, %v8840_v3  ;;  %v6805_v38 = vadd.f32 %v6804_v36, %v6803_v35  ;;  %v2893_v34 = vld [vmem:[%s8880_s2 + $0x8] sm:$0xff]  ;;  %v2895_v35 = vld [vmem:[%s8880_s2 + $0x18] sm:$0xff] }
 0x2d6   : > { %v2897_v36 = vld [vmem:[%s8880_s2 + $0x28] sm:$0xff] }
 0x2d7   : > { %v2420_v39 = vmax.f32 %v2370_v37, 0.0  ;;  %v2373_v40 = vadd.f32 %v6805_v38, %v8840_v3  ;;  %v2896_v37 = vld [vmem:[%s8880_s2 + $0x20] sm:$0xff]  ;;  %v2899_v38 = vld [vmem:[%s8880_s2 + $0x38] sm:$0xff] }
 0x2d8   : > { %2930 = vrot.lane.b32.xlu1 %v2895_v35, %s8188_s23 }
 0x2d9   : > { %v2421_v41 = vmax.f32 %v2373_v40, 0.0  ;;  %v6806_v42 = vpop.f32.mrb[12].mxu1  ;;  %6982 = vmatprep.mubr.msk.f32.mxu1 %vm2447_vm0, %v2420_v39  ;;  %v2898_v39 = vld [vmem:[%s8880_s2 + $0x30] sm:$0xff]  ;;  %v2901_v40 = vld [vmem:[%s8880_s2 + $0x48] sm:$0xff] }
 0x2da   : > { %v6807_v43 = vpop.f32.mrb[13].mxu1 }
 0x2db   : > { %v6808_v44 = vadd.f32 %v6807_v43, %v6806_v42  ;;  %v6809_v45 = vpop.f32.mrb[14].mxu1  ;;  %6983 = vmatmul.mubr.msk.f32.gmra.mrb[36].mxu1 %vm2447_vm0, %v2421_v41  ;;  %v2900_v41 = vld [vmem:[%s8880_s2 + $0x40] sm:$0xff]  ;;  %v2903_v42 = vld [vmem:[%s8880_s2 + $0x58] sm:$0xff]  ;;  %v2902_v43 = vld [vmem:[%s8880_s2 + $0x50] sm:$0xff] }
 0x2dc   : > { %v6810_v46 = vpop.f32.mrb[15].mxu1  ;;  %2934 = vrot.lane.b32.xlu1 %v2897_v36, %s8188_s23 }
 0x2dd   : > { %v2378_v47 = vadd.f32 %v6808_v44, %v8840_v3  ;;  %v6811_v48 = vadd.f32 %v6810_v46, %v6809_v45  ;;  %v2905_v44 = vld [vmem:[%s8880_s2 + $0x68] sm:$0xff]  ;;  %v2904_v45 = vld [vmem:[%s8880_s2 + $0x60] sm:$0xff]  ;;  %v2907_v46 = vld [vmem:[%s8880_s2 + $0x78] sm:$0xff] }
 0x2df   : > { %v2422_v49 = vmax.f32 %v2378_v47, 0.0  ;;  %v2381_v50 = vadd.f32 %v6811_v48, %v8840_v3  ;;  %v2906_v47 = vld [vmem:[%s8880_s2 + $0x70] sm:$0xff]  ;;  %v6348_v48 = vld [vmem:[%s10219_s7] ss:$0 sm:$0xff] }
 0x2e0   : > { %2938 = vrot.lane.b32.xlu1 %v2899_v38, %s8188_s23 }
 0x2e1   : > { %v2423_v51 = vmax.f32 %v2381_v50, 0.0  ;;  %v6812_v52 = vpop.f32.mrb[16].mxu1  ;;  %6985 = vmatprep.mubr.msk.f32.mxu1 %vm2447_vm0, %v2422_v49 }
 0x2e2   : > { %v6813_v53 = vpop.f32.mrb[17].mxu1 }
 0x2e3   : > { %v6814_v54 = vadd.f32 %v6813_v53, %v6812_v52  ;;  %v6815_v55 = vpop.f32.mrb[18].mxu1  ;;  %6986 = vmatmul.mubr.msk.f32.gmra.mrb[38].mxu1 %vm2447_vm0, %v2423_v51 }
 0x2e4   : > { %v6816_v56 = vpop.f32.mrb[19].mxu1  ;;  %2942 = vrot.lane.b32.xlu1 %v2901_v40, %s8188_s23 }
 0x2e5   : > { %v2386_v57 = vadd.f32 %v6814_v54, %v8840_v3  ;;  %v6817_v58 = vadd.f32 %v6816_v56, %v6815_v55 }
 0x2e7   : > { %v2424_v59 = vmax.f32 %v2386_v57, 0.0  ;;  %v2389_v60 = vadd.f32 %v6817_v58, %v8840_v3 }
 0x2e8   : > { %2946 = vrot.lane.b32.xlu1 %v2903_v42, %s8188_s23 }
 0x2e9   : > { %v2425_v61 = vmax.f32 %v2389_v60, 0.0  ;;  %v6818_v0 = vpop.f32.mrb[20].mxu1  ;;  %6988 = vmatprep.mubr.msk.f32.mxu1 %vm2447_vm0, %v2424_v59 }
 0x2ea   : > { %v6819_v4 = vpop.f32.mrb[21].mxu1 }
 0x2eb   : > { %v6820_v5 = vadd.f32 %v6819_v4, %v6818_v0  ;;  %v6821_v6 = vpop.f32.mrb[22].mxu1  ;;  %6989 = vmatmul.mubr.msk.f32.gmra.mrb[40].mxu1 %vm2447_vm0, %v2425_v61 }
 0x2ec   : > { %v6822_v7 = vpop.f32.mrb[23].mxu1  ;;  %2950 = vrot.lane.b32.xlu1 %v2905_v44, %s8188_s23 }
 0x2ed   : > { %v2394_v8 = vadd.f32 %v6820_v5, %v8840_v3  ;;  %v6823_v9 = vadd.f32 %v6822_v7, %v6821_v6 }
 0x2ef   : > { %v2426_v2 = vmax.f32 %v2394_v8, 0.0  ;;  %v2397_v10 = vadd.f32 %v6823_v9, %v8840_v3 }
 0x2f0   : > { %2954 = vrot.lane.b32.xlu1 %v2907_v46, %s8188_s23 }
 0x2f1   : > { %v2427_v11 = vmax.f32 %v2397_v10, 0.0  ;;  %v6824_v12 = vpop.f32.mrb[24].mxu1  ;;  %6991 = vmatprep.mubr.msk.f32.mxu1 %vm2447_vm0, %v2426_v2 }
 0x2f2   : > { %v6825_v13 = vpop.f32.mrb[25].mxu1 }
 0x2f3   : > { %v6826_v14 = vadd.f32 %v6825_v13, %v6824_v12  ;;  %v6827_v15 = vpop.f32.mrb[26].mxu1  ;;  %6992 = vmatmul.mubr.msk.f32.gmra.mrb[42].mxu1 %vm2447_vm0, %v2427_v11 }
 0x2f4   : > { %v6828_v16 = vpop.f32.mrb[27].mxu1 }
 0x2f5   : > { %v2402_v17 = vadd.f32 %v6826_v14, %v8840_v3  ;;  %v6829_v18 = vadd.f32 %v6828_v16, %v6827_v15 }
 0x2f7   : > { %v2428_v20 = vmax.f32 %v2402_v17, 0.0  ;;  %v2405_v21 = vadd.f32 %v6829_v18, %v8840_v3 }
 0x2f9   : > { %v2429_v22 = vmax.f32 %v2405_v21, 0.0  ;;  %v6830_v23 = vpop.f32.mrb[28].mxu1  ;;  %6994 = vmatprep.mubr.msk.f32.mxu1 %vm2447_vm0, %v2428_v20 }
 0x2fa   : > { %v6831_v24 = vpop.f32.mrb[29].mxu1 }
 0x2fb   : > { %v6832_v25 = vadd.f32 %v6831_v24, %v6830_v23  ;;  %v6833_v26 = vpop.f32.mrb[30].mxu1  ;;  %6995 = vmatmul.mubr.msk.f32.gmra.mrb[44].mxu1 %vm2447_vm0, %v2429_v22  ;;  %v8920_v22 = vld [vmem:[%s10221_s9] ss:$0 sm:$0xff] }
 0x2fc   : > { %v6834_v27 = vpop.f32.mrb[31].mxu1 }
 0x2fd   : > { %v2410_v28 = vadd.f32 %v6832_v25, %v8840_v3  ;;  %v6835_v29 = vadd.f32 %v6834_v27, %v6833_v26 }
 0x2ff   : > { %v2430_v30 = vmax.f32 %v2410_v28, 0.0  ;;  %v2413_v31 = vadd.f32 %v6835_v29, %v8840_v3  ;;  %v2892_v3 = vld [vmem:[%s8880_s2] sm:$0xff] }
 0x300   : > { %2924 = vrot.lane.b32.xlu0 %v2892_v3, %s8188_s23 }
 0x301   : > { %v2431_v32 = vmax.f32 %v2413_v31, 0.0  ;;  %6997 = vmatprep.mubr.msk.f32.mxu1 %vm2447_vm0, %v2430_v30 }
 0x303   : > { %6998 = vmatmul.mubr.msk.f32.gmra.mrb[46].mxu1 %vm2447_vm0, %v2431_v32  ;;  %v8189_v32 = vmov 1  }
 0x304   : > { %2926 = vrot.lane.b32.xlu0 %v2893_v34, %s8188_s23 }
 0x305   : > { %7238 = vset.pattern.permute.xlu0 %v8189_v32 }
 0x308   : > { %2932 = vrot.lane.b32.xlu0 %v2896_v37, %s8188_s23 }
 0x30c   : > { %2936 = vrot.lane.b32.xlu0 %v2898_v39, %s8188_s23 }
 0x310   : > { %2940 = vrot.lane.b32.xlu0 %v2900_v41, %s8188_s23 }
 0x314   : > { %2944 = vrot.lane.b32.xlu0 %v2902_v43, %s8188_s23 }
 0x318   : > { %2948 = vrot.lane.b32.xlu0 %v2904_v45, %s8188_s23 }
 0x31c   : > { %2952 = vrot.lane.b32.xlu0 %v2906_v47, %s8188_s23 }
 0x346   : > { %v2929_v45 = vpop.permute.xlu1 %2928 }
 0x372   : > { %v2925_v34 = vpop.permute.xlu0 %2924 }
 0x376   : > { %v2927_v40 = vpop.permute.xlu0 %2926 }
 0x39e   : > { %v6978_v49 = vpop.f32.mrb[32].mxu1 }
 0x39f   : > { %v2562_v50 = vpop.f32.mrb[33].mxu1  ;;  %v2568_v52 = vadd.f32 %v6978_v49, %v6348_v48 }
 0x3a0   : > { %v2563_v51 = vadd.f32 %v6348_v48, %v2562_v50 }
 0x3a2   : > { %7004 = vmatprep.mubr.msk.f32.mxu1 %vm2650_vm1, %v2563_v51 }
 0x3a3   : > { %7005 = vmatmul.mubr.msk.f32.vlgmr.msra.gmra.mrb[48].mxu1 %vm2650_vm1, %v2568_v52 }
 0x3a6   : > { %v6981_v53 = vpop.f32.mrb[34].mxu1 }
 0x3a7   : > { %v2572_v54 = vpop.f32.mrb[35].mxu1  ;;  %v2578_v56 = vadd.f32 %v6981_v53, %v6348_v48 }
 0x3a8   : > { %v2573_v55 = vadd.f32 %v6348_v48, %v2572_v54  ;;  %v2931_v54 = vpop.permute.xlu1 %2930 }
 0x3aa   : > { %7007 = vmatprep.mubr.msk.f32.mxu1 %vm2650_vm1, %v2573_v55 }
 0x3ab   : > { %7008 = vmatmul.mubr.msk.f32.gmra.mrb[50].mxu1 %vm2650_vm1, %v2578_v56 }
 0x3ae   : > { %v6984_v57 = vpop.f32.mrb[36].mxu1 }
 0x3af   : > { %v2582_v58 = vpop.f32.mrb[37].mxu1  ;;  %v2588_v60 = vadd.f32 %v6984_v57, %v6348_v48 }
 0x3b0   : > { %v2583_v59 = vadd.f32 %v6348_v48, %v2582_v58 }
 0x3b2   : > { %7010 = vmatprep.mubr.msk.f32.mxu1 %vm2650_vm1, %v2583_v59 }
 0x3b3   : > { %7011 = vmatmul.mubr.msk.f32.gmra.mrb[52].mxu1 %vm2650_vm1, %v2588_v60 }
 0x3b6   : > { %v6987_v61 = vpop.f32.mrb[38].mxu1 }
 0x3b7   : > { %v2592_v0 = vpop.f32.mrb[39].mxu1  ;;  %v2598_v5 = vadd.f32 %v6987_v61, %v6348_v48 }
 0x3b8   : > { %v2593_v4 = vadd.f32 %v6348_v48, %v2592_v0 }
 0x3ba   : > { %7013 = vmatprep.mubr.msk.f32.mxu1 %vm2650_vm1, %v2593_v4 }
 0x3bb   : > { %7014 = vmatmul.mubr.msk.f32.gmra.mrb[54].mxu1 %vm2650_vm1, %v2598_v5 }
 0x3be   : > { %v6990_v6 = vpop.f32.mrb[40].mxu1 }
 0x3bf   : > { %v2602_v7 = vpop.f32.mrb[41].mxu1  ;;  %v2608_v9 = vadd.f32 %v6990_v6, %v6348_v48 }
 0x3c0   : > { %v2603_v8 = vadd.f32 %v6348_v48, %v2602_v7 }
 0x3c2   : > { %7016 = vmatprep.mubr.msk.f32.mxu1 %vm2650_vm1, %v2603_v8  ;;  %v2935_v8 = vpop.permute.xlu1 %2934 }
 0x3c3   : > { %7017 = vmatmul.mubr.msk.f32.gmra.mrb[56].mxu1 %vm2650_vm1, %v2608_v9 }
 0x3c6   : > { %v6993_v2 = vpop.f32.mrb[42].mxu1 }
 0x3c7   : > { %v2612_v10 = vpop.f32.mrb[43].mxu1  ;;  %v2618_v12 = vadd.f32 %v6993_v2, %v6348_v48  ;;  %v2933_v2 = vpop.permute.xlu0 %2932 }
 0x3c8   : > { %v2613_v11 = vadd.f32 %v6348_v48, %v2612_v10 }
 0x3ca   : > { %7019 = vmatprep.mubr.msk.f32.mxu1 %vm2650_vm1, %v2613_v11 }
 0x3cb   : > { %7020 = vmatmul.mubr.msk.f32.gmra.mrb[58].mxu1 %vm2650_vm1, %v2618_v12 }
 0x3ce   : > { %v6996_v13 = vpop.f32.mrb[44].mxu1 }
 0x3cf   : > { %v2622_v14 = vpop.f32.mrb[45].mxu1  ;;  %v2628_v16 = vadd.f32 %v6996_v13, %v6348_v48 }
 0x3d0   : > { %v2623_v15 = vadd.f32 %v6348_v48, %v2622_v14 }
 0x3d2   : > { %7022 = vmatprep.mubr.msk.f32.mxu1 %vm2650_vm1, %v2623_v15 }
 0x3d3   : > { %7023 = vmatmul.mubr.msk.f32.gmra.mrb[60].mxu1 %vm2650_vm1, %v2628_v16 }
 0x3d6   : > { %v6999_v17 = vpop.f32.mrb[46].mxu1 }
 0x3d7   : > { %v2632_v18 = vpop.f32.mrb[47].mxu1  ;;  %v2638_v21 = vadd.f32 %v6999_v17, %v6348_v48 }
 0x3d8   : > { %v2633_v20 = vadd.f32 %v6348_v48, %v2632_v18 }
 0x3da   : > { %7025 = vmatprep.mubr.msk.f32.mxu1 %vm2650_vm1, %v2633_v20 }
 0x3db   : > { %7026 = vmatmul.mubr.msk.f32.gmra.mrb[62].mxu1 %vm2650_vm1, %v2638_v21 }
 0x476   : > { %v7006_v23 = vpop.f32.mrb[48].mxu1 }
 0x477   : > { %v8930_v24 = vadd.f32 %v7006_v23, %v8920_v22  ;;  %v2765_v25 = vpop.f32.mrb[49].mxu1  ;;  %v2939_v23 = vpop.permute.xlu1 %2938 }
 0x478   : > { %v8933_v26 = vadd.f32 %v8920_v22, %v2765_v25 }
 0x479   : > { %v2845_v27 = vmul.f32 0.5, %v8930_v24  ;;  %6031 = vst.msk [vmem:[%s8927_s21 + $0x8] sm:$0xff] %vm6029_vm2, %v8930_v24 }
 0x47a   : > { %v2844_v28 = vmul.f32 0.5, %v8933_v26  ;;  %6030 = vst.msk [vmem:[%s8927_s21] sm:$0xff] %vm6029_vm2, %v8933_v26 }
 0x47b   : > { %v2862_v29 = vmul.f32 1.442695, %v2845_v27  ;;  %v2937_v27 = vpop.permute.xlu0 %2936 }
 0x47c   : > { %v2860_v30 = vmul.f32 1.442695, %v2844_v28 }
 0x47d   : > { %7698 = vpow2.f32 %v2862_v29 }
 0x47e   : > { %7700 = vpow2.f32 %v2860_v30  ;;  %v7009_v31 = vpop.f32.mrb[50].mxu1 }
 0x47f   : > { %v8945_v3 = vadd.f32 %v7009_v31, %v8920_v22  ;;  %v2775_v33 = vpop.f32.mrb[51].mxu1 }
 0x480   : > { %v8948_v35 = vadd.f32 %v8920_v22, %v2775_v33 }
 0x481   : > { %v2847_v36 = vmul.f32 0.5, %v8945_v3  ;;  %6033 = vst.msk [vmem:[%s8927_s21 + $0x18] sm:$0xff] %vm6029_vm2, %v8945_v3 }
 0x482   : > { %v2846_v37 = vmul.f32 0.5, %v8948_v35  ;;  %6032 = vst.msk [vmem:[%s8927_s21 + $0x10] sm:$0xff] %vm6029_vm2, %v8948_v35 }
 0x483   : > { %v2866_v38 = vmul.f32 1.442695, %v2847_v36 }
 0x484   : > { %v2864_v39 = vmul.f32 1.442695, %v2846_v37 }
 0x485   : > { %7702 = vpow2.f32 %v2866_v38 }
 0x486   : > { %7704 = vpow2.f32 %v2864_v39  ;;  %v7012_v41 = vpop.f32.mrb[52].mxu1 }
 0x487   : > { %v7699_v42 = vpop.eup %7698  ;;  %v8959_v43 = vadd.f32 %v7012_v41, %v8920_v22  ;;  %v2785_v44 = vpop.f32.mrb[53].mxu1 }
 0x488   : > { %v7701_v46 = vpop.eup %7700  ;;  %v2973_v47 = vmul.f32 %v7699_v42, %v2927_v40  ;;  %v8962_v48 = vadd.f32 %v8920_v22, %v2785_v44  ;;  %v2943_v41 = vpop.permute.xlu1 %2942 }
 0x489   : > { %v2972_v49 = vmul.f32 %v7701_v46, %v2925_v34  ;;  %v2849_v50 = vmul.f32 0.5, %v8959_v43  ;;  %6035 = vst.msk [vmem:[%s8927_s21 + $0x28] sm:$0xff] %vm6029_vm2, %v8959_v43  ;;  %v2941_v44 = vpop.permute.xlu0 %2940 }
 0x48a   : > { %v2848_v51 = vmul.f32 0.5, %v8962_v48  ;;  %6034 = vst.msk [vmem:[%s8927_s21 + $0x20] sm:$0xff] %vm6029_vm2, %v8962_v48  ;;  %3006 = vrot.lane.b32.xlu1 %v2973_v47, %s8190_s29 }
 0x48b   : > { %v2870_v52 = vmul.f32 1.442695, %v2849_v50  ;;  %3004 = vrot.lane.b32.xlu0 %v2972_v49, %s8190_s29 }
 0x48c   : > { %v2868_v53 = vmul.f32 1.442695, %v2848_v51 }
 0x48d   : > { %7706 = vpow2.f32 %v2870_v52 }
 0x48e   : > { %7708 = vpow2.f32 %v2868_v53  ;;  %v7015_v55 = vpop.f32.mrb[54].mxu1 }
 0x48f   : > { %v7703_v56 = vpop.eup %7702  ;;  %v8975_v57 = vadd.f32 %v7015_v55, %v8920_v22  ;;  %v2795_v58 = vpop.f32.mrb[55].mxu1 }
 0x490   : > { %v7705_v59 = vpop.eup %7704  ;;  %v2975_v60 = vmul.f32 %v7703_v56, %v2931_v54  ;;  %v8978_v61 = vadd.f32 %v8920_v22, %v2795_v58  ;;  %v2947_v58 = vpop.permute.xlu1 %2946 }
 0x491   : > { %v2974_v0 = vmul.f32 %v7705_v59, %v2929_v45  ;;  %v2851_v4 = vmul.f32 0.5, %v8975_v57  ;;  %6037 = vst.msk [vmem:[%s8927_s21 + $0x38] sm:$0xff] %vm6029_vm2, %v8975_v57 }
 0x492   : > { %v2850_v5 = vmul.f32 0.5, %v8978_v61  ;;  %6036 = vst.msk [vmem:[%s8927_s21 + $0x30] sm:$0xff] %vm6029_vm2, %v8978_v61  ;;  %3010 = vrot.lane.b32.xlu1 %v2975_v60, %s8190_s29  ;;  %v2945_v60 = vpop.permute.xlu0 %2944 }
 0x493   : > { %v2874_v6 = vmul.f32 1.442695, %v2851_v4  ;;  %3008 = vrot.lane.b32.xlu0 %v2974_v0, %s8190_s29 }
 0x494   : > { %v2872_v7 = vmul.f32 1.442695, %v2850_v5 }
 0x495   : > { %7710 = vpow2.f32 %v2874_v6 }
 0x496   : > { %7712 = vpow2.f32 %v2872_v7  ;;  %v7018_v9 = vpop.f32.mrb[56].mxu1 }
 0x497   : > { %v7707_v10 = vpop.eup %7706  ;;  %v8991_v11 = vadd.f32 %v7018_v9, %v8920_v22  ;;  %v2805_v12 = vpop.f32.mrb[57].mxu1 }
 0x498   : > { %v7709_v13 = vpop.eup %7708  ;;  %v2977_v14 = vmul.f32 %v7707_v10, %v2935_v8  ;;  %v8994_v15 = vadd.f32 %v8920_v22, %v2805_v12 }
 0x499   : > { %v2853_v16 = vmul.f32 0.5, %v8991_v11  ;;  %6039 = vst.msk [vmem:[%s8927_s21 + $0x48] sm:$0xff] %vm6029_vm2, %v8991_v11  ;;  %v2976_v17 = vmul.f32 %v7709_v13, %v2933_v2 }
 0x49a   : > { %v2852_v18 = vmul.f32 0.5, %v8994_v15  ;;  %6038 = vst.msk [vmem:[%s8927_s21 + $0x40] sm:$0xff] %vm6029_vm2, %v8994_v15  ;;  %3014 = vrot.lane.b32.xlu1 %v2977_v14, %s8190_s29  ;;  %v2949_v14 = vpop.permute.xlu0 %2948 }
 0x49b   : > { %v2878_v20 = vmul.f32 1.442695, %v2853_v16  ;;  %3012 = vrot.lane.b32.xlu0 %v2976_v17, %s8190_s29 }
 0x49c   : > { %v2876_v21 = vmul.f32 1.442695, %v2852_v18 }
 0x49d   : > { %7714 = vpow2.f32 %v2878_v20 }
 0x49e   : > { %7716 = vpow2.f32 %v2876_v21  ;;  %v7021_v25 = vpop.f32.mrb[58].mxu1 }
 0x49f   : > { %v7711_v28 = vpop.eup %7710  ;;  %v9007_v29 = vadd.f32 %v7021_v25, %v8920_v22  ;;  %v2815_v30 = vpop.f32.mrb[59].mxu1 }
 0x4a0   : > { %v7713_v31 = vpop.eup %7712  ;;  %v2979_v33 = vmul.f32 %v7711_v28, %v2939_v23  ;;  %v9010_v34 = vadd.f32 %v8920_v22, %v2815_v30  ;;  %v2953_v23 = vpop.permute.xlu0 %2952 }
 0x4a1   : > { %v2855_v36 = vmul.f32 0.5, %v9007_v29  ;;  %6041 = vst.msk [vmem:[%s8927_s21 + $0x58] sm:$0xff] %vm6029_vm2, %v9007_v29  ;;  %v2978_v37 = vmul.f32 %v7713_v31, %v2937_v27 }
 0x4a2   : > { %v2854_v38 = vmul.f32 0.5, %v9010_v34  ;;  %6040 = vst.msk [vmem:[%s8927_s21 + $0x50] sm:$0xff] %vm6029_vm2, %v9010_v34  ;;  %3018 = vrot.lane.b32.xlu1 %v2979_v33, %s8190_s29 }
 0x4a3   : > { %v2882_v39 = vmul.f32 1.442695, %v2855_v36  ;;  %3016 = vrot.lane.b32.xlu0 %v2978_v37, %s8190_s29 }
 0x4a4   : > { %v2880_v40 = vmul.f32 1.442695, %v2854_v38 }
 0x4a5   : > { %7718 = vpow2.f32 %v2882_v39  ;;  %v3293_v39 = vld [vmem:[%s10224_s12] sm:$0xff] }
 0x4a6   : > { %7720 = vpow2.f32 %v2880_v40  ;;  %v7024_v42 = vpop.f32.mrb[60].mxu1 }
 0x4a7   : > { %v7715_v45 = vpop.eup %7714  ;;  %v9023_v46 = vadd.f32 %v7024_v42, %v8920_v22  ;;  %v2825_v47 = vpop.f32.mrb[61].mxu1 }
 0x4a8   : > { %v7717_v49 = vpop.eup %7716  ;;  %v2981_v50 = vmul.f32 %v7715_v45, %v2943_v41  ;;  %v9026_v51 = vadd.f32 %v8920_v22, %v2825_v47 }
 0x4a9   : > { %v2857_v52 = vmul.f32 0.5, %v9023_v46  ;;  %6043 = vst.msk [vmem:[%s8927_s21 + $0x68] sm:$0xff] %vm6029_vm2, %v9023_v46  ;;  %v2980_v53 = vmul.f32 %v7717_v49, %v2941_v44 }
 0x4aa   : > { %v2856_v54 = vmul.f32 0.5, %v9026_v51  ;;  %6042 = vst.msk [vmem:[%s8927_s21 + $0x60] sm:$0xff] %vm6029_vm2, %v9026_v51  ;;  %3022 = vrot.lane.b32.xlu1 %v2981_v50, %s8190_s29 }
 0x4ab   : > { %v2886_v55 = vmul.f32 1.442695, %v2857_v52  ;;  %3020 = vrot.lane.b32.xlu0 %v2980_v53, %s8190_s29 }
 0x4ac   : > { %v2884_v56 = vmul.f32 1.442695, %v2856_v54 }
 0x4ad   : > { %7722 = vpow2.f32 %v2886_v55 }
 0x4ae   : > { %7724 = vpow2.f32 %v2884_v56  ;;  %v7027_v59 = vpop.f32.mrb[62].mxu1 }
 0x4af   : > { %v7719_v0 = vpop.eup %7718  ;;  %v9039_v4 = vadd.f32 %v7027_v59, %v8920_v22  ;;  %v2835_v5 = vpop.f32.mrb[63].mxu1 }
 0x4b0   : > { %v7721_v6 = vpop.eup %7720  ;;  %v2983_v7 = vmul.f32 %v7719_v0, %v2947_v58  ;;  %v9042_v8 = vadd.f32 %v8920_v22, %v2835_v5  ;;  %v2951_v22 = vpop.permute.xlu1 %2950  ;;  %v9109_v0 = vld [vmem:[%s10222_s10] ss:$0 sm:$0xff]  ;;  %v9114_v5 = vld [vmem:[%s10222_s10 + $0x1] ss:$0 sm:$0xff] }
 0x4b1   : > { %v2859_v9 = vmul.f32 0.5, %v9039_v4  ;;  %6045 = vst.msk [vmem:[%s8927_s21 + $0x78] sm:$0xff] %vm6029_vm2, %v9039_v4  ;;  %v2982_v2 = vmul.f32 %v7721_v6, %v2945_v60 }
 0x4b2   : > { %v2858_v10 = vmul.f32 0.5, %v9042_v8  ;;  %6044 = vst.msk [vmem:[%s8927_s21 + $0x70] sm:$0xff] %vm6029_vm2, %v9042_v8  ;;  %3026 = vrot.lane.b32.xlu1 %v2983_v7, %s8190_s29 }
 0x4b3   : > { %v2890_v12 = vmul.f32 1.442695, %v2859_v9  ;;  %3024 = vrot.lane.b32.xlu0 %v2982_v2, %s8190_s29 }
 0x4b4   : > { %v2888_v13 = vmul.f32 1.442695, %v2858_v10  ;;  %v2955_v21 = vpop.permute.xlu1 %2954 }
 0x4b5   : > { %7726 = vpow2.f32 %v2890_v12 }
 0x4b6   : > { %7728 = vpow2.f32 %v2888_v13  ;;  %v9123_v13 = vld [vmem:[%s10223_s11] ss:$0 sm:$0xff] }
 0x4b7   : > { %v7723_v16 = vpop.eup %7722 }
 0x4b8   : > { %v7725_v17 = vpop.eup %7724  ;;  %v2985_v18 = vmul.f32 %v7723_v16, %v2951_v22 }
 0x4b9   : > { %v2984_v20 = vmul.f32 %v7725_v17, %v2949_v14  ;;  %v7526_v17 = vld [vmem:[%s10226_s14] ss:$8 sps:$4 sm:$0xff]  }
 0x4ba   : > { %3030 = vrot.lane.b32.xlu1 %v2985_v18, %s8190_s29 }
 0x4bb   : > { %3028 = vrot.lane.b32.xlu0 %v2984_v20, %s8190_s29  ;;  %v7531_v20 = vld [vmem:[%s10226_s14 + $0x14] ss:$8 sps:$4 sm:$0xff]  }
 0x4bf   : > { %v7727_v25 = vpop.eup %7726 }
 0x4c0   : > { %v7729_v27 = vpop.eup %7728  ;;  %v2987_v28 = vmul.f32 %v7727_v25, %v2955_v21  ;;  %v7529_v25 = vld [vmem:[%s10226_s14 + $0x10] ss:$8 sps:$4 sm:$0xff]  }
 0x4c1   : > { %v2986_v30 = vmul.f32 %v7729_v27, %v2953_v23 }
 0x4c2   : > { %3034 = vrot.lane.b32.xlu1 %v2987_v28, %s8190_s29 }
 0x4c3   : > { %3032 = vrot.lane.b32.xlu0 %v2986_v30, %s8190_s29 }
 0x4fc   : > { %v3007_v31 = vpop.permute.xlu1 %3006 }
 0x4fd   : > { %v3053_v33 = vadd.f32 %v3007_v31, %v8930_v24  ;;  %v3005_v36 = vpop.permute.xlu0 %3004  ;;  %v3294_v24 = vld [vmem:[%s10224_s12 + $0x8] sm:$0xff] }
 0x4fe   : > { %v3052_v37 = vadd.f32 %v3005_v36, %v8933_v26  ;;  %v7076_v41 = vpack.c.bf16 %v3294_v24, %v3293_v39 }
 0x4ff   : > { %3076 = vperm.xlu1 %7237, %v3053_v33   ;;  %3175 = vperm.xlu0 %7238, %v3053_v33  }
 0x500   : > { %7077 = vmatprep.subr.bf16.mxu1 %v7076_v41 }
 0x501   : > { %7079 = vmatpush3.bf16.msra.mxu1 %v7076_v41 }
 0x503   : > { %7240 = vset.pattern.permute.xlu1 %v8189_v32  ;;  %7239 = vset.pattern.permute.xlu0 %v8187_v19 }
 0x504   : > { %v3011_v38 = vpop.permute.xlu1 %3010  ;;  %3171 = vperm.xlu1 %7240, %v3052_v37   ;;  %3071 = vperm.xlu0 %7239, %v3052_v37  }
 0x505   : > { %v3055_v40 = vadd.f32 %v3011_v38, %v8945_v3  ;;  %v3009_v26 = vpop.permute.xlu0 %3008 }
 0x506   : > { %v3054_v42 = vadd.f32 %v3009_v26, %v8948_v35 }
 0x508   : > { %3183 = vperm.xlu1 %7240, %v3055_v40   ;;  %3086 = vperm.xlu0 %7239, %v3055_v40  }
 0x50c   : > { %7241 = vset.pattern.permute.xlu1 %v8187_v19  ;;  %7246 = vset.pattern.permute.xlu0 %v8189_v32  ;;  %v3015_v47 = vpop.permute.xlu1 %3014 }
 0x50d   : > { %3081 = vperm.xlu1 %7241, %v3054_v42   ;;  %v3013_v44 = vpop.permute.xlu0 %3012  ;;  %v3057_v49 = vadd.f32 %v3015_v47, %v8959_v43 }
 0x50e   : > { %v3056_v45 = vadd.f32 %v3013_v44, %v8962_v48 }
 0x510   : > { %3187 = vperm.xlu0 %7246, %v3056_v45  }
 0x511   : > { %7242 = vset.pattern.permute.xlu1 %v8189_v32 }
 0x512   : > { %3179 = vperm.xlu1 %7242, %v3054_v42  }
 0x514   : > { %v3019_v3 = vpop.permute.xlu1 %3018 }
 0x515   : > { %v3059_v50 = vadd.f32 %v3019_v3, %v8975_v57  ;;  %v3017_v35 = vpop.permute.xlu0 %3016 }
 0x516   : > { %7243 = vset.pattern.permute.xlu1 %v8187_v19  ;;  %v3058_v52 = vadd.f32 %v3017_v35, %v8978_v61 }
 0x517   : > { %3096 = vperm.xlu1 %7243, %v3057_v49   ;;  %3199 = vperm.xlu0 %7246, %v3059_v50  }
 0x51b   : > { %7244 = vset.pattern.permute.xlu1 %v8189_v32  ;;  %7247 = vset.pattern.permute.xlu0 %v8187_v19 }
 0x51c   : > { %v3023_v48 = vpop.permute.xlu1 %3022  ;;  %3191 = vperm.xlu1 %7244, %v3057_v49   ;;  %3101 = vperm.xlu0 %7247, %v3058_v52  }
 0x51d   : > { %v3061_v53 = vadd.f32 %v3023_v48, %v8991_v11  ;;  %v3021_v43 = vpop.permute.xlu0 %3020 }
 0x51e   : > { %v3060_v58 = vadd.f32 %v3021_v43, %v8994_v15 }
 0x520   : > { %7245 = vset.pattern.permute.xlu1 %v8187_v19  ;;  %3116 = vperm.xlu0 %7247, %v3061_v53  }
 0x521   : > { %3091 = vperm.xlu1 %7245, %v3056_v45  }
 0x524   : > { %7254 = vset.pattern.permute.xlu0 %v8189_v32  ;;  %v3027_v54 = vpop.permute.xlu1 %3026 }
 0x525   : > { %3106 = vperm.xlu1 %7245, %v3059_v50   ;;  %v3025_v57 = vpop.permute.xlu0 %3024 }
 0x526   : > { %v3062_v61 = vadd.f32 %v3025_v57, %v9010_v34 }
 0x528   : > { %3211 = vperm.xlu0 %7254, %v3062_v61  }
 0x529   : > { %7248 = vset.pattern.permute.xlu1 %v8189_v32 }
 0x52a   : > { %3195 = vperm.xlu1 %7248, %v3058_v52  }
 0x52c   : > { %7255 = vset.pattern.permute.xlu0 %v8187_v19  ;;  %v3031_v56 = vpop.permute.xlu1 %3030 }
 0x52d   : > { %v3029_v55 = vpop.permute.xlu0 %3028  ;;  %v3065_v59 = vadd.f32 %v3031_v56, %v9023_v46 }
 0x52e   : > { %v3064_v11 = vadd.f32 %v3029_v55, %v9026_v51  ;;  %3207 = vperm.xlu1 %7248, %v3061_v53   ;;  %v3063_v51 = vadd.f32 %v3027_v54, %v9007_v29  ;;  %v7528_v29 = vld [vmem:[%s10226_s14 + $0x4] ss:$8 sps:$4 sm:$0xff]  }
 0x52f   : > { %3603 = vmatprep.subr.bf16.mxu1 %v7528_v29 }
 0x530   : > { %3131 = vperm.xlu0 %7255, %v3064_v11  }
 0x532   : > { %7249 = vset.pattern.permute.xlu1 %v8187_v19 }
 0x533   : > { %3111 = vperm.xlu1 %7249, %v3060_v58  }
 0x534   : > { %7256 = vset.pattern.permute.xlu0 %v8189_v32  ;;  %v3035_v34 = vpop.permute.xlu1 %3034 }
 0x535   : > { %3223 = vperm.xlu0 %7256, %v3065_v59   ;;  %v3067_v60 = vadd.f32 %v3035_v34, %v9039_v4  ;;  %v3033_v15 = vpop.permute.xlu0 %3032 }
 0x536   : > { %v3066_v46 = vadd.f32 %v3033_v15, %v9042_v8 }
 0x537   : > { %7250 = vset.pattern.permute.xlu1 %v8189_v32 }
 0x538   : > { %3203 = vperm.xlu1 %7250, %v3060_v58  }
 0x539   : > { %7260 = vset.pattern.permute.xlu0 %v8187_v19 }
 0x53a   : > { %3146 = vperm.xlu0 %7260, %v3067_v60  }
 0x53c   : > { %7251 = vset.pattern.permute.xlu1 %v8187_v19 }
 0x53d   : > { %3126 = vperm.xlu1 %7251, %v3063_v51  }
 0x53e   : > { %7261 = vset.pattern.permute.xlu0 %v8189_v32 }
 0x541   : > { %7252 = vset.pattern.permute.xlu1 %v8189_v32 }
 0x542   : > { %3215 = vperm.xlu1 %7252, %v3063_v51  }
 0x546   : > { %7253 = vset.pattern.permute.xlu1 %v8187_v19 }
 0x547   : > { %3121 = vperm.xlu1 %7253, %v3062_v61  }
 0x54b   : > { %3136 = vperm.xlu1 %7253, %v3065_v59  }
 0x54f   : > { %7257 = vset.pattern.permute.xlu1 %v8189_v32 }
 0x550   : > { %3219 = vperm.xlu1 %7257, %v3064_v11  }
 0x554   : > { %7258 = vset.pattern.permute.xlu1 %v8187_v19 }
 0x555   : > { %3141 = vperm.xlu1 %7258, %v3066_v46  }
 0x559   : > { %7259 = vset.pattern.permute.xlu1 %v8189_v32 }
 0x55a   : > { %3227 = vperm.xlu1 %7259, %v3066_v46  }
 0x55e   : > { %3231 = vperm.xlu1 %7259, %v3067_v60  }
 0x57e   : > { %v3077_v4 = vpop.permute.xlu1 %3076  ;;  %v3176_v6 = vpop.permute.xlu0 %3175 }
 0x57f   : > { %v3154_v32 = vmul.f32 %v9109_v0, %v3077_v4  ;;  %v3239_v7 = vmul.f32 %v9114_v5, %v3176_v6 }
 0x581   : > { %v3255_v12 = vadd.f32 %v3239_v7, %v3154_v32 }
 0x583   : > { %v3172_v8 = vpop.permute.xlu1 %3171  ;;  %v3072_v9 = vpop.permute.xlu0 %3071  ;;  %v3278_v18 = vadd.f32 %v9123_v13, %v3255_v12 }
 0x584   : > { %v3238_v2 = vmul.f32 %v9114_v5, %v3172_v8  ;;  %v3153_v10 = vmul.f32 %v9109_v0, %v3072_v9 }
 0x586   : > { %v3254_v22 = vadd.f32 %v3238_v2, %v3153_v10 }
 0x587   : > { %v3184_v14 = vpop.permute.xlu1 %3183  ;;  %v3087_v21 = vpop.permute.xlu0 %3086 }
 0x588   : > { %v3277_v16 = vadd.f32 %v9123_v13, %v3254_v22  ;;  %v3241_v27 = vmul.f32 %v9114_v5, %v3184_v14  ;;  %v3156_v28 = vmul.f32 %v9109_v0, %v3087_v21 }
 0x58a   : > { %7032 = vmatprep.mubr.msk.f32.mxu1 %vm2650_vm1, %v3277_v16  ;;  %v3257_v36 = vadd.f32 %v3241_v27, %v3156_v28 }
 0x58b   : > { %7033 = vmatmul.mubr.msk.f32.vlgmr.msra.gmra.mrb[64].mxu1 %vm2650_vm1, %v3278_v18 }
 0x58c   : > { %v3082_v23 = vpop.permute.xlu1 %3081  ;;  %3604 = vmatpush1.bf16.msra.mxu1 %v7526_v17  ;;  %v3280_v24 = vadd.f32 %v9123_v13, %v3257_v36 }
 0x58d   : > { %3605 = vmatprep.subr.bf16.mxu1 %v7531_v20  ;;  %v3155_v31 = vmul.f32 %v9109_v0, %v3082_v23 }
 0x58f   : > { %v3188_v41 = vpop.permute.xlu0 %3187 }
 0x590   : > { %3606 = vmatpush1.bf16.msra.mxu1 %v7529_v25  ;;  %v3242_v45 = vmul.f32 %v9114_v5, %v3188_v41 }
 0x591   : > { %v3180_v30 = vpop.permute.xlu1 %3179 }
 0x592   : > { %v3240_v33 = vmul.f32 %v9114_v5, %v3180_v30 }
 0x594   : > { %v3256_v37 = vadd.f32 %v3240_v33, %v3155_v31 }
 0x596   : > { %v3279_v38 = vadd.f32 %v9123_v13, %v3256_v37  ;;  %v3097_v39 = vpop.permute.xlu1 %3096  ;;  %v3200_v47 = vpop.permute.xlu0 %3199 }
 0x597   : > { %v3158_v42 = vmul.f32 %v9109_v0, %v3097_v39  ;;  %v3245_v57 = vmul.f32 %v9114_v5, %v3200_v47 }
 0x598   : > { %7035 = vmatprep.mubr.msk.f32.mxu1 %vm2650_vm1, %v3279_v38 }
 0x599   : > { %7036 = vmatmul.mubr.msk.f32.gmra.mrb[66].mxu1 %vm2650_vm1, %v3280_v24 }
 0x59b   : > { %v3192_v40 = vpop.permute.xlu1 %3191  ;;  %v3102_v53 = vpop.permute.xlu0 %3101 }
 0x59c   : > { %v3243_v26 = vmul.f32 %v9114_v5, %v3192_v40  ;;  %v3159_v54 = vmul.f32 %v9109_v0, %v3102_v53 }
 0x59e   : > { %v3259_v49 = vadd.f32 %v3243_v26, %v3158_v42 }
 0x59f   : > { %v3117_v51 = vpop.permute.xlu0 %3116 }
 0x5a0   : > { %v3092_v44 = vpop.permute.xlu1 %3091  ;;  %v3282_v48 = vadd.f32 %v9123_v13, %v3259_v49  ;;  %v3162_v46 = vmul.f32 %v9109_v0, %v3117_v51  ;;  %v7534_v49 = vld [vmem:[%s10226_s14 + $0x24] ss:$8 sps:$4 sm:$0xff]  }
 0x5a1   : > { %v3157_v3 = vmul.f32 %v9109_v0, %v3092_v44  ;;  %3607 = vmatprep.subr.bf16.mxu1 %v7534_v49  ;;  %v7565_v51 = vld [vmem:[%s10228_s16 + $0xe8] ss:$28 sps:$4 sm:$0xff]  }
 0x5a2   : > { %v7621_v49 = vld [vmem:[%s10228_s16 + $0x2e4] ss:$28 sps:$4 sm:$0xff]  }
 0x5a3   : > { %v3258_v50 = vadd.f32 %v3242_v45, %v3157_v3 }
 0x5a4   : > { %v3107_v35 = vpop.permute.xlu1 %3106 }
 0x5a5   : > { %v3281_v52 = vadd.f32 %v9123_v13, %v3258_v50  ;;  %v3160_v43 = vmul.f32 %v9109_v0, %v3107_v35  ;;  %v7532_v35 = vld [vmem:[%s10226_s14 + $0x20] ss:$8 sps:$4 sm:$0xff]  }
 0x5a6   : > { %3608 = vmatpush1.bf16.msra.mxu1 %v7532_v35  ;;  %v7570_v35 = vld [vmem:[%s10228_s16 + $0x11c] ss:$28 sps:$4 sm:$0xff]  }
 0x5a7   : > { %7038 = vmatprep.mubr.msk.f32.mxu1 %vm2650_vm1, %v3281_v52  ;;  %v3261_v11 = vadd.f32 %v3245_v57, %v3160_v43  ;;  %v3212_v12 = vpop.permute.xlu0 %3211  ;;  %v7537_v57 = vld [vmem:[%s10226_s14 + $0x34] ss:$8 sps:$4 sm:$0xff]  }
 0x5a8   : > { %7039 = vmatmul.mubr.msk.f32.gmra.mrb[68].mxu1 %vm2650_vm1, %v3282_v48  ;;  %v3248_v18 = vmul.f32 %v9114_v5, %v3212_v12  ;;  %3609 = vmatprep.subr.bf16.mxu1 %v7537_v57  ;;  %v7589_v12 = vld [vmem:[%s10228_s16 + $0x1c8] ss:$28 sps:$4 sm:$0xff]   ;;  %v7574_v57 = vld [vmem:[%s10228_s16 + $0x150] ss:$28 sps:$4 sm:$0xff]  }
 0x5a9   : > { %v3196_v61 = vpop.permute.xlu1 %3195  ;;  %v3284_v34 = vadd.f32 %v9123_v13, %v3261_v11  ;;  %v7547_v11 = vld [vmem:[%s10228_s16 + $0x40] ss:$28 sps:$4 sm:$0xff]  }
 0x5aa   : > { %v3244_v55 = vmul.f32 %v9114_v5, %v3196_v61  ;;  %v7535_v61 = vld [vmem:[%s10226_s14 + $0x30] ss:$8 sps:$4 sm:$0xff]  }
 0x5ab   : > { %3610 = vmatpush1.bf16.msra.mxu1 %v7535_v61 }
 0x5ac   : > { %v3260_v56 = vadd.f32 %v3244_v55, %v3159_v54  ;;  %v7543_v55 = vld [vmem:[%s10228_s16 + $0xc] ss:$28 sps:$4 sm:$0xff]  }
 0x5ad   : > { %v3208_v58 = vpop.permute.xlu1 %3207  ;;  %4618 = vmatprep.subr.bf16.mxu0 %v7543_v55 }
 0x5ae   : > { %v3283_v59 = vadd.f32 %v9123_v13, %v3260_v56  ;;  %v3247_v15 = vmul.f32 %v9114_v5, %v3208_v58  ;;  %v7555_v56 = vld [vmem:[%s10228_s16 + $0x7c] ss:$28 sps:$4 sm:$0xff]  }
 0x5af   : > { %v3132_v14 = vpop.permute.xlu0 %3131  ;;  %v7553_v58 = vld [vmem:[%s10228_s16 + $0x78] ss:$28 sps:$4 sm:$0xff]  }
 0x5b0   : > { %7041 = vmatprep.mubr.msk.f32.mxu1 %vm2650_vm1, %v3283_v59  ;;  %v3263_v32 = vadd.f32 %v3247_v15, %v3162_v46  ;;  %v3165_v37 = vmul.f32 %v9109_v0, %v3132_v14  ;;  %v7561_v59 = vld [vmem:[%s10228_s16 + $0xb4] ss:$28 sps:$4 sm:$0xff]   ;;  %v7573_v15 = vld [vmem:[%s10228_s16 + $0x124] ss:$28 sps:$4 sm:$0xff]  }
 0x5b1   : > { %7042 = vmatmul.mubr.msk.f32.gmra.mrb[70].mxu1 %vm2650_vm1, %v3284_v34  ;;  %v7559_v34 = vld [vmem:[%s10228_s16 + $0xb0] ss:$28 sps:$4 sm:$0xff]   ;;  %v7571_v46 = vld [vmem:[%s10228_s16 + $0x120] ss:$28 sps:$4 sm:$0xff]  }
 0x5b2   : > { %v3112_v60 = vpop.permute.xlu1 %3111  ;;  %v3286_v2 = vadd.f32 %v9123_v13, %v3263_v32  ;;  %v7583_v32 = vld [vmem:[%s10228_s16 + $0x190] ss:$28 sps:$4 sm:$0xff]   ;;  %v7597_v14 = vld [vmem:[%s10228_s16 + $0x204] ss:$28 sps:$4 sm:$0xff]  }
 0x5b3   : > { %v3161_v4 = vmul.f32 %v9109_v0, %v3112_v60  ;;  %v7567_v60 = vld [vmem:[%s10228_s16 + $0xec] ss:$28 sps:$4 sm:$0xff]  }
 0x5b4   : > { %v3224_v28 = vpop.permute.xlu0 %3223 }
 0x5b5   : > { %v3251_v33 = vmul.f32 %v9114_v5, %v3224_v28  ;;  %v7552_v28 = vld [vmem:[%s10228_s16 + $0x74] ss:$28 sps:$4 sm:$0xff]  }
 0x5b7   : > { %v3204_v29 = vpop.permute.xlu1 %3203 }
 0x5b8   : > { %v3246_v6 = vmul.f32 %v9114_v5, %v3204_v29  ;;  %v7579_v29 = vld [vmem:[%s10228_s16 + $0x15c] ss:$28 sps:$4 sm:$0xff]  }
 0x5b9   : > { %v3147_v47 = vpop.permute.xlu0 %3146 }
 0x5ba   : > { %v3262_v7 = vadd.f32 %v3246_v6, %v3161_v4  ;;  %v3168_v52 = vmul.f32 %v9109_v0, %v3147_v47  ;;  %v7577_v4 = vld [vmem:[%s10228_s16 + $0x158] ss:$28 sps:$4 sm:$0xff]   ;;  %v7613_v47 = vld [vmem:[%s10228_s16 + $0x2a8] ss:$28 sps:$4 sm:$0xff]  }
 0x5bb   : > { %v7585_v6 = vld [vmem:[%s10228_s16 + $0x194] ss:$28 sps:$4 sm:$0xff]  }
 0x5bc   : > { %v3285_v8 = vadd.f32 %v9123_v13, %v3262_v7  ;;  %v3127_v9 = vpop.permute.xlu1 %3126  ;;  %v9261_v7 = vld [vmem:[%s10225_s13] ss:$0 sm:$0xff] }
 0x5bd   : > { %v3164_v16 = vmul.f32 %v9109_v0, %v3127_v9 }
 0x5be   : > { %7044 = vmatprep.mubr.msk.f32.mxu1 %vm2650_vm1, %v3285_v8  ;;  %v7591_v8 = vld [vmem:[%s10228_s16 + $0x1cc] ss:$28 sps:$4 sm:$0xff]  }
 0x5bf   : > { %7045 = vmatmul.mubr.msk.f32.gmra.mrb[72].mxu1 %vm2650_vm1, %v3286_v2 }
 0x5c1   : > { %v3216_v10 = vpop.permute.xlu1 %3215 }
 0x5c2   : > { %v3249_v22 = vmul.f32 %v9114_v5, %v3216_v10 }
 0x5c4   : > { %v3265_v21 = vadd.f32 %v3249_v22, %v3164_v16 }
 0x5c6   : > { %v3122_v17 = vpop.permute.xlu1 %3121  ;;  %v3288_v30 = vadd.f32 %v9123_v13, %v3265_v21  ;;  %v7546_v21 = vld [vmem:[%s10228_s16 + $0x3c] ss:$28 sps:$4 sm:$0xff]  }
 0x5c7   : > { %v3163_v20 = vmul.f32 %v9109_v0, %v3122_v17 }
 0x5c9   : > { %v3264_v23 = vadd.f32 %v3248_v18, %v3163_v20  ;;  %v7538_v18 = vld [vmem:[%s10228_s16] ss:$28 sps:$4 sm:$0xff]  }
 0x5ca   : > { %v3137_v25 = vpop.permute.xlu1 %3136 }
 0x5cb   : > { %v3287_v27 = vadd.f32 %v9123_v13, %v3264_v23  ;;  %v3166_v31 = vmul.f32 %v9109_v0, %v3137_v25  ;;  %v7595_v23 = vld [vmem:[%s10228_s16 + $0x200] ss:$28 sps:$4 sm:$0xff]  }
 0x5cc   : > { %v7603_v25 = vld [vmem:[%s10228_s16 + $0x23c] ss:$28 sps:$4 sm:$0xff]  }
 0x5cd   : > { %7047 = vmatprep.mubr.msk.f32.mxu1 %vm2650_vm1, %v3287_v27  ;;  %v3267_v39 = vadd.f32 %v3251_v33, %v3166_v31  ;;  %v7544_v27 = vld [vmem:[%s10228_s16 + $0x38] ss:$28 sps:$4 sm:$0xff]   ;;  %v7550_v33 = vld [vmem:[%s10228_s16 + $0x70] ss:$28 sps:$4 sm:$0xff]  }
 0x5ce   : > { %7048 = vmatmul.mubr.msk.f32.gmra.mrb[74].mxu1 %vm2650_vm1, %v3288_v30  ;;  %v7601_v30 = vld [vmem:[%s10228_s16 + $0x238] ss:$28 sps:$4 sm:$0xff]  }
 0x5cf   : > { %v3220_v36 = vpop.permute.xlu1 %3219  ;;  %v3290_v26 = vadd.f32 %v9123_v13, %v3267_v39  ;;  %v7609_v31 = vld [vmem:[%s10228_s16 + $0x274] ss:$28 sps:$4 sm:$0xff]  }
 0x5d0   : > { %v3250_v38 = vmul.f32 %v9114_v5, %v3220_v36 }
 0x5d2   : > { %v3266_v24 = vadd.f32 %v3250_v38, %v3165_v37  ;;  %v7558_v37 = vld [vmem:[%s10228_s16 + $0xac] ss:$28 sps:$4 sm:$0xff]  }
 0x5d3   : > { %v7607_v38 = vld [vmem:[%s10228_s16 + $0x270] ss:$28 sps:$4 sm:$0xff]  }
 0x5d4   : > { %v3289_v40 = vadd.f32 %v9123_v13, %v3266_v24  ;;  %v3142_v41 = vpop.permute.xlu1 %3141 }
 0x5d5   : > { %v3167_v44 = vmul.f32 %v9109_v0, %v3142_v41  ;;  %v7540_v0 = vld [vmem:[%s10228_s16 + $0x4] ss:$28 sps:$4 sm:$0xff]  }
 0x5d6   : > { %7050 = vmatprep.mubr.msk.f32.mxu1 %vm2650_vm1, %v3289_v40  ;;  %4505 = vmatprep.subr.bf16.mxu1 %v7540_v0  ;;  %v7615_v40 = vld [vmem:[%s10228_s16 + $0x2ac] ss:$28 sps:$4 sm:$0xff]  }
 0x5d7   : > { %7051 = vmatmul.mubr.msk.f32.gmra.mrb[76].mxu1 %vm2650_vm1, %v3290_v26  ;;  %v7582_v0 = vld [vmem:[%s10228_s16 + $0x18c] ss:$28 sps:$4 sm:$0xff]  }
 0x5d9   : > { %v3228_v42 = vpop.permute.xlu1 %3227 }
 0x5da   : > { %v3252_v45 = vmul.f32 %v9114_v5, %v3228_v42  ;;  %v7556_v42 = vld [vmem:[%s10228_s16 + $0xa8] ss:$28 sps:$4 sm:$0xff]  }
 0x5dc   : > { %v3268_v3 = vadd.f32 %v3252_v45, %v3167_v44  ;;  %v7564_v45 = vld [vmem:[%s10228_s16 + $0xe4] ss:$28 sps:$4 sm:$0xff]  }
 0x5dd   : > { %v3232_v50 = vpop.permute.xlu1 %3231 }
 0x5de   : > { %v3291_v48 = vadd.f32 %v9123_v13, %v3268_v3  ;;  %v3253_v53 = vmul.f32 %v9114_v5, %v3232_v50  ;;  %v7541_v5 = vld [vmem:[%s10228_s16 + $0x8] ss:$28 sps:$4 sm:$0xff]   ;;  %v7562_v50 = vld [vmem:[%s10228_s16 + $0xe0] ss:$28 sps:$4 sm:$0xff]  }
 0x5df   : > { %4619 = vmatpush1.bf16.msra.mxu0 %v7541_v5 }
 0x5e0   : > { %v3269_v43 = vadd.f32 %v3253_v53, %v3168_v52  ;;  %7053 = vmatprep.mubr.msk.f32.mxu1 %vm2650_vm1, %v3291_v48  ;;  %v7619_v52 = vld [vmem:[%s10228_s16 + $0x2e0] ss:$28 sps:$4 sm:$0xff]   ;;  %v7568_v48 = vld [vmem:[%s10228_s16 + $0x118] ss:$28 sps:$4 sm:$0xff]  }
 0x5e1   : > { %v7576_v53 = vld [vmem:[%s10228_s16 + $0x154] ss:$28 sps:$4 sm:$0xff]  }
 0x5e2   : > { %v3292_v54 = vadd.f32 %v9123_v13, %v3269_v43  ;;  %v7549_v13 = vld [vmem:[%s10228_s16 + $0x44] ss:$28 sps:$4 sm:$0xff]  }
 0x5e3   : > { %4620 = vmatprep.subr.bf16.mxu0 %v7549_v13 }
 0x5e4   : > { %7054 = vmatmul.mubr.msk.f32.gmra.mrb[78].mxu1 %vm2650_vm1, %v3292_v54  ;;  %4621 = vmatpush1.bf16.msra.mxu0 %v7547_v11  ;;  %v7580_v11 = vld [vmem:[%s10228_s16 + $0x188] ss:$28 sps:$4 sm:$0xff]  }
 0x5e5   : > { %3635 = vmatprep.mubr.bf16.mxu1 %v8187_v19  ;;  %4622 = vmatprep.subr.bf16.mxu0 %v7555_v56 }
 0x5e8   : > { %4623 = vmatpush1.bf16.msra.mxu0 %v7553_v58  ;;  %v7588_v58 = vld [vmem:[%s10228_s16 + $0x1c4] ss:$28 sps:$4 sm:$0xff]  }
 0x5e9   : > { %4624 = vmatprep.subr.bf16.mxu0 %v7561_v59 }
 0x5ec   : > { %4625 = vmatpush1.bf16.msra.mxu0 %v7559_v34  ;;  %v7586_v34 = vld [vmem:[%s10228_s16 + $0x1c0] ss:$28 sps:$4 sm:$0xff]  }
 0x5ed   : > { %4626 = vmatprep.subr.bf16.mxu0 %v7567_v60 }
 0x5f0   : > { %4627 = vmatpush1.bf16.msra.mxu0 %v7565_v51 }
 0x5f1   : > { %4628 = vmatprep.subr.bf16.mxu0 %v7573_v15  ;;  %v7594_v15 = vld [vmem:[%s10228_s16 + $0x1fc] ss:$28 sps:$4 sm:$0xff]  }
 0x5f4   : > { %4629 = vmatpush1.bf16.msra.mxu0 %v7571_v46 }
 0x5f5   : > { %4630 = vmatprep.subr.bf16.mxu0 %v7579_v29 }
 0x5f8   : > { %4631 = vmatpush1.bf16.msra.mxu0 %v7577_v4 }
 0x5f9   : > { %4632 = vmatprep.subr.bf16.mxu0 %v7585_v6  ;;  %v7592_v6 = vld [vmem:[%s10228_s16 + $0x1f8] ss:$28 sps:$4 sm:$0xff]  }
 0x5fc   : > { %4633 = vmatpush1.bf16.msra.mxu0 %v7583_v32 }
 0x5fd   : > { %4634 = vmatprep.subr.bf16.mxu0 %v7591_v8  ;;  %v7600_v8 = vld [vmem:[%s10228_s16 + $0x234] ss:$28 sps:$4 sm:$0xff]  }
 0x600   : > { %4635 = vmatpush1.bf16.msra.mxu0 %v7589_v12 }
 0x601   : > { %4636 = vmatprep.subr.bf16.mxu0 %v7597_v14 }
 0x604   : > { %4637 = vmatpush1.bf16.msra.mxu0 %v7595_v23  ;;  %v7618_v23 = vld [vmem:[%s10228_s16 + $0x2dc] ss:$28 sps:$4 sm:$0xff]  }
 0x605   : > { %4638 = vmatprep.subr.bf16.mxu0 %v7603_v25 }
 0x608   : > { %4639 = vmatpush1.bf16.msra.mxu0 %v7601_v30 }
 0x609   : > { %4640 = vmatprep.subr.bf16.mxu0 %v7609_v31 }
 0x60c   : > { %4641 = vmatpush1.bf16.msra.mxu0 %v7607_v38 }
 0x60d   : > { %4642 = vmatprep.subr.bf16.mxu0 %v7615_v40 }
 0x610   : > { %4643 = vmatpush1.bf16.msra.mxu0 %v7613_v47 }
 0x611   : > { %4644 = vmatprep.subr.bf16.mxu0 %v7621_v49 }
 0x614   : > { %4645 = vmatpush1.bf16.msra.mxu0 %v7619_v52  ;;  %v7627_v52 = vld [vmem:[%s10228_s16 + $0x31c] ss:$28 sps:$4 sm:$0xff]  }
 0x615   : > { %4646 = vmatprep.subr.bf16.mxu0 %v7627_v52  ;;  %v9563_v52 = vld [vmem:[%s10228_s16 + $0x2f0] ss:$28 sps:$4 sm:$0xff]  }
 0x65e   : > { %v7034_v9 = vpop.f32.mrb[64].mxu1 }
 0x65f   : > { %v3422_v2 = vadd.f32 %v7034_v9, %v9261_v7  ;;  %v3416_v10 = vpop.f32.mrb[65].mxu1  ;;  %v7598_v9 = vld [vmem:[%s10228_s16 + $0x230] ss:$28 sps:$4 sm:$0xff]  }
 0x660   : > { %v3417_v22 = vadd.f32 %v9261_v7, %v3416_v10  ;;  %v7604_v10 = vld [vmem:[%s10228_s16 + $0x268] ss:$28 sps:$4 sm:$0xff]  }
 0x661   : > { %v3496_v16 = vmax.f32 %v3422_v2, 0.0  ;;  %v7606_v2 = vld [vmem:[%s10228_s16 + $0x26c] ss:$28 sps:$4 sm:$0xff]  }
 0x662   : > { %v3495_v17 = vmax.f32 %v3417_v22, 0.0  ;;  %v7612_v22 = vld [vmem:[%s10228_s16 + $0x2a4] ss:$28 sps:$4 sm:$0xff]  }
 0x664   : > { %v3511_v20 = vpack.c.bf16 %v3496_v16, %v3495_v17 }
 0x666   : > { %6410 = vmatmul.mubr.msk.bf16.vlgmr.msra.gmra.mrb[80].mxu1 %vm2447_vm0, %v3511_v20  ;;  %v7610_v20 = vld [vmem:[%s10228_s16 + $0x2a0] ss:$28 sps:$4 sm:$0xff]  }
 0x667   : > { %3645 = vmatprep.mubr.bf16.mxu1 %v8187_v19  ;;  %4506 = vmatpush1.bf16.msra.mxu1 %v7538_v18 }
 0x668   : > { %4507 = vmatprep.subr.bf16.mxu1 %v7546_v21 }
 0x66b   : > { %4508 = vmatpush1.bf16.msra.mxu1 %v7544_v27  ;;  %v7616_v27 = vld [vmem:[%s10228_s16 + $0x2d8] ss:$28 sps:$4 sm:$0xff]  }
 0x66c   : > { %v7037_v36 = vpop.f32.mrb[66].mxu1  ;;  %4509 = vmatprep.subr.bf16.mxu1 %v7552_v28 }
 0x66d   : > { %v3432_v39 = vadd.f32 %v7037_v36, %v9261_v7  ;;  %v3426_v24 = vpop.f32.mrb[67].mxu1 }
 0x66e   : > { %v3427_v41 = vadd.f32 %v9261_v7, %v3426_v24 }
 0x66f   : > { %v3498_v26 = vmax.f32 %v3432_v39, 0.0  ;;  %4510 = vmatpush1.bf16.msra.mxu1 %v7550_v33 }
 0x670   : > { %v3497_v44 = vmax.f32 %v3427_v41, 0.0  ;;  %4511 = vmatprep.subr.bf16.mxu1 %v7558_v37 }
 0x672   : > { %v3512_v3 = vpack.c.bf16 %v3498_v26, %v3497_v44 }
 0x673   : > { %4512 = vmatpush1.bf16.msra.mxu1 %v7556_v42 }
 0x674   : > { %6411 = vmatmul.mubr.msk.bf16.gmra.mrb[84].mxu1 %vm2447_vm0, %v3512_v3  ;;  %4513 = vmatprep.subr.bf16.mxu1 %v7564_v45 }
 0x675   : > { %3655 = vmatprep.mubr.bf16.mxu1 %v8187_v19 }
 0x677   : > { %4514 = vmatpush1.bf16.msra.mxu1 %v7562_v50 }
 0x678   : > { %4515 = vmatprep.subr.bf16.mxu1 %v7570_v35  ;;  %v7624_v35 = vld [vmem:[%s10228_s16 + $0x314] ss:$28 sps:$4 sm:$0xff]  }
 0x67b   : > { %v7040_v43 = vpop.f32.mrb[68].mxu1  ;;  %4516 = vmatpush1.bf16.msra.mxu1 %v7568_v48 }
 0x67c   : > { %v3442_v61 = vadd.f32 %v7040_v43, %v9261_v7  ;;  %v3436_v54 = vpop.f32.mrb[69].mxu1  ;;  %4517 = vmatprep.subr.bf16.mxu1 %v7576_v53  ;;  %v7625_v53 = vld [vmem:[%s10228_s16 + $0x318] ss:$28 sps:$4 sm:$0xff]   ;;  %v7630_v43 = vld [vmem:[%s10228_s16 + $0x34c] ss:$28 sps:$4 sm:$0xff]  }
 0x67d   : > { %v3437_v5 = vadd.f32 %v9261_v7, %v3436_v54  ;;  %4647 = vmatpush1.bf16.msra.mxu0 %v7625_v53  ;;  %v7631_v54 = vld [vmem:[%s10228_s16 + $0x350] ss:$28 sps:$4 sm:$0xff]  }
 0x67e   : > { %v3500_v55 = vmax.f32 %v3442_v61, 0.0  ;;  %v7628_v61 = vld [vmem:[%s10228_s16 + $0x348] ss:$28 sps:$4 sm:$0xff]  }
 0x67f   : > { %v3499_v13 = vmax.f32 %v3437_v5, 0.0  ;;  %4518 = vmatpush1.bf16.msra.mxu1 %v7574_v57  ;;  %v7633_v57 = vld [vmem:[%s10228_s16 + $0x354] ss:$28 sps:$4 sm:$0xff]  }
 0x680   : > { %4519 = vmatprep.subr.bf16.mxu1 %v7582_v0  ;;  %4648 = vmatprep.subr.bf16.mxu0 %v7633_v57  ;;  %v7636_v0 = vld [vmem:[%s10228_s16 + $0x14] ss:$28 sps:$4 sm:$0xff]  }
 0x681   : > { %v3513_v56 = vpack.c.bf16 %v3500_v55, %v3499_v13  ;;  %4649 = vmatpush1.bf16.msra.mxu0 %v7631_v54  ;;  %v9441_v5 = vld [vmem:[%s10228_s16 + $0x1d8] ss:$28 sps:$4 sm:$0xff]   ;;  %v3527_v55 = vld [vmem:[%s10227_s15] sm:$0x3] }
 0x682   : > { %6896 = vmatprep.subr.bf16.mxu0 %v9441_v5  ;;  %v9448_v13 = vrot.slane %v3527_v55, %v8767_v63  ;;  %v7654_v54 = vld [vmem:[%s10228_s16 + $0x164] ss:$28 sps:$4 sm:$0xff]  }
 0x683   : > { %6412 = vmatmul.mubr.msk.bf16.gmra.mrb[88].mxu1 %vm2447_vm0, %v3513_v56 }
 0x684   : > { %v7043_v59 = vpop.f32.mrb[70].mxu1  ;;  %3665 = vmatprep.mubr.bf16.mxu1 %v8187_v19  ;;  %4520 = vmatpush1.bf16.msra.mxu1 %v7580_v11  ;;  %v9451_v11 = vrot.slane %v3527_v55, %v8773_v1 }
 0x685   : > { %v3452_v60 = vadd.f32 %v7043_v59, %v9261_v7  ;;  %v3446_v51 = vpop.f32.mrb[71].mxu1  ;;  %4521 = vmatprep.subr.bf16.mxu1 %v7588_v58 }
 0x686   : > { %v3447_v46 = vadd.f32 %v9261_v7, %v3446_v51 }
 0x687   : > { %v3502_v29 = vmax.f32 %v3452_v60, 0.0 }
 0x688   : > { %v3501_v4 = vmax.f32 %v3447_v46, 0.0  ;;  %4522 = vmatpush1.bf16.msra.mxu1 %v7586_v34 }
 0x689   : > { %4523 = vmatprep.subr.bf16.mxu1 %v7594_v15 }
 0x68a   : > { %v3514_v32 = vpack.c.bf16 %v3502_v29, %v3501_v4 }
 0x68c   : > { %6413 = vmatmul.mubr.msk.bf16.gmra.mrb[92].mxu1 %vm2447_vm0, %v3514_v32 }
 0x68d   : > { %3675 = vmatprep.mubr.bf16.mxu1 %v8187_v19  ;;  %4524 = vmatpush1.bf16.msra.mxu1 %v7592_v6 }
 0x68e   : > { %4525 = vmatprep.subr.bf16.mxu1 %v7600_v8 }
 0x691   : > { %4526 = vmatpush1.bf16.msra.mxu1 %v7598_v9 }
 0x692   : > { %v7046_v12 = vpop.f32.mrb[72].mxu1  ;;  %4527 = vmatprep.subr.bf16.mxu1 %v7606_v2  ;;  %v7634_v2 = vld [vmem:[%s10228_s16 + $0x10] ss:$28 sps:$4 sm:$0xff]  }
 0x693   : > { %v3462_v14 = vadd.f32 %v7046_v12, %v9261_v7  ;;  %v3456_v16 = vpop.f32.mrb[73].mxu1  ;;  %v7639_v12 = vld [vmem:[%s10228_s16 + $0x4c] ss:$28 sps:$4 sm:$0xff]  }
 0x694   : > { %v3457_v17 = vadd.f32 %v9261_v7, %v3456_v16  ;;  %v9488_v16 = vld [vmem:[%s10228_s16 + $0x50] ss:$28 sps:$4 sm:$0xff]  }
 0x695   : > { %v3504_v18 = vmax.f32 %v3462_v14, 0.0  ;;  %4528 = vmatpush1.bf16.msra.mxu1 %v7604_v10  ;;  %v9467_v10 = vld [vmem:[%s10228_s16 + $0x18] ss:$28 sps:$4 sm:$0xff]   ;;  %v7637_v14 = vld [vmem:[%s10228_s16 + $0x48] ss:$28 sps:$4 sm:$0xff]  }
 0x696   : > { %v3503_v21 = vmax.f32 %v3457_v17, 0.0  ;;  %4529 = vmatprep.subr.bf16.mxu1 %v7612_v22  ;;  %v9475_v22 = vld [vmem:[%s10228_s16 + $0x210] ss:$28 sps:$4 sm:$0xff]   ;;  %v7642_v17 = vld [vmem:[%s10228_s16 + $0x84] ss:$28 sps:$4 sm:$0xff]  }
 0x698   : > { %v3515_v25 = vpack.c.bf16 %v3504_v18, %v3503_v21  ;;  %v9497_v18 = vld [vmem:[%s10228_s16 + $0x248] ss:$28 sps:$4 sm:$0xff]  }
 0x699   : > { %4530 = vmatpush1.bf16.msra.mxu1 %v7610_v20 }
 0x69a   : > { %6414 = vmatmul.mubr.msk.bf16.gmra.mrb[96].mxu1 %vm2447_vm0, %v3515_v25  ;;  %4531 = vmatprep.subr.bf16.mxu1 %v7618_v23 }
 0x69b   : > { %3685 = vmatprep.mubr.bf16.mxu1 %v8187_v19 }
 0x69d   : > { %4532 = vmatpush1.bf16.msra.mxu1 %v7616_v27 }
 0x69e   : > { %4533 = vmatprep.subr.bf16.mxu1 %v7624_v35  ;;  %v7651_v35 = vld [vmem:[%s10228_s16 + $0x12c] ss:$28 sps:$4 sm:$0xff]  }
 0x6a1   : > { %v7049_v28 = vpop.f32.mrb[74].mxu1 }
 0x6a2   : > { %v3472_v30 = vadd.f32 %v7049_v28, %v9261_v7  ;;  %v3466_v31 = vpop.f32.mrb[75].mxu1  ;;  %v7640_v28 = vld [vmem:[%s10228_s16 + $0x80] ss:$28 sps:$4 sm:$0xff]  }
 0x6a3   : > { %v3467_v33 = vadd.f32 %v9261_v7, %v3466_v31 }
 0x6a4   : > { %v3506_v36 = vmax.f32 %v3472_v30, 0.0  ;;  %v9508_v30 = vld [vmem:[%s10228_s16 + $0x88] ss:$28 sps:$4 sm:$0xff]  }
 0x6a5   : > { %v3505_v37 = vmax.f32 %v3467_v33, 0.0 }
 0x6a7   : > { %v3516_v38 = vpack.c.bf16 %v3506_v36, %v3505_v37  ;;  %v7645_v36 = vld [vmem:[%s10228_s16 + $0xbc] ss:$28 sps:$4 sm:$0xff]  }
 0x6a8   : > { %v9518_v37 = vld [vmem:[%s10228_s16 + $0x280] ss:$28 sps:$4 sm:$0xff]  }
 0x6a9   : > { %6415 = vmatmul.mubr.msk.bf16.gmra.mrb[100].mxu1 %vm2447_vm0, %v3516_v38 }
 0x6aa   : > { %v7052_v39 = vpop.f32.mrb[76].mxu1  ;;  %3695 = vmatprep.mubr.bf16.mxu1 %v8187_v19 }
 0x6ab   : > { %v3482_v24 = vadd.f32 %v7052_v39, %v9261_v7  ;;  %v3476_v40 = vpop.f32.mrb[77].mxu1 }
 0x6ac   : > { %v3477_v41 = vadd.f32 %v9261_v7, %v3476_v40 }
 0x6ad   : > { %v3508_v26 = vmax.f32 %v3482_v24, 0.0 }
 0x6ae   : > { %v3507_v42 = vmax.f32 %v3477_v41, 0.0 }
 0x6b0   : > { %v3517_v44 = vpack.c.bf16 %v3508_v26, %v3507_v42 }
 0x6b2   : > { %6416 = vmatmul.mubr.msk.bf16.gmra.mrb[104].mxu1 %vm2447_vm0, %v3517_v44  ;;  %v7643_v44 = vld [vmem:[%s10228_s16 + $0xb8] ss:$28 sps:$4 sm:$0xff]  }
 0x6b3   : > { %3705 = vmatprep.mubr.bf16.mxu1 %v8187_v19  ;;  %v7622_v19 = vld [vmem:[%s10228_s16 + $0x310] ss:$28 sps:$4 sm:$0xff]  }
 0x6b4   : > { %4534 = vmatpush1.bf16.msra.mxu1 %v7622_v19 }
 0x6b5   : > { %4535 = vmatprep.subr.bf16.mxu1 %v7630_v43  ;;  %v9573_v43 = vld [vmem:[%s10228_s16 + $0x130] ss:$28 sps:$4 sm:$0xff]  }
 0x6b7   : > { %v7055_v45 = vpop.f32.mrb[78].mxu1 }
 0x6b8   : > { %v3492_v47 = vadd.f32 %v7055_v45, %v9261_v7  ;;  %v3486_v3 = vpop.f32.mrb[79].mxu1  ;;  %4536 = vmatpush1.bf16.msra.mxu1 %v7628_v61  ;;  %v9533_v45 = vld [vmem:[%s10228_s16 + $0xc0] ss:$28 sps:$4 sm:$0xff]  }
 0x6b9   : > { %v3487_v49 = vadd.f32 %v9261_v7, %v3486_v3  ;;  %4731 = vmatprep.subr.bf16.mxu1 %v7636_v0  ;;  %v9541_v3 = vld [vmem:[%s10228_s16 + $0x2b8] ss:$28 sps:$4 sm:$0xff]   ;;  %v9583_v0 = vld [vmem:[%s10228_s16 + $0x328] ss:$28 sps:$4 sm:$0xff]  }
 0x6ba   : > { %v3510_v50 = vmax.f32 %v3492_v47, 0.0  ;;  %v7648_v47 = vld [vmem:[%s10228_s16 + $0xf4] ss:$28 sps:$4 sm:$0xff]  }
 0x6bb   : > { %v3509_v48 = vmax.f32 %v3487_v49, 0.0  ;;  %v7646_v49 = vld [vmem:[%s10228_s16 + $0xf0] ss:$28 sps:$4 sm:$0xff]  }
 0x6bd   : > { %v3518_v7 = vpack.c.bf16 %v3510_v50, %v3509_v48  ;;  %v9554_v50 = vld [vmem:[%s10228_s16 + $0xf8] ss:$28 sps:$4 sm:$0xff]  }
 0x6bf   : > { %6417 = vmatmul.mubr.msk.bf16.gmra.mrb[108].mxu1 %vm2447_vm0, %v3518_v7  ;;  %v7649_v7 = vld [vmem:[%s10228_s16 + $0x128] ss:$28 sps:$4 sm:$0xff]  }
 0x739   : > { %v3637_v56 = vpop.f32.mrb[80].mxu1 }
 0x73a   : > { %v3638_v58 = vadd.f32 %v3637_v56, %v9448_v13  ;;  %v3639_v59 = vpop.f32.mrb[81].mxu1 }
 0x73b   : > { %v3640_v34 = vadd.f32 %v3639_v59, %v9451_v11  ;;  %v3641_v60 = vpop.f32.mrb[82].mxu1 }
 0x73c   : > { %v3642_v51 = vadd.f32 %v3641_v60, %v9448_v13  ;;  %v3643_v15 = vpop.f32.mrb[83].mxu1  ;;  %v3716_v29 = vmax.f32 %v3638_v58, 0.0  ;;  %v7652_v60 = vld [vmem:[%s10228_s16 + $0x160] ss:$28 sps:$4 sm:$0xff]  }
 0x73d   : > { %v3644_v46 = vadd.f32 %v3643_v15, %v9451_v11  ;;  %v3717_v6 = vmax.f32 %v3640_v34, 0.0 }
 0x73e   : > { %v3718_v4 = vmax.f32 %v3642_v51, 0.0  ;;  %v9594_v51 = vld [vmem:[%s10228_s16 + $0x168] ss:$28 sps:$4 sm:$0xff]  }
 0x73f   : > { %v3719_v32 = vmax.f32 %v3644_v46, 0.0 }
 0x740   : > { %v9457_v8 = vpack.c.bf16 %v3718_v4, %v3716_v29 }
 0x741   : > { %v9459_v9 = vpack.c.bf16 %v3719_v32, %v3717_v6  ;;  %v7657_v6 = vld [vmem:[%s10228_s16 + $0x19c] ss:$28 sps:$4 sm:$0xff]  }
 0x742   : > { %v9607_v32 = vld [vmem:[%s10228_s16 + $0x360] ss:$28 sps:$4 sm:$0xff]  }
 0x743   : > { %4537 = vmatprep.mubr.bf16.mxu1 %v9459_v9  ;;  %4650 = vmatprep.mubr.bf16.mxu0 %v9459_v9 }
 0x744   : > { %4538 = vmatmul.mubr.bf16.vlgmr.msra.gmra.mrb[112].mxu1 %v9457_v8  ;;  %4651 = vmatmul.mubr.bf16.vlgmr.msra.gmra.mrb[32].mxu0 %v9457_v8 }
 0x745   : > { %4732 = vmatpush1.bf16.msra.mxu1 %v7634_v2  ;;  %6897 = vmatpush3.bf16.msra.mxu0 %v9467_v10 }
 0x746   : > { %4733 = vmatprep.subr.bf16.mxu1 %v7639_v12  ;;  %6898 = vmatprep.subr.bf16.mxu0 %v9475_v22  ;;  %v7655_v12 = vld [vmem:[%s10228_s16 + $0x198] ss:$28 sps:$4 sm:$0xff]  }
 0x747   : > { %v3647_v20 = vpop.f32.mrb[84].mxu1 }
 0x748   : > { %v3648_v21 = vadd.f32 %v3647_v20, %v9448_v13  ;;  %v3649_v23 = vpop.f32.mrb[85].mxu1 }
 0x749   : > { %v3650_v25 = vadd.f32 %v3649_v23, %v9451_v11  ;;  %v3651_v27 = vpop.f32.mrb[86].mxu1  ;;  %4734 = vmatpush1.bf16.msra.mxu1 %v7637_v14  ;;  %6899 = vmatpush3.bf16.msra.mxu0 %v9488_v16  ;;  %v9616_v14 = vld [vmem:[%s10228_s16 + $0x1a0] ss:$28 sps:$4 sm:$0xff]  }
 0x74a   : > { %v3652_v31 = vadd.f32 %v3651_v27, %v9448_v13  ;;  %v3653_v33 = vpop.f32.mrb[87].mxu1  ;;  %4735 = vmatprep.subr.bf16.mxu1 %v7642_v17  ;;  %6900 = vmatprep.subr.bf16.mxu0 %v9497_v18  ;;  %v3720_v39 = vmax.f32 %v3648_v21, 0.0  ;;  %v7660_v21 = vld [vmem:[%s10228_s16 + $0x1d4] ss:$28 sps:$4 sm:$0xff]  }
 0x74b   : > { %v3654_v38 = vadd.f32 %v3653_v33, %v9451_v11  ;;  %v3721_v40 = vmax.f32 %v3650_v25, 0.0  ;;  %v7658_v33 = vld [vmem:[%s10228_s16 + $0x1d0] ss:$28 sps:$4 sm:$0xff]  }
 0x74c   : > { %v3722_v24 = vmax.f32 %v3652_v31, 0.0 }
 0x74d   : > { %v3723_v41 = vmax.f32 %v3654_v38, 0.0  ;;  %4736 = vmatpush1.bf16.msra.mxu1 %v7640_v28  ;;  %6901 = vmatpush3.bf16.msra.mxu0 %v9508_v30 }
 0x74e   : > { %v9522_v26 = vpack.c.bf16 %v3722_v24, %v3720_v39  ;;  %4737 = vmatprep.subr.bf16.mxu1 %v7645_v36  ;;  %6902 = vmatprep.subr.bf16.mxu0 %v9518_v37  ;;  %v7665_v39 = vld [vmem:[%s10228_s16 + $0x20c] ss:$28 sps:$4 sm:$0xff]  }
 0x74f   : > { %v9525_v42 = vpack.c.bf16 %v3723_v41, %v3721_v40 }
 0x751   : > { %4547 = vmatprep.mubr.bf16.mxu1 %v9525_v42  ;;  %4660 = vmatprep.mubr.bf16.mxu0 %v9525_v42 }
 0x752   : > { %4548 = vmatmul.mubr.bf16.gmra.mrb[116].mxu1 %v9522_v26  ;;  %4661 = vmatmul.mubr.bf16.gmra.mrb[36].mxu0 %v9522_v26 }
 0x753   : > { %4738 = vmatpush1.bf16.msra.mxu1 %v7643_v44  ;;  %6903 = vmatpush3.bf16.msra.mxu0 %v9533_v45 }
 0x754   : > { %4739 = vmatprep.subr.bf16.mxu1 %v7648_v47  ;;  %6904 = vmatprep.subr.bf16.mxu0 %v9541_v3  ;;  %v7663_v47 = vld [vmem:[%s10228_s16 + $0x208] ss:$28 sps:$4 sm:$0xff]  }
 0x756   : > { %v3657_v48 = vpop.f32.mrb[88].mxu1 }
 0x757   : > { %v3658_v19 = vadd.f32 %v3657_v48, %v9448_v13  ;;  %v3659_v53 = vpop.f32.mrb[89].mxu1  ;;  %4740 = vmatpush1.bf16.msra.mxu1 %v7646_v49  ;;  %6905 = vmatpush3.bf16.msra.mxu0 %v9554_v50  ;;  %v7670_v49 = vld [vmem:[%s10228_s16 + $0x244] ss:$28 sps:$4 sm:$0xff]   ;;  %v7675_v48 = vld [vmem:[%s10228_s16 + $0x27c] ss:$28 sps:$4 sm:$0xff]  }
 0x758   : > { %v3660_v57 = vadd.f32 %v3659_v53, %v9451_v11  ;;  %v3661_v61 = vpop.f32.mrb[90].mxu1  ;;  %4741 = vmatprep.subr.bf16.mxu1 %v7651_v35  ;;  %6906 = vmatprep.subr.bf16.mxu0 %v9563_v52  ;;  %v7668_v35 = vld [vmem:[%s10228_s16 + $0x240] ss:$28 sps:$4 sm:$0xff]  }
 0x759   : > { %v3662_v55 = vadd.f32 %v3661_v61, %v9448_v13  ;;  %v3663_v56 = vpop.f32.mrb[91].mxu1  ;;  %v3724_v59 = vmax.f32 %v3658_v19, 0.0 }
 0x75a   : > { %v3664_v58 = vadd.f32 %v3663_v56, %v9451_v11  ;;  %v3725_v15 = vmax.f32 %v3660_v57, 0.0 }
 0x75b   : > { %v3726_v34 = vmax.f32 %v3662_v55, 0.0  ;;  %4742 = vmatpush1.bf16.msra.mxu1 %v7649_v7  ;;  %6907 = vmatpush3.bf16.msra.mxu0 %v9573_v43 }
 0x75c   : > { %v3727_v46 = vmax.f32 %v3664_v58, 0.0  ;;  %4743 = vmatprep.subr.bf16.mxu1 %v7654_v54  ;;  %6908 = vmatprep.subr.bf16.mxu0 %v9583_v0  ;;  %v7673_v54 = vld [vmem:[%s10228_s16 + $0x278] ss:$28 sps:$4 sm:$0xff]  }
 0x75d   : > { %v9597_v29 = vpack.c.bf16 %v3726_v34, %v3724_v59  ;;  %v7680_v58 = vld [vmem:[%s10228_s16 + $0x2b4] ss:$28 sps:$4 sm:$0xff]  }
 0x75e   : > { %v9599_v4 = vpack.c.bf16 %v3727_v46, %v3725_v15 }
 0x75f   : > { %v3667_v2 = vpop.f32.mrb[92].mxu1  ;;  %4744 = vmatpush1.bf16.msra.mxu1 %v7652_v60  ;;  %6909 = vmatpush3.bf16.msra.mxu0 %v9594_v51 }
 0x760   : > { %v3668_v17 = vadd.f32 %v3667_v2, %v9448_v13  ;;  %v3669_v20 = vpop.f32.mrb[93].mxu1  ;;  %4557 = vmatprep.mubr.bf16.mxu1 %v9599_v4  ;;  %4670 = vmatprep.mubr.bf16.mxu0 %v9599_v4 }
 0x761   : > { %v3670_v23 = vadd.f32 %v3669_v20, %v9451_v11  ;;  %v3671_v25 = vpop.f32.mrb[94].mxu1  ;;  %4558 = vmatmul.mubr.bf16.gmra.mrb[120].mxu1 %v9597_v29  ;;  %4671 = vmatmul.mubr.bf16.gmra.mrb[40].mxu0 %v9597_v29  ;;  %v7683_v20 = vld [vmem:[%s10228_s16 + $0x2e8] ss:$28 sps:$4 sm:$0xff]  }
 0x762   : > { %v3672_v27 = vadd.f32 %v3671_v25, %v9448_v13  ;;  %v3673_v28 = vpop.f32.mrb[95].mxu1  ;;  %4745 = vmatprep.subr.bf16.mxu1 %v7657_v6  ;;  %6910 = vmatprep.subr.bf16.mxu0 %v9607_v32  ;;  %v3728_v36 = vmax.f32 %v3668_v17, 0.0  ;;  %v7685_v17 = vld [vmem:[%s10228_s16 + $0x2ec] ss:$28 sps:$4 sm:$0xff]  }
 0x763   : > { %v3674_v31 = vadd.f32 %v3673_v28, %v9451_v11  ;;  %4746 = vmatpush1.bf16.msra.mxu1 %v7655_v12  ;;  %6911 = vmatpush3.bf16.msra.mxu0 %v9616_v14  ;;  %v3729_v24 = vmax.f32 %v3670_v23, 0.0  ;;  %v7678_v12 = vld [vmem:[%s10228_s16 + $0x2b0] ss:$28 sps:$4 sm:$0xff]   ;;  %v7688_v28 = vld [vmem:[%s10228_s16 + $0x320] ss:$28 sps:$4 sm:$0xff]  }
 0x764   : > { %v3730_v38 = vmax.f32 %v3672_v27, 0.0  ;;  %4747 = vmatprep.subr.bf16.mxu1 %v7660_v21  ;;  %v7690_v21 = vld [vmem:[%s10228_s16 + $0x324] ss:$28 sps:$4 sm:$0xff]  }
 0x765   : > { %v3731_v40 = vmax.f32 %v3674_v31, 0.0 }
 0x766   : > { %v9637_v41 = vpack.c.bf16 %v3730_v38, %v3728_v36  ;;  %v7695_v36 = vld [vmem:[%s10228_s16 + $0x35c] ss:$28 sps:$4 sm:$0xff]  }
 0x767   : > { %v9639_v44 = vpack.c.bf16 %v3731_v40, %v3729_v24  ;;  %4748 = vmatpush1.bf16.msra.mxu1 %v7658_v33 }
 0x768   : > { %4749 = vmatprep.subr.bf16.mxu1 %v7665_v39 }
 0x769   : > { %4567 = vmatprep.mubr.bf16.mxu1 %v9639_v44  ;;  %4680 = vmatprep.mubr.bf16.mxu0 %v9639_v44 }
 0x76a   : > { %4568 = vmatmul.mubr.bf16.gmra.mrb[124].mxu1 %v9637_v41  ;;  %4681 = vmatmul.mubr.bf16.gmra.mrb[44].mxu0 %v9637_v41 }
 0x76b   : > { %4750 = vmatpush1.bf16.msra.mxu1 %v7663_v47 }
 0x76c   : > { %4751 = vmatprep.subr.bf16.mxu1 %v7670_v49  ;;  %v7693_v49 = vld [vmem:[%s10228_s16 + $0x358] ss:$28 sps:$4 sm:$0xff]  }
 0x76d   : > { %v3677_v19 = vpop.f32.mrb[96].mxu1 }
 0x76e   : > { %v3678_v53 = vadd.f32 %v3677_v19, %v9448_v13  ;;  %v3679_v7 = vpop.f32.mrb[97].mxu1 }
 0x76f   : > { %v3680_v57 = vadd.f32 %v3679_v7, %v9451_v11  ;;  %v3681_v61 = vpop.f32.mrb[98].mxu1  ;;  %4752 = vmatpush1.bf16.msra.mxu1 %v7668_v35 }
 0x770   : > { %v3682_v55 = vadd.f32 %v3681_v61, %v9448_v13  ;;  %v3683_v56 = vpop.f32.mrb[99].mxu1  ;;  %4753 = vmatprep.subr.bf16.mxu1 %v7675_v48  ;;  %v3732_v34 = vmax.f32 %v3678_v53, 0.0 }
 0x771   : > { %v3684_v59 = vadd.f32 %v3683_v56, %v9451_v11  ;;  %v3733_v15 = vmax.f32 %v3680_v57, 0.0 }
 0x772   : > { %v3734_v60 = vmax.f32 %v3682_v55, 0.0 }
 0x773   : > { %v3735_v46 = vmax.f32 %v3684_v59, 0.0  ;;  %4754 = vmatpush1.bf16.msra.mxu1 %v7673_v54 }
 0x774   : > { %v9667_v6 = vpack.c.bf16 %v3734_v60, %v3732_v34  ;;  %4755 = vmatprep.subr.bf16.mxu1 %v7680_v58 }
 0x775   : > { %v9669_v2 = vpack.c.bf16 %v3735_v46, %v3733_v15 }
 0x777   : > { %4577 = vmatprep.mubr.bf16.mxu1 %v9669_v2  ;;  %4690 = vmatprep.mubr.bf16.mxu0 %v9669_v2 }
 0x778   : > { %4578 = vmatmul.mubr.bf16.gmra.mrb[128].mxu1 %v9667_v6  ;;  %4691 = vmatmul.mubr.bf16.gmra.mrb[48].mxu0 %v9667_v6 }
 0x779   : > { %4756 = vmatpush1.bf16.msra.mxu1 %v7678_v12 }
 0x77a   : > { %4757 = vmatprep.subr.bf16.mxu1 %v7685_v17 }
 0x77c   : > { %v3687_v23 = vpop.f32.mrb[100].mxu1 }
 0x77d   : > { %v3688_v25 = vadd.f32 %v3687_v23, %v9448_v13  ;;  %v3689_v27 = vpop.f32.mrb[101].mxu1  ;;  %4758 = vmatpush1.bf16.msra.mxu1 %v7683_v20 }
 0x77e   : > { %v3690_v31 = vadd.f32 %v3689_v27, %v9451_v11  ;;  %v3691_v33 = vpop.f32.mrb[102].mxu1  ;;  %4759 = vmatprep.subr.bf16.mxu1 %v7690_v21 }
 0x77f   : > { %v3692_v38 = vadd.f32 %v3691_v33, %v9448_v13  ;;  %v3693_v39 = vpop.f32.mrb[103].mxu1  ;;  %v3736_v40 = vmax.f32 %v3688_v25, 0.0 }
 0x780   : > { %v3694_v24 = vadd.f32 %v3693_v39, %v9451_v11  ;;  %v3737_v35 = vmax.f32 %v3690_v31, 0.0 }
 0x781   : > { %v3738_v47 = vmax.f32 %v3692_v38, 0.0  ;;  %4760 = vmatpush1.bf16.msra.mxu1 %v7688_v28 }
 0x782   : > { %v3739_v48 = vmax.f32 %v3694_v24, 0.0  ;;  %4761 = vmatprep.subr.bf16.mxu1 %v7695_v36 }
 0x783   : > { %v9700_v19 = vpack.c.bf16 %v3738_v47, %v3736_v40 }
 0x784   : > { %v9702_v53 = vpack.c.bf16 %v3739_v48, %v3737_v35 }
 0x785   : > { %v3697_v7 = vpop.f32.mrb[104].mxu1  ;;  %4762 = vmatpush1.bf16.msra.mxu1 %v7693_v49 }
 0x786   : > { %v3698_v57 = vadd.f32 %v3697_v7, %v9448_v13  ;;  %v3699_v61 = vpop.f32.mrb[105].mxu1  ;;  %4587 = vmatprep.mubr.bf16.mxu1 %v9702_v53  ;;  %4700 = vmatprep.mubr.bf16.mxu0 %v9702_v53 }
 0x787   : > { %v3700_v54 = vadd.f32 %v3699_v61, %v9451_v11  ;;  %v3701_v55 = vpop.f32.mrb[106].mxu1  ;;  %4588 = vmatmul.mubr.bf16.gmra.mrb[132].mxu1 %v9700_v19  ;;  %4701 = vmatmul.mubr.bf16.gmra.mrb[52].mxu0 %v9700_v19 }
 0x788   : > { %v3702_v56 = vadd.f32 %v3701_v55, %v9448_v13  ;;  %v3703_v58 = vpop.f32.mrb[107].mxu1  ;;  %7080 = vmatprep.subr.bf16.mxu1 %v9441_v5  ;;  %v3740_v34 = vmax.f32 %v3698_v57, 0.0 }
 0x789   : > { %v3704_v59 = vadd.f32 %v3703_v58, %v9451_v11  ;;  %v3741_v15 = vmax.f32 %v3700_v54, 0.0 }
 0x78a   : > { %v3742_v60 = vmax.f32 %v3702_v56, 0.0 }
 0x78b   : > { %v3743_v46 = vmax.f32 %v3704_v59, 0.0 }
 0x78c   : > { %v9713_v12 = vpack.c.bf16 %v3742_v60, %v3740_v34 }
 0x78d   : > { %v9715_v17 = vpack.c.bf16 %v3743_v46, %v3741_v15 }
 0x78f   : > { %4597 = vmatprep.mubr.bf16.mxu1 %v9715_v17  ;;  %4710 = vmatprep.mubr.bf16.mxu0 %v9715_v17 }
 0x790   : > { %4598 = vmatmul.mubr.bf16.gmra.mrb[136].mxu1 %v9713_v12  ;;  %4711 = vmatmul.mubr.bf16.gmra.mrb[56].mxu0 %v9713_v12 }
 0x792   : > { %v3707_v20 = vpop.f32.mrb[108].mxu1 }
 0x793   : > { %v3708_v5 = vadd.f32 %v3707_v20, %v9448_v13  ;;  %v3709_v21 = vpop.f32.mrb[109].mxu1 }
 0x794   : > { %v3710_v23 = vadd.f32 %v3709_v21, %v9451_v11  ;;  %v3711_v25 = vpop.f32.mrb[110].mxu1 }
 0x795   : > { %v3712_v27 = vadd.f32 %v3711_v25, %v9448_v13  ;;  %v3713_v28 = vpop.f32.mrb[111].mxu1  ;;  %v3744_v33 = vmax.f32 %v3708_v5, 0.0  ;;  %v3904_v13 = vsub.s32 2, %v8764_v62 }
 0x796   : > { %v3714_v31 = vadd.f32 %v3713_v28, %v9451_v11  ;;  %v3745_v38 = vmax.f32 %v3710_v23, 0.0  ;;  %v3892_v11 = vld [vmem:[%s10229_s17] sm:$0xff] }
 0x797   : > { %v3746_v36 = vmax.f32 %v3712_v27, 0.0 }
 0x798   : > { %v3747_v39 = vmax.f32 %v3714_v31, 0.0 }
 0x799   : > { %v3762_v24 = vpack.c.bf16 %v3746_v36, %v3744_v33 }
 0x79a   : > { %v3763_v40 = vpack.c.bf16 %v3747_v39, %v3745_v38 }
 0x79c   : > { %4607 = vmatprep.mubr.bf16.mxu1 %v3763_v40  ;;  %4720 = vmatprep.mubr.bf16.mxu0 %v3763_v40 }
 0x79d   : > { %4608 = vmatmul.mubr.bf16.gmra.mrb[140].mxu1 %v3762_v24  ;;  %4721 = vmatmul.mubr.bf16.gmra.mrb[60].mxu0 %v3762_v24 }
 0x79e   : > { %4763 = vmatprep.mubr.bf16.mxu1 %v9459_v9  ;;  %4876 = vmatprep.mubr.bf16.mxu0 %v9459_v9  ;;  %v9774_v9 = vrot.slane %v3892_v11, %v8767_v63 }
 0x7a5   : > { %4764 = vmatmul.mubr.bf16.vlgmr.msra.gmra.mrb[144].mxu1 %v9457_v8  ;;  %4877 = vmatmul.mubr.bf16.vlgmr.msra.gmra.mrb[64].mxu0 %v9457_v8  ;;  %v3908_v8 = vsub.s32 3, %v8764_v62 }
 0x7a6   : > { %4773 = vmatprep.mubr.bf16.mxu1 %v9525_v42  ;;  %7088 = vmatpush3.bf16.msra.mxu1 %v9467_v10  ;;  %v9776_v10 = vrot.slane %v3892_v11, %v3904_v13 }
 0x7a7   : > { %4884 = vmatprep.mubr.bf16.mxu0 %v9525_v42  ;;  %7081 = vmatprep.subr.bf16.mxu1 %v9475_v22  ;;  %v9779_v22 = vrot.slane %v3892_v11, %v8773_v1 }
 0x7aa   : > { %7089 = vmatpush3.bf16.msra.mxu1 %v9488_v16  ;;  %v9781_v16 = vrot.slane %v3892_v11, %v3908_v8 }
 0x7ab   : > { %7082 = vmatprep.subr.bf16.mxu1 %v9497_v18 }
 0x7ad   : > { %4774 = vmatmul.mubr.bf16.gmra.mrb[148].mxu1 %v9522_v26  ;;  %4885 = vmatmul.mubr.bf16.gmra.mrb[68].mxu0 %v9522_v26 }
 0x7ae   : > { %4783 = vmatprep.mubr.bf16.mxu1 %v9599_v4  ;;  %4892 = vmatprep.mubr.bf16.mxu0 %v9599_v4 }
 0x7af   : > { %7090 = vmatpush3.bf16.msra.mxu1 %v9508_v30 }
 0x7b0   : > { %7083 = vmatprep.subr.bf16.mxu1 %v9518_v37 }
 0x7b3   : > { %7091 = vmatpush3.bf16.msra.mxu1 %v9533_v45 }
 0x7b4   : > { %7084 = vmatprep.subr.bf16.mxu1 %v9541_v3 }
 0x7b5   : > { %4784 = vmatmul.mubr.bf16.gmra.mrb[152].mxu1 %v9597_v29  ;;  %4893 = vmatmul.mubr.bf16.gmra.mrb[72].mxu0 %v9597_v29 }
 0x7b6   : > { %4793 = vmatprep.mubr.bf16.mxu1 %v9639_v44  ;;  %4900 = vmatprep.mubr.bf16.mxu0 %v9639_v44 }
 0x7b7   : > { %7092 = vmatpush3.bf16.msra.mxu1 %v9554_v50 }
 0x7b8   : > { %7085 = vmatprep.subr.bf16.mxu1 %v9563_v52 }
 0x7bb   : > { %7093 = vmatpush3.bf16.msra.mxu1 %v9573_v43 }
 0x7bc   : > { %7086 = vmatprep.subr.bf16.mxu1 %v9583_v0 }
 0x7bd   : > { %4794 = vmatmul.mubr.bf16.gmra.mrb[156].mxu1 %v9637_v41  ;;  %4901 = vmatmul.mubr.bf16.gmra.mrb[76].mxu0 %v9637_v41 }
 0x7be   : > { %4803 = vmatprep.mubr.bf16.mxu1 %v9669_v2 }
 0x7bf   : > { %7094 = vmatpush3.bf16.msra.mxu1 %v9594_v51 }
 0x7c0   : > { %7087 = vmatprep.subr.bf16.mxu1 %v9607_v32 }
 0x7c3   : > { %7095 = vmatpush3.bf16.msra.mxu1 %v9616_v14 }
 0x7c5   : > { %4804 = vmatmul.mubr.bf16.gmra.mrb[160].mxu1 %v9667_v6 }
 0x7c6   : > { %4813 = vmatprep.mubr.bf16.mxu1 %v9702_v53 }
 0x7cd   : > { %4814 = vmatmul.mubr.bf16.gmra.mrb[164].mxu1 %v9700_v19 }
 0x7ce   : > { %4823 = vmatprep.mubr.bf16.mxu1 %v9715_v17 }
 0x7d5   : > { %4824 = vmatmul.mubr.bf16.gmra.mrb[168].mxu1 %v9713_v12 }
 0x7d6   : > { %4833 = vmatprep.mubr.bf16.mxu1 %v3763_v40 }
 0x7dd   : > { %4834 = vmatmul.mubr.bf16.gmra.mrb[172].mxu1 %v3762_v24 }
 0x7de   : > { %4908 = vmatprep.mubr.bf16.mxu1 %v9669_v2 }
 0x7e5   : > { %4909 = vmatmul.mubr.bf16.vlgmr.msra.gmra.mrb[176].mxu1 %v9667_v6 }
 0x7e6   : > { %4916 = vmatprep.mubr.bf16.mxu1 %v9702_v53 }
 0x7ed   : > { %4917 = vmatmul.mubr.bf16.gmra.mrb[180].mxu1 %v9700_v19 }
 0x7ee   : > { %4924 = vmatprep.mubr.bf16.mxu1 %v9715_v17 }
 0x7f5   : > { %4925 = vmatmul.mubr.bf16.gmra.mrb[184].mxu1 %v9713_v12 }
 0x7f6   : > { %4932 = vmatprep.mubr.bf16.mxu1 %v3763_v40 }
 0x7fd   : > { %4933 = vmatmul.mubr.bf16.gmra.mrb[188].mxu1 %v3762_v24 }
 0x817   : > { %v4539_v18 = vpop.f32.mrb[112].mxu1  ;;  %v4652_v30 = vpop.f32.mrb[32].mxu0 }
 0x818   : > { %v4540_v37 = vadd.f32 %v4539_v18, %v9774_v9  ;;  %v4653_v26 = vadd.f32 %v4652_v30, %v9776_v10  ;;  %v4541_v42 = vpop.f32.mrb[113].mxu1  ;;  %v4654_v45 = vpop.f32.mrb[33].mxu0 }
 0x819   : > { %v4542_v3 = vadd.f32 %v4541_v42, %v9779_v22  ;;  %v4655_v63 = vadd.f32 %v4654_v45, %v9781_v16  ;;  %v4543_v50 = vpop.f32.mrb[114].mxu1  ;;  %v4656_v52 = vpop.f32.mrb[34].mxu0 }
 0x81a   : > { %v6530_v43 = vmul.f32 -1.442695, %v4540_v37  ;;  %v6532_v0 = vmul.f32 -1.442695, %v4653_v26  ;;  %v4544_v1 = vadd.f32 %v4543_v50, %v9774_v9  ;;  %v4657_v51 = vadd.f32 %v4656_v52, %v9776_v10  ;;  %v4545_v29 = vpop.f32.mrb[115].mxu1  ;;  %v4658_v4 = vpop.f32.mrb[35].mxu0 }
 0x81b   : > { %v6531_v32 = vmul.f32 -1.442695, %v4542_v3  ;;  %v6533_v14 = vmul.f32 -1.442695, %v4655_v63  ;;  %v4546_v41 = vadd.f32 %v4545_v29, %v9779_v22  ;;  %v4659_v44 = vadd.f32 %v4658_v4, %v9781_v16 }
 0x81c   : > { %7730 = vpow2.f32 %v6530_v43  ;;  %v6537_v6 = vmul.f32 -1.442695, %v4544_v1  ;;  %v6539_v2 = vmul.f32 -1.442695, %v4657_v51 }
 0x81d   : > { %7732 = vpow2.f32 %v6532_v0  ;;  %v6538_v47 = vmul.f32 -1.442695, %v4546_v41  ;;  %v6540_v49 = vmul.f32 -1.442695, %v4659_v44 }
 0x81e   : > { %7734 = vpow2.f32 %v6531_v32 }
 0x81f   : > { %7736 = vpow2.f32 %v6533_v14 }
 0x820   : > { %7738 = vpow2.f32 %v6537_v6 }
 0x821   : > { %7740 = vpow2.f32 %v6539_v2 }
 0x822   : > { %7742 = vpow2.f32 %v6538_v47 }
 0x823   : > { %7744 = vpow2.f32 %v6540_v49 }
 0x825   : > { %v4549_v35 = vpop.f32.mrb[116].mxu1  ;;  %v4662_v48 = vpop.f32.mrb[36].mxu0 }
 0x826   : > { %v7731_v19 = vpop.eup %7730  ;;  %v4551_v53 = vpop.f32.mrb[117].mxu1  ;;  %v4550_v15 = vadd.f32 %v4549_v35, %v9774_v9  ;;  %v4663_v20 = vadd.f32 %v4662_v48, %v9776_v10 }
 0x827   : > { %v4664_v7 = vpop.f32.mrb[37].mxu0  ;;  %v7733_v57 = vpop.eup %7732  ;;  %v5277_v61 = vadd.f32 1.0, %v7731_v19  ;;  %v4552_v23 = vadd.f32 %v4551_v53, %v9779_v22 }
 0x828   : > { %v4553_v54 = vpop.f32.mrb[118].mxu1  ;;  %v4666_v55 = vpop.f32.mrb[38].mxu0  ;;  %v5279_v58 = vadd.f32 1.0, %v7733_v57  ;;  %v4665_v28 = vadd.f32 %v4664_v7, %v9781_v16  ;;  %v6544_v36 = vmul.f32 -1.442695, %v4550_v15 }
 0x829   : > { %v7735_v56 = vpop.eup %7734  ;;  %v4555_v59 = vpop.f32.mrb[119].mxu1  ;;  %7746 = vrcp.f32 %v5277_v61  ;;  %v4554_v38 = vadd.f32 %v4553_v54, %v9774_v9  ;;  %v6546_v24 = vmul.f32 -1.442695, %v4663_v20  ;;  %v4667_v40 = vadd.f32 %v4666_v55, %v9776_v10 }
 0x82a   : > { %v7737_v34 = vpop.eup %7736  ;;  %v5278_v60 = vadd.f32 1.0, %v7735_v56  ;;  %v4668_v46 = vpop.f32.mrb[39].mxu0  ;;  %7748 = vrcp.f32 %v5279_v58  ;;  %v6545_v13 = vmul.f32 -1.442695, %v4552_v23  ;;  %v4556_v11 = vadd.f32 %v4555_v59, %v9779_v22 }
 0x82b   : > { %v7739_v12 = vpop.eup %7738  ;;  %v5280_v17 = vadd.f32 1.0, %v7737_v34  ;;  %v6547_v8 = vmul.f32 -1.442695, %v4665_v28  ;;  %v4669_v18 = vadd.f32 %v4668_v46, %v9781_v16  ;;  %v6551_v30 = vmul.f32 -1.442695, %v4554_v38 }
 0x82c   : > { %v7741_v5 = vpop.eup %7740  ;;  %7750 = vrcp.f32 %v5278_v60  ;;  %v5284_v21 = vadd.f32 1.0, %v7739_v12  ;;  %v6553_v37 = vmul.f32 -1.442695, %v4667_v40  ;;  %v6552_v42 = vmul.f32 -1.442695, %v4556_v11 }
 0x82d   : > { %v7743_v25 = vpop.eup %7742  ;;  %7752 = vrcp.f32 %v5280_v17  ;;  %v5286_v27 = vadd.f32 1.0, %v7741_v5  ;;  %v6554_v3 = vmul.f32 -1.442695, %v4669_v18 }
 0x82e   : > { %v7745_v31 = vpop.eup %7744  ;;  %7754 = vrcp.f32 %v5284_v21  ;;  %v5285_v33 = vadd.f32 1.0, %v7743_v25 }
 0x82f   : > { %7756 = vrcp.f32 %v5286_v27  ;;  %v5287_v39 = vadd.f32 1.0, %v7745_v31 }
 0x830   : > { %7758 = vrcp.f32 %v5285_v33 }
 0x831   : > { %7760 = vrcp.f32 %v5287_v39 }
 0x832   : > { %7762 = vpow2.f32 %v6544_v36 }
 0x833   : > { %7764 = vpow2.f32 %v6546_v24  ;;  %v7747_v26 = vpop.eup %7746 }
 0x834   : > { %7766 = vpow2.f32 %v6545_v13  ;;  %v7749_v45 = vpop.eup %7748  ;;  %v4559_v63 = vpop.f32.mrb[120].mxu1 }
 0x835   : > { %7768 = vpow2.f32 %v6547_v8  ;;  %v4672_v50 = vpop.f32.mrb[40].mxu0  ;;  %v4560_v43 = vadd.f32 %v4559_v63, %v9774_v9  ;;  %v4561_v1 = vpop.f32.mrb[121].mxu1 }
 0x836   : > { %v7751_v52 = vpop.eup %7750  ;;  %7770 = vpow2.f32 %v6551_v30  ;;  %v4673_v0 = vadd.f32 %v4672_v50, %v9776_v10  ;;  %v4674_v51 = vpop.f32.mrb[41].mxu0  ;;  %v4562_v32 = vadd.f32 %v4561_v1, %v9779_v22 }
 0x837   : > { %v7753_v29 = vpop.eup %7752  ;;  %v6708_v4 = vpack.c.bf16 %v7751_v52, %v7747_v26  ;;  %7772 = vpow2.f32 %v6553_v37  ;;  %v4675_v14 = vadd.f32 %v4674_v51, %v9781_v16  ;;  %v4563_v41 = vpop.f32.mrb[122].mxu1  ;;  %v6558_v47 = vmul.f32 -1.442695, %v4560_v43 }
 0x838   : > { %v4676_v44 = vpop.f32.mrb[42].mxu0  ;;  %v7755_v6 = vpop.eup %7754  ;;  %v6709_v2 = vpack.c.bf16 %v7753_v29, %v7749_v45  ;;  %7774 = vpow2.f32 %v6552_v42  ;;  %v6560_v49 = vmul.f32 -1.442695, %v4673_v0  ;;  %v6559_v53 = vmul.f32 -1.442695, %v4562_v32 }
 0x839   : > { %v4565_v35 = vpop.f32.mrb[123].mxu1  ;;  %v4678_v48 = vpop.f32.mrb[43].mxu0  ;;  %5965 = vst [vmem:[%s9804_s25] sm:$0xff] %v6708_v4  ;;  %7776 = vpow2.f32 %v6554_v3  ;;  %v6561_v7 = vmul.f32 -1.442695, %v4675_v14  ;;  %v4564_v57 = vadd.f32 %v4563_v41, %v9774_v9  ;;  %v4677_v30 = vadd.f32 %v4676_v44, %v9776_v10 }
 0x83a   : > { %v7757_v19 = vpop.eup %7756  ;;  %5966 = vst [vmem:[%s9804_s25 + $0x8] sm:$0xff] %v6709_v2  ;;  %7778 = vpow2.f32 %v6558_v47  ;;  %v4566_v42 = vadd.f32 %v4565_v35, %v9779_v22  ;;  %v4679_v63 = vadd.f32 %v4678_v48, %v9781_v16 }
 0x83b   : > { %v7759_v61 = vpop.eup %7758  ;;  %7780 = vpow2.f32 %v6560_v49  ;;  %v6565_v56 = vmul.f32 -1.442695, %v4564_v57  ;;  %v6567_v51 = vmul.f32 -1.442695, %v4677_v30 }
 0x83c   : > { %v7761_v54 = vpop.eup %7760  ;;  %v6712_v55 = vpack.c.bf16 %v7759_v61, %v7755_v6  ;;  %7782 = vpow2.f32 %v6559_v53  ;;  %v6566_v14 = vmul.f32 -1.442695, %v4566_v42  ;;  %v6568_v6 = vmul.f32 -1.442695, %v4679_v63 }
 0x83d   : > { %v7763_v58 = vpop.eup %7762  ;;  %v6713_v59 = vpack.c.bf16 %v7761_v54, %v7757_v19  ;;  %7784 = vpow2.f32 %v6561_v7  ;;  %v4569_v12 = vpop.f32.mrb[124].mxu1 }
 0x83e   : > { %v7765_v34 = vpop.eup %7764  ;;  %5969 = vst [vmem:[%s9804_s25 + $0x1c] sm:$0xff] %v6712_v55  ;;  %v5291_v60 = vadd.f32 1.0, %v7763_v58  ;;  %7786 = vpow2.f32 %v6565_v56  ;;  %v4682_v17 = vpop.f32.mrb[44].mxu0  ;;  %v4570_v43 = vadd.f32 %v4569_v12, %v9774_v9 }
 0x83f   : > { %v7767_v15 = vpop.eup %7766  ;;  %5970 = vst [vmem:[%s9804_s25 + $0x24] sm:$0xff] %v6713_v59  ;;  %v5293_v46 = vadd.f32 1.0, %v7765_v34  ;;  %v4571_v21 = vpop.f32.mrb[125].mxu1  ;;  %v4683_v29 = vadd.f32 %v4682_v17, %v9776_v10 }
 0x840   : > { %v7769_v20 = vpop.eup %7768  ;;  %7788 = vrcp.f32 %v5291_v60  ;;  %v5292_v5 = vadd.f32 1.0, %v7767_v15  ;;  %v4684_v23 = vpop.f32.mrb[45].mxu0  ;;  %v4572_v41 = vadd.f32 %v4571_v21, %v9779_v22  ;;  %v6572_v49 = vmul.f32 -1.442695, %v4570_v43 }
 0x841   : > { %v7771_v25 = vpop.eup %7770  ;;  %7790 = vrcp.f32 %v5293_v46  ;;  %v5294_v27 = vadd.f32 1.0, %v7769_v20  ;;  %v4573_v28 = vpop.f32.mrb[126].mxu1  ;;  %v4685_v2 = vadd.f32 %v4684_v23, %v9781_v16  ;;  %v6574_v53 = vmul.f32 -1.442695, %v4683_v29 }
 0x842   : > { %v4686_v31 = vpop.f32.mrb[46].mxu0  ;;  %v7773_v33 = vpop.eup %7772  ;;  %7792 = vrcp.f32 %v5292_v5  ;;  %v5298_v36 = vadd.f32 1.0, %v7771_v25  ;;  %v4574_v35 = vadd.f32 %v4573_v28, %v9774_v9  ;;  %v6573_v56 = vmul.f32 -1.442695, %v4572_v41 }
 0x843   : > { %v4575_v38 = vpop.f32.mrb[127].mxu1  ;;  %v7775_v39 = vpop.eup %7774  ;;  %7794 = vrcp.f32 %v5294_v27  ;;  %v5300_v24 = vadd.f32 1.0, %v7773_v33  ;;  %v4687_v7 = vadd.f32 %v4686_v31, %v9776_v10  ;;  %v6575_v15 = vmul.f32 -1.442695, %v4685_v2 }
 0x844   : > { %v4688_v40 = vpop.f32.mrb[47].mxu0  ;;  %v7777_v13 = vpop.eup %7776  ;;  %7796 = vrcp.f32 %v5298_v36  ;;  %v5299_v11 = vadd.f32 1.0, %v7775_v39  ;;  %v4576_v58 = vadd.f32 %v4575_v38, %v9779_v22  ;;  %v6579_v5 = vmul.f32 -1.442695, %v4574_v35 }
 0x845   : > { %v7779_v8 = vpop.eup %7778  ;;  %7798 = vrcp.f32 %v5300_v24  ;;  %v5301_v18 = vadd.f32 1.0, %v7777_v13  ;;  %v4689_v46 = vadd.f32 %v4688_v40, %v9781_v16  ;;  %v6581_v31 = vmul.f32 -1.442695, %v4687_v7 }
 0x846   : > { %v7781_v37 = vpop.eup %7780  ;;  %7800 = vrcp.f32 %v5299_v11  ;;  %v5305_v26 = vadd.f32 1.0, %v7779_v8  ;;  %v6580_v39 = vmul.f32 -1.442695, %v4576_v58 }
 0x847   : > { %v7783_v45 = vpop.eup %7782  ;;  %7802 = vrcp.f32 %v5301_v18  ;;  %v5307_v3 = vadd.f32 1.0, %v7781_v37  ;;  %v6582_v40 = vmul.f32 -1.442695, %v4689_v46 }
 0x848   : > { %v7785_v50 = vpop.eup %7784  ;;  %7804 = vrcp.f32 %v5305_v26  ;;  %v5306_v52 = vadd.f32 1.0, %v7783_v45 }
 0x849   : > { %v7787_v0 = vpop.eup %7786  ;;  %7806 = vrcp.f32 %v5307_v3  ;;  %v5308_v1 = vadd.f32 1.0, %v7785_v50 }
 0x84a   : > { %v7789_v4 = vpop.eup %7788  ;;  %7808 = vrcp.f32 %v5306_v52  ;;  %v5312_v32 = vadd.f32 1.0, %v7787_v0 }
 0x84b   : > { %v7791_v44 = vpop.eup %7790  ;;  %7810 = vrcp.f32 %v5308_v1  ;;  %v4579_v57 = vpop.f32.mrb[128].mxu1 }
 0x84c   : > { %v7793_v47 = vpop.eup %7792  ;;  %7812 = vrcp.f32 %v5312_v32  ;;  %v4692_v61 = vpop.f32.mrb[48].mxu0  ;;  %v4580_v21 = vadd.f32 %v4579_v57, %v9774_v9 }
 0x84d   : > { %v7795_v48 = vpop.eup %7794  ;;  %v6716_v19 = vpack.c.bf16 %v7793_v47, %v7789_v4  ;;  %7814 = vpow2.f32 %v6567_v51  ;;  %v9825_v59 = vpop.f32.mrb[129].mxu1  ;;  %v4693_v33 = vadd.f32 %v4692_v61, %v9776_v10 }
 0x84e   : > { %v7797_v54 = vpop.eup %7796  ;;  %v6717_v55 = vpack.c.bf16 %v7795_v48, %v7791_v44  ;;  %7816 = vpow2.f32 %v6566_v14  ;;  %v9827_v34 = vpop.f32.mrb[49].mxu0  ;;  %v6586_v11 = vmul.f32 -1.442695, %v4580_v21 }
 0x84f   : > { %v7799_v60 = vpop.eup %7798  ;;  %5973 = vst [vmem:[%s9804_s25 + $0x38] sm:$0xff] %v6716_v19  ;;  %7818 = vpow2.f32 %v6568_v6  ;;  %v9831_v12 = vpop.f32.mrb[130].mxu1  ;;  %v6588_v30 = vmul.f32 -1.442695, %v4693_v33 }
 0x850   : > { %v9833_v17 = vpop.f32.mrb[50].mxu0  ;;  %v7801_v20 = vpop.eup %7800  ;;  %5974 = vst [vmem:[%s9804_s25 + $0x40] sm:$0xff] %v6717_v55  ;;  %7820 = vpow2.f32 %v6572_v49 }
 0x851   : > { %v9837_v23 = vpop.f32.mrb[131].mxu1  ;;  %v9839_v25 = vpop.f32.mrb[51].mxu0  ;;  %v6720_v28 = vpack.c.bf16 %v7801_v20, %v7797_v54  ;;  %7822 = vpow2.f32 %v6574_v53  ;;  %v4582_v53 = vadd.f32 %v9825_v59, %v9779_v22  ;;  %v4695_v54 = vadd.f32 %v9827_v34, %v9781_v16 }
 0x852   : > { %v7803_v27 = vpop.eup %7802  ;;  %7824 = vpow2.f32 %v6573_v56  ;;  %v4697_v59 = vadd.f32 %v9833_v17, %v9776_v10  ;;  %v4586_v34 = vadd.f32 %v9837_v23, %v9779_v22 }
 0x853   : > { %v7805_v36 = vpop.eup %7804  ;;  %v6721_v38 = vpack.c.bf16 %v7803_v27, %v7799_v60  ;;  %5977 = vst [vmem:[%s9804_s25 + $0x54] sm:$0xff] %v6720_v28  ;;  %7826 = vpow2.f32 %v6575_v15  ;;  %v4584_v60 = vadd.f32 %v9831_v12, %v9774_v9  ;;  %v6587_v21 = vmul.f32 -1.442695, %v4582_v53 }
 0x854   : > { %v7807_v24 = vpop.eup %7806  ;;  %7828 = vpow2.f32 %v6579_v5  ;;  %v4699_v12 = vadd.f32 %v9839_v25, %v9781_v16 }
 0x855   : > { %v7809_v13 = vpop.eup %7808  ;;  %5978 = vst [vmem:[%s9804_s25 + $0x5c] sm:$0xff] %v6721_v38  ;;  %7830 = vpow2.f32 %v6581_v31  ;;  %v6589_v31 = vmul.f32 -1.442695, %v4695_v54 }
 0x856   : > { %v7811_v8 = vpop.eup %7810  ;;  %v6724_v18 = vpack.c.bf16 %v7809_v13, %v7805_v36  ;;  %7832 = vpow2.f32 %v6580_v39  ;;  %v6593_v36 = vmul.f32 -1.442695, %v4584_v60 }
 0x857   : > { %v9844_v37 = vpop.eup %7812  ;;  %v6725_v26 = vpack.c.bf16 %v7811_v8, %v7807_v24  ;;  %7834 = vpow2.f32 %v6582_v40  ;;  %v6595_v40 = vmul.f32 -1.442695, %v4697_v59 }
 0x858   : > { %v7815_v42 = vpop.eup %7814  ;;  %5981 = vst [vmem:[%s9804_s25 + $0x70] sm:$0xff] %v6724_v18  ;;  %7836 = vpow2.f32 %v6586_v11 }
 0x859   : > { %v7817_v45 = vpop.eup %7816  ;;  %5982 = vst [vmem:[%s9804_s25 + $0x78] sm:$0xff] %v6725_v26  ;;  %v5314_v3 = vadd.f32 1.0, %v7815_v42  ;;  %7838 = vpow2.f32 %v6588_v30  ;;  %v6594_v30 = vmul.f32 -1.442695, %v4586_v34 }
 0x85a   : > { %v7819_v63 = vpop.eup %7818  ;;  %v5313_v50 = vadd.f32 1.0, %v7817_v45  ;;  %v4589_v4 = vpop.f32.mrb[132].mxu1 }
 0x85b   : > { %v7821_v52 = vpop.eup %7820  ;;  %7840 = vrcp.f32 %v5314_v3  ;;  %v5315_v43 = vadd.f32 1.0, %v7819_v63  ;;  %v4702_v32 = vpop.f32.mrb[52].mxu0  ;;  %v4590_v38 = vadd.f32 %v4589_v4, %v9774_v9  ;;  %v6596_v3 = vmul.f32 -1.442695, %v4699_v12 }
 0x85c   : > { %v7823_v0 = vpop.eup %7822  ;;  %7842 = vrcp.f32 %v5313_v50  ;;  %v5319_v1 = vadd.f32 1.0, %v7821_v52  ;;  %v4591_v44 = vpop.f32.mrb[133].mxu1  ;;  %v4703_v13 = vadd.f32 %v4702_v32, %v9776_v10 }
 0x85d   : > { %v7825_v51 = vpop.eup %7824  ;;  %7844 = vrcp.f32 %v5315_v43  ;;  %v5321_v29 = vadd.f32 1.0, %v7823_v0  ;;  %v4704_v6 = vpop.f32.mrb[53].mxu0  ;;  %v4592_v26 = vadd.f32 %v4591_v44, %v9779_v22  ;;  %v6600_v0 = vmul.f32 -1.442695, %v4590_v38 }
 0x85e   : > { %v7827_v14 = vpop.eup %7826  ;;  %7846 = vrcp.f32 %v5319_v1  ;;  %v5320_v41 = vadd.f32 1.0, %v7825_v51  ;;  %v4593_v49 = vpop.f32.mrb[134].mxu1  ;;  %v4705_v63 = vadd.f32 %v4704_v6, %v9781_v16  ;;  %v6602_v4 = vmul.f32 -1.442695, %v4703_v13 }
 0x85f   : > { %v7829_v2 = vpop.eup %7828  ;;  %7848 = vrcp.f32 %v5321_v29  ;;  %v5322_v47 = vadd.f32 1.0, %v7827_v14  ;;  %v9848_v35 = vpop.f32.mrb[54].mxu0  ;;  %v4594_v1 = vadd.f32 %v4593_v49, %v9774_v9  ;;  %v6601_v44 = vmul.f32 -1.442695, %v4592_v26 }
 0x860   : > { %v7831_v48 = vpop.eup %7830  ;;  %7850 = vrcp.f32 %v5320_v41  ;;  %v5326_v19 = vadd.f32 1.0, %v7829_v2  ;;  %v9852_v7 = vpop.f32.mrb[135].mxu1  ;;  %v4707_v32 = vadd.f32 %v9848_v35, %v9776_v10 }
 0x861   : > { %v7833_v57 = vpop.eup %7832  ;;  %7852 = vrcp.f32 %v5322_v47  ;;  %v5328_v61 = vadd.f32 1.0, %v7831_v48  ;;  %v9856_v55 = vpop.f32.mrb[55].mxu0  ;;  %v4596_v6 = vadd.f32 %v9852_v7, %v9779_v22  ;;  %v6603_v47 = vmul.f32 -1.442695, %v4705_v63 }
 0x862   : > { %v7835_v56 = vpop.eup %7834  ;;  %7854 = vrcp.f32 %v5326_v19  ;;  %v5327_v58 = vadd.f32 1.0, %v7833_v57  ;;  %v6607_v48 = vmul.f32 -1.442695, %v4594_v1  ;;  %v6609_v35 = vmul.f32 -1.442695, %v4707_v32 }
 0x863   : > { %v7837_v15 = vpop.eup %7836  ;;  %7856 = vrcp.f32 %v5328_v61  ;;  %v5329_v46 = vadd.f32 1.0, %v7835_v56  ;;  %v9867_v17 = vpop.f32.mrb[136].mxu1  ;;  %v6608_v54 = vmul.f32 -1.442695, %v4596_v6 }
 0x864   : > { %v7839_v20 = vpop.eup %7838  ;;  %7858 = vrcp.f32 %v5327_v58  ;;  %v5333_v5 = vadd.f32 1.0, %v7837_v15  ;;  %v9869_v39 = vpop.f32.mrb[56].mxu0 }
 0x865   : > { %v7841_v27 = vpop.eup %7840  ;;  %7860 = vrcp.f32 %v5329_v46  ;;  %v5335_v28 = vadd.f32 1.0, %v7839_v20  ;;  %v9873_v11 = vpop.f32.mrb[137].mxu1 }
 0x866   : > { %v7843_v33 = vpop.eup %7842  ;;  %7862 = vrcp.f32 %v5333_v5  ;;  %v9875_v25 = vpop.f32.mrb[57].mxu0 }
 0x867   : > { %v7845_v24 = vpop.eup %7844  ;;  %v6728_v23 = vpack.c.bf16 %v7843_v33, %v9844_v37  ;;  %7864 = vrcp.f32 %v5335_v28  ;;  %v9878_v42 = vpop.f32.mrb[138].mxu1 }
 0x868   : > { %v7847_v8 = vpop.eup %7846  ;;  %v6729_v18 = vpack.c.bf16 %v7845_v24, %v7841_v27  ;;  %7866 = vpow2.f32 %v6587_v21  ;;  %v9880_v45 = vpop.f32.mrb[58].mxu0 }
 0x869   : > { %v7849_v37 = vpop.eup %7848  ;;  %5985 = vst [vmem:[%s9804_s25 + $0x8c] sm:$0xff] %v6728_v23  ;;  %7868 = vpow2.f32 %v6589_v31  ;;  %v9884_v50 = vpop.f32.mrb[139].mxu1 }
 0x86a   : > { %v9886_v52 = vpop.f32.mrb[59].mxu0  ;;  %v7851_v43 = vpop.eup %7850  ;;  %5986 = vst [vmem:[%s9804_s25 + $0x94] sm:$0xff] %v6729_v18  ;;  %7870 = vpow2.f32 %v6593_v36 }
 0x86b   : > { %v7853_v51 = vpop.eup %7852  ;;  %v6732_v29 = vpack.c.bf16 %v7851_v43, %v7847_v8  ;;  %7872 = vpow2.f32 %v6595_v40 }
 0x86c   : > { %v7855_v14 = vpop.eup %7854  ;;  %v6733_v41 = vpack.c.bf16 %v7853_v51, %v7849_v37  ;;  %7874 = vpow2.f32 %v6594_v30  ;;  %v4709_v30 = vadd.f32 %v9856_v55, %v9781_v16  ;;  %v4602_v55 = vadd.f32 %v9873_v11, %v9779_v22 }
 0x86d   : > { %v7857_v2 = vpop.eup %7856  ;;  %5989 = vst [vmem:[%s9804_s25 + $0xa8] sm:$0xff] %v6732_v29  ;;  %7876 = vpow2.f32 %v6596_v3  ;;  %v4600_v3 = vadd.f32 %v9867_v17, %v9774_v9 }
 0x86e   : > { %v7859_v49 = vpop.eup %7858  ;;  %5990 = vst [vmem:[%s9804_s25 + $0xb0] sm:$0xff] %v6733_v41  ;;  %7878 = vpow2.f32 %v6600_v0  ;;  %v4713_v0 = vadd.f32 %v9869_v39, %v9776_v10  ;;  %v6610_v41 = vmul.f32 -1.442695, %v4709_v30 }
 0x86f   : > { %v7861_v19 = vpop.eup %7860  ;;  %v6736_v53 = vpack.c.bf16 %v7859_v49, %v7855_v14  ;;  %7880 = vpow2.f32 %v6602_v4  ;;  %v6614_v49 = vmul.f32 -1.442695, %v4600_v3 }
 0x870   : > { %v9896_v57 = vpop.eup %7862  ;;  %v6737_v61 = vpack.c.bf16 %v7861_v19, %v7857_v2  ;;  %7882 = vpow2.f32 %v6601_v44  ;;  %v9902_v15 = vpop.f32.mrb[140].mxu1  ;;  %v4715_v44 = vadd.f32 %v9875_v25, %v9781_v16  ;;  %v4604_v25 = vadd.f32 %v9878_v42, %v9774_v9 }
 0x871   : > { %v9898_v7 = vpop.eup %7864  ;;  %5993 = vst [vmem:[%s9804_s25 + $0xc4] sm:$0xff] %v6736_v53  ;;  %7884 = vpow2.f32 %v6603_v47  ;;  %v9904_v46 = vpop.f32.mrb[60].mxu0 }
 0x872   : > { %v7867_v56 = vpop.eup %7866  ;;  %5994 = vst [vmem:[%s9804_s25 + $0xcc] sm:$0xff] %v6737_v61  ;;  %7886 = vpow2.f32 %v6607_v48  ;;  %v9906_v5 = vpop.f32.mrb[141].mxu1  ;;  %v6616_v61 = vmul.f32 -1.442695, %v4713_v0 }
 0x873   : > { %v7869_v58 = vpop.eup %7868  ;;  %v5334_v60 = vadd.f32 1.0, %v7867_v56  ;;  %7888 = vpow2.f32 %v6609_v35  ;;  %v9908_v21 = vpop.f32.mrb[61].mxu0 }
 0x874   : > { %v7871_v59 = vpop.eup %7870  ;;  %v5336_v20 = vadd.f32 1.0, %v7869_v58  ;;  %7890 = vpow2.f32 %v6608_v54  ;;  %v9910_v28 = vpop.f32.mrb[142].mxu1 }
 0x875   : > { %v7873_v34 = vpop.eup %7872  ;;  %7892 = vrcp.f32 %v5334_v60  ;;  %v5340_v27 = vadd.f32 1.0, %v7871_v59  ;;  %v9912_v31 = vpop.f32.mrb[62].mxu0  ;;  %v6615_v60 = vmul.f32 -1.442695, %v4602_v55  ;;  %v4717_v59 = vadd.f32 %v9880_v45, %v9776_v10 }
 0x876   : > { %v7875_v12 = vpop.eup %7874  ;;  %7894 = vrcp.f32 %v5336_v20  ;;  %v5342_v33 = vadd.f32 1.0, %v7873_v34  ;;  %v9914_v36 = vpop.f32.mrb[143].mxu1  ;;  %v6621_v45 = vmul.f32 -1.442695, %v4604_v25 }
 0x877   : > { %v7877_v38 = vpop.eup %7876  ;;  %7896 = vrcp.f32 %v5340_v27  ;;  %v5341_v24 = vadd.f32 1.0, %v7875_v12  ;;  %v9916_v23 = vpop.f32.mrb[63].mxu0  ;;  %v4606_v27 = vadd.f32 %v9884_v50, %v9779_v22 }
 0x878   : > { %v7879_v40 = vpop.eup %7878  ;;  %7898 = vrcp.f32 %v5342_v33  ;;  %v5343_v13 = vadd.f32 1.0, %v7877_v38  ;;  %v9924_v1 = vpop.f32.mrb[144].mxu1  ;;  %v6617_v33 = vmul.f32 -1.442695, %v4715_v44 }
 0x879   : > { %v7881_v8 = vpop.eup %7880  ;;  %7900 = vrcp.f32 %v5341_v24  ;;  %v5347_v18 = vadd.f32 1.0, %v7879_v40  ;;  %v6912_v4 = vpop.f32.mrb[64].mxu0  ;;  %v6622_v3 = vmul.f32 -1.442695, %v4606_v27 }
 0x87a   : > { %v7883_v26 = vpop.eup %7882  ;;  %7902 = vrcp.f32 %v5343_v13  ;;  %v5349_v37 = vadd.f32 1.0, %v7881_v8  ;;  %v9928_v32 = vpop.f32.mrb[145].mxu1  ;;  %v6623_v8 = vmul.f32 -1.442695, %v4717_v59 }
 0x87b   : > { %v7885_v63 = vpop.eup %7884  ;;  %7904 = vrcp.f32 %v5347_v18  ;;  %v5348_v43 = vadd.f32 1.0, %v7883_v26  ;;  %v6913_v6 = vpop.f32.mrb[65].mxu0  ;;  %v4723_v18 = vadd.f32 %v9904_v46, %v9776_v10  ;;  %v4725_v46 = vadd.f32 %v9908_v21, %v9781_v16 }
 0x87c   : > { %v7887_v51 = vpop.eup %7886  ;;  %7906 = vrcp.f32 %v5349_v37  ;;  %v5350_v29 = vadd.f32 1.0, %v7885_v63  ;;  %v9932_v39 = vpop.f32.mrb[146].mxu1  ;;  %v9934_v48 = vadd.f32 %v6913_v6, %v6912_v4 }
 0x87d   : > { %v7889_v14 = vpop.eup %7888  ;;  %7908 = vrcp.f32 %v5348_v43  ;;  %v5354_v17 = vadd.f32 1.0, %v7887_v51  ;;  %v6915_v11 = vpop.f32.mrb[66].mxu0  ;;  %v6630_v6 = vmul.f32 -1.442695, %v4723_v18 }
 0x87e   : > { %v7891_v2 = vpop.eup %7890  ;;  %7910 = vrcp.f32 %v5350_v29  ;;  %v5356_v47 = vadd.f32 1.0, %v7889_v14  ;;  %v9936_v19 = vpop.f32.mrb[147].mxu1 }
 0x87f   : > { %v7893_v53 = vpop.eup %7892  ;;  %7912 = vrcp.f32 %v5354_v17  ;;  %v5355_v35 = vadd.f32 1.0, %v7891_v2  ;;  %v6916_v54 = vpop.f32.mrb[67].mxu0 }
 0x880   : > { %v7895_v56 = vpop.eup %7894  ;;  %v6740_v58 = vpack.c.bf16 %v7893_v53, %v9896_v57  ;;  %7914 = vrcp.f32 %v5356_v47  ;;  %v9946_v12 = vadd.f32 %v6916_v54, %v6915_v11  ;;  %v4719_v57 = vadd.f32 %v9886_v52, %v9781_v16  ;;  %v9954_v24 = vpop.f32.mrb[148].mxu1 }
 0x881   : > { %v7897_v20 = vpop.eup %7896  ;;  %v6741_v34 = vpack.c.bf16 %v7895_v56, %v9898_v7  ;;  %7916 = vrcp.f32 %v5355_v35  ;;  %v4610_v7 = vadd.f32 %v9902_v15, %v9774_v9  ;;  %v6918_v40 = vpop.f32.mrb[68].mxu0  ;;  %v4612_v15 = vadd.f32 %v9906_v5, %v9779_v22 }
 0x882   : > { %v7899_v42 = vpop.eup %7898  ;;  %5997 = vst [vmem:[%s9804_s25 + $0xe0] sm:$0xff] %v6740_v58  ;;  %7918 = vpow2.f32 %v6610_v41  ;;  %v9958_v30 = vpop.f32.mrb[149].mxu1  ;;  %v6624_v51 = vmul.f32 -1.442695, %v4719_v57  ;;  %v6631_v11 = vmul.f32 -1.442695, %v4725_v46 }
 0x883   : > { %v7901_v38 = vpop.eup %7900  ;;  %5998 = vst [vmem:[%s9804_s25 + $0xe8] sm:$0xff] %v6741_v34  ;;  %7920 = vpow2.f32 %v6614_v49  ;;  %v6919_v52 = vpop.f32.mrb[69].mxu0  ;;  %v6628_v5 = vmul.f32 -1.442695, %v4610_v7  ;;  %v6629_v21 = vmul.f32 -1.442695, %v4612_v15 }
 0x884   : > { %v7903_v50 = vpop.eup %7902  ;;  %v6744_v13 = vpack.c.bf16 %v7901_v38, %v7897_v20  ;;  %7922 = vpow2.f32 %v6616_v61  ;;  %v9962_v63 = vpop.f32.mrb[150].mxu1  ;;  %v9967_v29 = vadd.f32 %v6919_v52, %v6918_v40 }
 0x885   : > { %v7905_v26 = vpop.eup %7904  ;;  %v6745_v37 = vpack.c.bf16 %v7903_v50, %v7899_v42  ;;  %7924 = vpow2.f32 %v6615_v60  ;;  %v6921_v43 = vpop.f32.mrb[70].mxu0 }
 0x886   : > { %v7907_v0 = vpop.eup %7906  ;;  %6001 = vst [vmem:[%s9804_s25 + $0xfc] sm:$0xff] %v6744_v13  ;;  %7926 = vpow2.f32 %v6617_v33  ;;  %v9969_v55 = vpop.f32.mrb[151].mxu1  ;;  %v3912_v13 = vsub.s32 4, %v8764_v62 }
 0x887   : > { %v6922_v4 = vpop.f32.mrb[71].mxu0  ;;  %v7909_v14 = vpop.eup %7908  ;;  %6002 = vst [vmem:[%s9804_s25 + $0x104] sm:$0xff] %v6745_v37  ;;  %7928 = vpow2.f32 %v6621_v45 }
 0x888   : > { %v9972_v17 = vadd.f32 %v6922_v4, %v6921_v43  ;;  %v7911_v41 = vpop.eup %7910  ;;  %v6748_v44 = vpack.c.bf16 %v7909_v14, %v7905_v26  ;;  %7930 = vpow2.f32 %v6623_v8  ;;  %v9978_v35 = vpop.f32.mrb[152].mxu1  ;;  %v3916_v8 = vsub.s32 5, %v8764_v62 }
 0x889   : > { %v7913_v2 = vpop.eup %7912  ;;  %v6749_v47 = vpack.c.bf16 %v7911_v41, %v7907_v0  ;;  %7932 = vpow2.f32 %v6622_v3  ;;  %v6924_v61 = vpop.f32.mrb[72].mxu0  ;;  %v3920_v26 = vsub.s32 6, %v8764_v62  ;;  %v4727_v62 = vadd.f32 %v9912_v31, %v9776_v10  ;;  %v8178_v41 = vld [vmem:[%s10229_s17] sm:$0xff] }
 0x88a   : > { %v9974_v49 = vpop.eup %7914  ;;  %6005 = vst [vmem:[%s9804_s25 + $0x118] sm:$0xff] %v6748_v44  ;;  %7934 = vpow2.f32 %v6624_v51  ;;  %v9980_v56 = vpop.f32.mrb[153].mxu1  ;;  %v4614_v51 = vadd.f32 %v9910_v28, %v9774_v9  ;;  %v10003_v44 = vrot.slane %v8178_v41, %v3912_v13  ;;  %v10007_v28 = vrot.slane %v8178_v41, %v3916_v8 }
 0x88b   : > { %v7917_v53 = vpop.eup %7916  ;;  %6006 = vst [vmem:[%s9804_s25 + $0x120] sm:$0xff] %v6749_v47  ;;  %7936 = vpow2.f32 %v6628_v5  ;;  %v6925_v58 = vpop.f32.mrb[73].mxu0 }
 0x88c   : > { %v7919_v25 = vpop.eup %7918  ;;  %v6752_v54 = vpack.c.bf16 %v7917_v53, %v7913_v2  ;;  %7938 = vpow2.f32 %v6630_v6  ;;  %v9982_v20 = vadd.f32 %v6925_v58, %v6924_v61  ;;  %v9984_v34 = vpop.f32.mrb[154].mxu1  ;;  %v4616_v61 = vadd.f32 %v9914_v36, %v9779_v22 }
 0x88d   : > { %v7921_v60 = vpop.eup %7920  ;;  %v5357_v59 = vadd.f32 1.0, %v7919_v25  ;;  %7940 = vpow2.f32 %v6629_v21  ;;  %v6927_v27 = vpop.f32.mrb[74].mxu0  ;;  %v10009_v21 = vrot.slane %v8178_v41, %v3920_v26 }
 0x88e   : > { %v7923_v42 = vpop.eup %7922  ;;  %6009 = vst [vmem:[%s9804_s25 + $0x134] sm:$0xff] %v6752_v54  ;;  %v5361_v33 = vadd.f32 1.0, %v7921_v60  ;;  %7942 = vpow2.f32 %v6631_v11  ;;  %v9987_v57 = vpop.f32.mrb[155].mxu1 }
 0x88f   : > { %v6928_v38 = vpop.f32.mrb[75].mxu0  ;;  %v7925_v45 = vpop.eup %7924  ;;  %7944 = vrcp.f32 %v5357_v59  ;;  %v5363_v7 = vadd.f32 1.0, %v7923_v42  ;;  %v4729_v42 = vadd.f32 %v9916_v23, %v9781_v16  ;;  %v6636_v16 = vmul.f32 -1.442695, %v4616_v61 }
 0x890   : > { %v7927_v40 = vpop.eup %7926  ;;  %7946 = vrcp.f32 %v5361_v33  ;;  %v5362_v50 = vadd.f32 1.0, %v7925_v45  ;;  %v9992_v37 = vadd.f32 %v6928_v38, %v6927_v27  ;;  %v9996_v46 = vpop.f32.mrb[156].mxu1  ;;  %v6635_v27 = vmul.f32 -1.442695, %v4614_v51 }
 0x891   : > { %v7929_v18 = vpop.eup %7928  ;;  %7948 = vrcp.f32 %v5363_v7  ;;  %v5364_v52 = vadd.f32 1.0, %v7927_v40  ;;  %v6930_v4 = vpop.f32.mrb[76].mxu0  ;;  %v6637_v45 = vmul.f32 -1.442695, %v4727_v62  ;;  %v4766_v7 = vadd.f32 %v9924_v1, %v10003_v44 }
 0x892   : > { %v7931_v3 = vpop.eup %7930  ;;  %7950 = vrcp.f32 %v5362_v50  ;;  %v5368_v15 = vadd.f32 1.0, %v7929_v18  ;;  %v10005_v6 = vpop.f32.mrb[157].mxu1  ;;  %v4768_v40 = vadd.f32 %v9928_v32, %v10007_v28  ;;  %v4879_v23 = vadd.f32 %v9934_v48, %v10009_v21 }
 0x893   : > { %v7933_v43 = vpop.eup %7932  ;;  %7952 = vrcp.f32 %v5364_v52  ;;  %v5370_v0 = vadd.f32 1.0, %v7931_v3  ;;  %v6931_v2 = vpop.f32.mrb[77].mxu0  ;;  %v6638_v1 = vmul.f32 -1.442695, %v4729_v42  ;;  %v4770_v52 = vadd.f32 %v9932_v39, %v10003_v44 }
 0x894   : > { %v7935_v14 = vpop.eup %7934  ;;  %7954 = vrcp.f32 %v5368_v15  ;;  %v5369_v5 = vadd.f32 1.0, %v7933_v43  ;;  %v10011_v11 = vpop.f32.mrb[158].mxu1  ;;  %v10015_v25 = vadd.f32 %v6931_v2, %v6930_v4  ;;  %v6534_v32 = vmul.f32 -1.442695, %v4766_v7 }
 0x895   : > { %v7937_v47 = vpop.eup %7936  ;;  %7956 = vrcp.f32 %v5370_v0  ;;  %v5371_v9 = vadd.f32 1.0, %v7935_v14  ;;  %v6933_v53 = vpop.f32.mrb[78].mxu0  ;;  %v6535_v0 = vmul.f32 -1.442695, %v4768_v40  ;;  %v4882_v39 = vadd.f32 %v9946_v12, %v10009_v21 }
 0x896   : > { %v7939_v10 = vpop.eup %7938  ;;  %7958 = vrcp.f32 %v5369_v5  ;;  %v5375_v31 = vadd.f32 1.0, %v7937_v47  ;;  %v10017_v54 = vpop.f32.mrb[159].mxu1  ;;  %v6536_v5 = vmul.f32 -1.442695, %v4879_v23  ;;  %v4776_v62 = vadd.f32 %v9954_v24, %v10003_v44 }
 0x897   : > { %v6934_v58 = vpop.f32.mrb[79].mxu0  ;;  %v7941_v60 = vpop.eup %7940  ;;  %7960 = vrcp.f32 %v5371_v9  ;;  %v5377_v59 = vadd.f32 1.0, %v7939_v10  ;;  %v6541_v2 = vmul.f32 -1.442695, %v4770_v52  ;;  %v4778_v47 = vadd.f32 %v9958_v30, %v10007_v28 }
 0x898   : > { %v7943_v33 = vpop.eup %7942  ;;  %7962 = vrcp.f32 %v5375_v31  ;;  %v5376_v38 = vadd.f32 1.0, %v7941_v60  ;;  %v10025_v50 = vadd.f32 %v6934_v58, %v6933_v53  ;;  %v10032_v26 = vpop.f32.mrb[160].mxu1  ;;  %v4887_v53 = vadd.f32 %v9967_v29, %v10009_v21 }
 0x899   : > { %v7945_v22 = vpop.eup %7944  ;;  %7964 = vrcp.f32 %v5377_v59  ;;  %v5378_v36 = vadd.f32 1.0, %v7943_v33  ;;  %v10037_v15 = vpop.f32.mrb[161].mxu1  ;;  %v6543_v31 = vmul.f32 -1.442695, %v4882_v39  ;;  %v6548_v60 = vmul.f32 -1.442695, %v4776_v62 }
 0x89a   : > { %v7947_v13 = vpop.eup %7946  ;;  %v6753_v8 = vpack.c.bf16 %v7945_v22, %v9974_v49  ;;  %7966 = vrcp.f32 %v5376_v38  ;;  %v4772_v49 = vadd.f32 %v9936_v19, %v10007_v28  ;;  %v10041_v51 = vpop.f32.mrb[162].mxu1  ;;  %v6549_v30 = vmul.f32 -1.442695, %v4778_v47 }
 0x89b   : > { %v7949_v18 = vpop.eup %7948  ;;  %7968 = vrcp.f32 %v5378_v36  ;;  %v10045_v19 = vpop.f32.mrb[163].mxu1  ;;  %v6550_v29 = vmul.f32 -1.442695, %v4887_v53  ;;  %v4782_v62 = vadd.f32 %v9969_v55, %v10007_v28 }
 0x89c   : > { %v7951_v3 = vpop.eup %7950  ;;  %6010 = vst [vmem:[%s9804_s25 + $0x13c] sm:$0xff] %v6753_v8  ;;  %7970 = vpow2.f32 %v6635_v27  ;;  %v6542_v9 = vmul.f32 -1.442695, %v4772_v49 }
 0x89d   : > { %v7953_v43 = vpop.eup %7952  ;;  %v6756_v48 = vpack.c.bf16 %v7951_v3, %v7947_v13  ;;  %7972 = vpow2.f32 %v6637_v45 }
 0x89e   : > { %v7955_v4 = vpop.eup %7954  ;;  %v6757_v14 = vpack.c.bf16 %v7953_v43, %v7949_v18  ;;  %7974 = vpow2.f32 %v6636_v16 }
 0x89f   : > { %v7957_v41 = vpop.eup %7956  ;;  %6013 = vst [vmem:[%s9804_s25 + $0x150] sm:$0xff] %v6756_v48  ;;  %7976 = vpow2.f32 %v6638_v1 }
 0x8a0   : > { %v7959_v12 = vpop.eup %7958  ;;  %6014 = vst [vmem:[%s9804_s25 + $0x158] sm:$0xff] %v6757_v14  ;;  %7978 = vpow2.f32 %v6534_v32  ;;  %v10054_v27 = vpop.f32.mrb[164].mxu1 }
 0x8a1   : > { %v7961_v10 = vpop.eup %7960  ;;  %v6760_v24 = vpack.c.bf16 %v7959_v12, %v7955_v4  ;;  %7980 = vpow2.f32 %v6535_v0  ;;  %v10057_v33 = vpop.f32.mrb[165].mxu1  ;;  %v4890_v12 = vadd.f32 %v9972_v17, %v10009_v21 }
 0x8a2   : > { %v7963_v61 = vpop.eup %7962  ;;  %v6761_v58 = vpack.c.bf16 %v7961_v10, %v7957_v41  ;;  %7982 = vpow2.f32 %v6536_v5  ;;  %v10059_v7 = vpop.f32.mrb[166].mxu1  ;;  %v4780_v5 = vadd.f32 %v9962_v63, %v10003_v44  ;;  %v4786_v63 = vadd.f32 %v9978_v35, %v10003_v44 }
 0x8a3   : > { %v7965_v59 = vpop.eup %7964  ;;  %6017 = vst [vmem:[%s9804_s25 + $0x16c] sm:$0xff] %v6760_v24  ;;  %7984 = vpow2.f32 %v6541_v2  ;;  %v10061_v40 = vpop.f32.mrb[167].mxu1  ;;  %v6556_v35 = vmul.f32 -1.442695, %v4782_v62 }
 0x8a4   : > { %v7967_v42 = vpop.eup %7966  ;;  %6018 = vst [vmem:[%s9804_s25 + $0x174] sm:$0xff] %v6761_v58  ;;  %7986 = vpow2.f32 %v6542_v9  ;;  %v4788_v58 = vadd.f32 %v9980_v56, %v10007_v28 }
 0x8a5   : > { %v7969_v38 = vpop.eup %7968  ;;  %v6764_v45 = vpack.c.bf16 %v7967_v42, %v7963_v61  ;;  %7988 = vpow2.f32 %v6543_v31 }
 0x8a6   : > { %v7971_v22 = vpop.eup %7970  ;;  %v6765_v36 = vpack.c.bf16 %v7969_v38, %v7965_v59  ;;  %7990 = vpow2.f32 %v6548_v60  ;;  %v4895_v59 = vadd.f32 %v9982_v20, %v10009_v21  ;;  %v6563_v56 = vmul.f32 -1.442695, %v4788_v58 }
 0x8a7   : > { %v7973_v13 = vpop.eup %7972  ;;  %6021 = vst [vmem:[%s9804_s25 + $0x188] sm:$0xff] %v6764_v45  ;;  %v5382_v8 = vadd.f32 1.0, %v7971_v22  ;;  %7992 = vpow2.f32 %v6549_v30  ;;  %v6557_v22 = vmul.f32 -1.442695, %v4890_v12 }
 0x8a8   : > { %v7975_v16 = vpop.eup %7974  ;;  %6022 = vst [vmem:[%s9804_s25 + $0x190] sm:$0xff] %v6765_v36  ;;  %v5384_v23 = vadd.f32 1.0, %v7973_v13  ;;  %7994 = vpow2.f32 %v6550_v29  ;;  %v10065_v43 = vpop.f32.mrb[168].mxu1  ;;  %v6555_v29 = vmul.f32 -1.442695, %v4780_v5 }
 0x8a9   : > { %v7977_v18 = vpop.eup %7976  ;;  %7996 = vrcp.f32 %v5382_v8  ;;  %v5383_v1 = vadd.f32 1.0, %v7975_v16  ;;  %v10067_v39 = vpop.f32.mrb[169].mxu1  ;;  %v6562_v36 = vmul.f32 -1.442695, %v4786_v63  ;;  %v4790_v16 = vadd.f32 %v9984_v34, %v10003_v44 }
 0x8aa   : > { %v7979_v52 = vpop.eup %7978  ;;  %7998 = vrcp.f32 %v5384_v23  ;;  %v5385_v3 = vadd.f32 1.0, %v7977_v18  ;;  %v4829_v41 = vpop.f32.mrb[170].mxu1  ;;  %v4898_v34 = vadd.f32 %v9992_v37, %v10009_v21  ;;  %v4798_v37 = vadd.f32 %v10005_v6, %v10007_v28 }
 0x8ab   : > { %v7981_v32 = vpop.eup %7980  ;;  %8000 = vrcp.f32 %v5383_v1  ;;  %v5281_v49 = vadd.f32 1.0, %v7979_v52  ;;  %v10076_v9 = vadd.f32 %v4829_v41, %v10003_v44  ;;  %v4831_v53 = vpop.f32.mrb[171].mxu1  ;;  %v6564_v1 = vmul.f32 -1.442695, %v4895_v59 }
 0x8ac   : > { %v7983_v48 = vpop.eup %7982  ;;  %8002 = vrcp.f32 %v5385_v3  ;;  %v5282_v0 = vadd.f32 1.0, %v7981_v32  ;;  %v10081_v31 = vadd.f32 %v4831_v53, %v10007_v28  ;;  %v4792_v52 = vadd.f32 %v9987_v57, %v10007_v28 }
 0x8ad   : > { %v7985_v4 = vpop.eup %7984  ;;  %8004 = vrcp.f32 %v5281_v49  ;;  %v5283_v14 = vadd.f32 1.0, %v7983_v48  ;;  %v4796_v57 = vadd.f32 %v9996_v46, %v10003_v44  ;;  %v4903_v46 = vadd.f32 %v10015_v25, %v10009_v21 }
 0x8ae   : > { %v7987_v2 = vpop.eup %7986  ;;  %8006 = vrcp.f32 %v5282_v0  ;;  %v5288_v47 = vadd.f32 1.0, %v7985_v4  ;;  %v6570_v53 = vmul.f32 -1.442695, %v4792_v52  ;;  %v6571_v63 = vmul.f32 -1.442695, %v4898_v34 }
 0x8af   : > { %v7989_v10 = vpop.eup %7988  ;;  %8008 = vrcp.f32 %v5283_v14  ;;  %v5289_v24 = vadd.f32 1.0, %v7987_v2  ;;  %v6569_v2 = vmul.f32 -1.442695, %v4790_v16  ;;  %v6576_v6 = vmul.f32 -1.442695, %v4796_v57 }
 0x8b0   : > { %v7991_v55 = vpop.eup %7990  ;;  %8010 = vrcp.f32 %v5288_v47  ;;  %v5290_v61 = vadd.f32 1.0, %v7989_v10  ;;  %v4835_v13 = vpop.f32.mrb[172].mxu1  ;;  %v6577_v59 = vmul.f32 -1.442695, %v4798_v37 }
 0x8b1   : > { %v7993_v17 = vpop.eup %7992  ;;  %8012 = vrcp.f32 %v5289_v24  ;;  %v5295_v60 = vadd.f32 1.0, %v7991_v55  ;;  %v10090_v23 = vadd.f32 %v4835_v13, %v10003_v44  ;;  %v4837_v20 = vpop.f32.mrb[173].mxu1  ;;  %v4800_v55 = vadd.f32 %v10011_v11, %v10003_v44 }
 0x8b2   : > { %v7995_v30 = vpop.eup %7994  ;;  %8014 = vrcp.f32 %v5290_v61  ;;  %v5296_v42 = vadd.f32 1.0, %v7993_v17  ;;  %v10095_v3 = vadd.f32 %v4837_v20, %v10007_v28  ;;  %v4839_v32 = vpop.f32.mrb[174].mxu1 }
 0x8b3   : > { %v7997_v38 = vpop.eup %7996  ;;  %8016 = vrcp.f32 %v5295_v60  ;;  %v5297_v45 = vadd.f32 1.0, %v7995_v30  ;;  %v10100_v0 = vadd.f32 %v4839_v32, %v10003_v44  ;;  %v4841_v4 = vpop.f32.mrb[175].mxu1 }
 0x8b4   : > { %v7999_v8 = vpop.eup %7998  ;;  %8018 = vrcp.f32 %v5296_v42  ;;  %v10105_v62 = vadd.f32 %v4841_v4, %v10007_v28 }
 0x8b5   : > { %v8001_v18 = vpop.eup %8000  ;;  %8020 = vrcp.f32 %v5297_v45  ;;  %v6583_v45 = vmul.f32 -1.442695, %v4800_v55 }
 0x8b6   : > { %v8003_v49 = vpop.eup %8002  ;;  %v6768_v48 = vpack.c.bf16 %v8001_v18, %v7997_v38  ;;  %8022 = vpow2.f32 %v6555_v29  ;;  %v6578_v29 = vmul.f32 -1.442695, %v4903_v46 }
 0x8b7   : > { %v8005_v14 = vpop.eup %8004  ;;  %v6769_v5 = vpack.c.bf16 %v8003_v49, %v7999_v8  ;;  %8024 = vpow2.f32 %v6556_v35 }
 0x8b8   : > { %v8007_v41 = vpop.eup %8006  ;;  %6025 = vst [vmem:[%s9804_s25 + $0x1a4] sm:$0xff] %v6768_v48  ;;  %8026 = vpow2.f32 %v6557_v22  ;;  %v6936_v58 = vpop.f32.mrb[176].mxu1 }
 0x8b9   : > { %v8009_v47 = vpop.eup %8008  ;;  %6026 = vst [vmem:[%s9804_s25 + $0x1ac] sm:$0xff] %v6769_v5  ;;  %v6710_v12 = vpack.c.bf16 %v8007_v41, %v8005_v14  ;;  %8028 = vpow2.f32 %v6562_v36  ;;  %v6937_v25 = vpop.f32.mrb[177].mxu1 }
 0x8ba   : > { %v8011_v10 = vpop.eup %8010  ;;  %v6711_v24 = vpack.c.bf16 %v8009_v47, %v8009_v47  ;;  %8030 = vpow2.f32 %v6563_v56  ;;  %v10117_v35 = vadd.f32 %v6937_v25, %v6936_v58  ;;  %v6939_v11 = vpop.f32.mrb[178].mxu1 }
 0x8bb   : > { %v8013_v61 = vpop.eup %8012  ;;  %5967 = vst [vmem:[%s9804_s25 + $0x10] sm:$0xff] %v6710_v12  ;;  %8032 = vpow2.f32 %v6564_v1  ;;  %v6940_v22 = vpop.f32.mrb[179].mxu1 }
 0x8bc   : > { %v8015_v17 = vpop.eup %8014  ;;  %5968 = vst [vmem:[%s9804_s25 + $0x18] sm:$0xf] %v6711_v24  ;;  %v6714_v60 = vpack.c.bf16 %v8013_v61, %v8011_v10  ;;  %8034 = vpow2.f32 %v6569_v2  ;;  %v10121_v8 = vadd.f32 %v6940_v22, %v6939_v11  ;;  %v4802_v10 = vadd.f32 %v10017_v54, %v10007_v28 }
 0x8bd   : > { %v8017_v30 = vpop.eup %8016  ;;  %v6715_v42 = vpack.c.bf16 %v8015_v17, %v8015_v17  ;;  %8036 = vpow2.f32 %v6570_v53  ;;  %v4906_v61 = vadd.f32 %v10025_v50, %v10009_v21  ;;  %v4808_v54 = vadd.f32 %v10037_v15, %v10007_v28 }
 0x8be   : > { %v8019_v38 = vpop.eup %8018  ;;  %5971 = vst [vmem:[%s9804_s25 + $0x2c] sm:$0xff] %v6714_v60  ;;  %8038 = vpow2.f32 %v6571_v63 }
 0x8bf   : > { %v8021_v36 = vpop.eup %8020  ;;  %5972 = vst [vmem:[%s9804_s25 + $0x34] sm:$0xf] %v6715_v42  ;;  %v6718_v13 = vpack.c.bf16 %v8019_v38, %v8017_v30  ;;  %8040 = vpow2.f32 %v6576_v6  ;;  %v6584_v42 = vmul.f32 -1.442695, %v4802_v10  ;;  %v6585_v38 = vmul.f32 -1.442695, %v4906_v61 }
 0x8c0   : > { %v8023_v56 = vpop.eup %8022  ;;  %v6719_v16 = vpack.c.bf16 %v8021_v36, %v8021_v36  ;;  %8042 = vpow2.f32 %v6577_v59  ;;  %v6942_v48 = vpop.f32.mrb[180].mxu1  ;;  %v4806_v59 = vadd.f32 %v10032_v26, %v10003_v44  ;;  %v4812_v26 = vadd.f32 %v10045_v19, %v10007_v28 }
 0x8c1   : > { %v8025_v20 = vpop.eup %8024  ;;  %5975 = vst [vmem:[%s9804_s25 + $0x48] sm:$0xff] %v6718_v13  ;;  %v5302_v18 = vadd.f32 1.0, %v8023_v56  ;;  %8044 = vpow2.f32 %v6578_v29  ;;  %v6943_v14 = vpop.f32.mrb[181].mxu1 }
 0x8c2   : > { %v8027_v1 = vpop.eup %8026  ;;  %5976 = vst [vmem:[%s9804_s25 + $0x50] sm:$0xf] %v6719_v16  ;;  %v5303_v52 = vadd.f32 1.0, %v8025_v20  ;;  %8046 = vpow2.f32 %v6583_v45  ;;  %v10125_v41 = vadd.f32 %v6943_v14, %v6942_v48  ;;  %v6945_v2 = vpop.f32.mrb[182].mxu1  ;;  %v4810_v45 = vadd.f32 %v10041_v51, %v10003_v44 }
 0x8c3   : > { %v8029_v32 = vpop.eup %8028  ;;  %8048 = vrcp.f32 %v5302_v18  ;;  %v5304_v49 = vadd.f32 1.0, %v8027_v1  ;;  %v6946_v12 = vpop.f32.mrb[183].mxu1  ;;  %v6590_v20 = vmul.f32 -1.442695, %v4806_v59  ;;  %v6591_v18 = vmul.f32 -1.442695, %v4808_v54 }
 0x8c4   : > { %v8031_v34 = vpop.eup %8030  ;;  %8050 = vrcp.f32 %v5303_v52  ;;  %v5309_v4 = vadd.f32 1.0, %v8029_v32  ;;  %v10129_v24 = vadd.f32 %v6946_v12, %v6945_v2  ;;  %v4816_v1 = vadd.f32 %v10054_v27, %v10003_v44 }
 0x8c5   : > { %v8033_v5 = vpop.eup %8032  ;;  %8052 = vrcp.f32 %v5304_v49  ;;  %v5310_v57 = vadd.f32 1.0, %v8031_v34  ;;  %v4818_v49 = vadd.f32 %v10057_v33, %v10007_v28  ;;  %v4820_v14 = vadd.f32 %v10059_v7, %v10003_v44 }
 0x8c6   : > { %v8035_v37 = vpop.eup %8034  ;;  %8054 = vrcp.f32 %v5309_v4  ;;  %v5311_v47 = vadd.f32 1.0, %v8033_v5  ;;  %v6597_v4 = vmul.f32 -1.442695, %v4810_v45  ;;  %v6598_v27 = vmul.f32 -1.442695, %v4812_v26 }
 0x8c7   : > { %v8037_v53 = vpop.eup %8036  ;;  %8056 = vrcp.f32 %v5310_v57  ;;  %v5316_v46 = vadd.f32 1.0, %v8035_v37  ;;  %v4822_v57 = vadd.f32 %v10061_v40, %v10007_v28  ;;  %v6604_v37 = vmul.f32 -1.442695, %v4816_v1 }
 0x8c8   : > { %v8039_v63 = vpop.eup %8038  ;;  %8058 = vrcp.f32 %v5311_v47  ;;  %v5317_v55 = vadd.f32 1.0, %v8037_v53  ;;  %v6948_v29 = vpop.f32.mrb[184].mxu1  ;;  %v4826_v47 = vadd.f32 %v10065_v43, %v10003_v44  ;;  %v6605_v7 = vmul.f32 -1.442695, %v4818_v49 }
 0x8c9   : > { %v8041_v6 = vpop.eup %8040  ;;  %8060 = vrcp.f32 %v5316_v46  ;;  %v5318_v58 = vadd.f32 1.0, %v8039_v63  ;;  %v6949_v22 = vpop.f32.mrb[185].mxu1  ;;  %v4828_v46 = vadd.f32 %v10067_v39, %v10007_v28  ;;  %v6611_v40 = vmul.f32 -1.442695, %v4820_v14 }
 0x8ca   : > { %v8043_v17 = vpop.eup %8042  ;;  %8062 = vrcp.f32 %v5317_v55  ;;  %v5323_v60 = vadd.f32 1.0, %v8041_v6  ;;  %v10141_v15 = vadd.f32 %v6949_v22, %v6948_v29  ;;  %v6951_v56 = vpop.f32.mrb[186].mxu1  ;;  %v6612_v44 = vmul.f32 -1.442695, %v4822_v57 }
 0x8cb   : > { %v8045_v25 = vpop.eup %8044  ;;  %8064 = vrcp.f32 %v5318_v58  ;;  %v5324_v30 = vadd.f32 1.0, %v8043_v17  ;;  %v6952_v52 = vpop.f32.mrb[187].mxu1  ;;  %v6618_v28 = vmul.f32 -1.442695, %v4826_v47  ;;  %v6619_v54 = vmul.f32 -1.442695, %v4828_v46 }
 0x8cc   : > { %v8047_v11 = vpop.eup %8046  ;;  %8066 = vrcp.f32 %v5323_v60  ;;  %v5325_v50 = vadd.f32 1.0, %v8045_v25  ;;  %v10147_v19 = vadd.f32 %v6952_v52, %v6951_v56  ;;  %v6625_v29 = vmul.f32 -1.442695, %v10076_v9 }
 0x8cd   : > { %v8049_v36 = vpop.eup %8048  ;;  %8068 = vrcp.f32 %v5324_v30  ;;  %v5330_v13 = vadd.f32 1.0, %v8047_v11 }
 0x8ce   : > { %v8051_v16 = vpop.eup %8050  ;;  %8070 = vrcp.f32 %v5325_v50 }
 0x8cf   : > { %v8053_v51 = vpop.eup %8052  ;;  %v6722_v32 = vpack.c.bf16 %v8051_v16, %v8049_v36  ;;  %8072 = vrcp.f32 %v5330_v13 }
 0x8d0   : > { %v8055_v48 = vpop.eup %8054  ;;  %v6723_v34 = vpack.c.bf16 %v8053_v51, %v8053_v51  ;;  %8074 = vpow2.f32 %v6584_v42  ;;  %v6954_v10 = vpop.f32.mrb[188].mxu1 }
 0x8d1   : > { %v8057_v5 = vpop.eup %8056  ;;  %5979 = vst [vmem:[%s9804_s25 + $0x64] sm:$0xff] %v6722_v32  ;;  %8076 = vpow2.f32 %v6585_v38  ;;  %v6955_v55 = vpop.f32.mrb[189].mxu1 }
 0x8d2   : > { %v8059_v2 = vpop.eup %8058  ;;  %5980 = vst [vmem:[%s9804_s25 + $0x6c] sm:$0xf] %v6723_v34  ;;  %v6726_v33 = vpack.c.bf16 %v8057_v5, %v8055_v48  ;;  %8078 = vpow2.f32 %v6590_v20  ;;  %v10161_v43 = vadd.f32 %v6955_v55, %v6954_v10  ;;  %v6957_v58 = vpop.f32.mrb[190].mxu1 }
 0x8d3   : > { %v8061_v12 = vpop.eup %8060  ;;  %v6727_v53 = vpack.c.bf16 %v8059_v2, %v8059_v2  ;;  %8080 = vpow2.f32 %v6591_v18  ;;  %v6958_v39 = vpop.f32.mrb[191].mxu1 }
 0x8d4   : > { %v8063_v63 = vpop.eup %8062  ;;  %5983 = vst [vmem:[%s9804_s25 + $0x80] sm:$0xff] %v6726_v33  ;;  %8082 = vpow2.f32 %v6597_v4  ;;  %v10164_v25 = vadd.f32 %v6958_v39, %v6957_v58  ;;  %v4935_v39 = vadd.f32 %v10161_v43, %v10009_v21 }
 0x8d5   : > { %v8065_v61 = vpop.eup %8064  ;;  %5984 = vst [vmem:[%s9804_s25 + $0x88] sm:$0xf] %v6727_v53  ;;  %v6730_v6 = vpack.c.bf16 %v8063_v63, %v8061_v12  ;;  %8084 = vpow2.f32 %v6598_v27  ;;  %v6632_v53 = vmul.f32 -1.442695, %v10090_v23  ;;  %v6633_v63 = vmul.f32 -1.442695, %v10095_v3 }
 0x8d6   : > { %v8067_v17 = vpop.eup %8066  ;;  %v6731_v60 = vpack.c.bf16 %v8065_v61, %v8065_v61  ;;  %8086 = vpow2.f32 %v6604_v37  ;;  %v6626_v37 = vmul.f32 -1.442695, %v10081_v31  ;;  %v6639_v61 = vmul.f32 -1.442695, %v10100_v0 }
 0x8d7   : > { %v8069_v59 = vpop.eup %8068  ;;  %5987 = vst [vmem:[%s9804_s25 + $0x9c] sm:$0xff] %v6730_v6  ;;  %8088 = vpow2.f32 %v6605_v7  ;;  %v4911_v7 = vadd.f32 %v10117_v35, %v10009_v21  ;;  %v4919_v23 = vadd.f32 %v10125_v41, %v10009_v21  ;;  %v6640_v35 = vmul.f32 -1.442695, %v10105_v62 }
 0x8d8   : > { %v8071_v30 = vpop.eup %8070  ;;  %5988 = vst [vmem:[%s9804_s25 + $0xa4] sm:$0xf] %v6731_v60  ;;  %v6734_v42 = vpack.c.bf16 %v8069_v59, %v8067_v17  ;;  %8090 = vpow2.f32 %v6611_v40  ;;  %v4914_v40 = vadd.f32 %v10121_v8, %v10009_v21  ;;  %v4922_v3 = vadd.f32 %v10129_v24, %v10009_v21 }
 0x8d9   : > { %v8073_v11 = vpop.eup %8072  ;;  %v6735_v50 = vpack.c.bf16 %v8071_v30, %v8071_v30  ;;  %8092 = vpow2.f32 %v6612_v44  ;;  %v6592_v58 = vmul.f32 -1.442695, %v4911_v7  ;;  %v4927_v0 = vadd.f32 %v10141_v15, %v10009_v21 }
 0x8da   : > { %v8075_v38 = vpop.eup %8074  ;;  %5991 = vst [vmem:[%s9804_s25 + $0xb8] sm:$0xff] %v6734_v42  ;;  %8094 = vpow2.f32 %v6618_v28  ;;  %v6599_v41 = vmul.f32 -1.442695, %v4914_v40  ;;  %v4930_v60 = vadd.f32 %v10147_v19, %v10009_v21  ;;  %v6606_v24 = vmul.f32 -1.442695, %v4919_v23 }
 0x8db   : > { %v8077_v45 = vpop.eup %8076  ;;  %5992 = vst [vmem:[%s9804_s25 + $0xc0] sm:$0xf] %v6735_v50  ;;  %v5331_v22 = vadd.f32 1.0, %v8075_v38  ;;  %8096 = vpow2.f32 %v6619_v54  ;;  %v6613_v54 = vmul.f32 -1.442695, %v4922_v3  ;;  %v4938_v15 = vadd.f32 %v10164_v25, %v10009_v21 }
 0x8dc   : > { %v8079_v36 = vpop.eup %8078  ;;  %v5332_v13 = vadd.f32 1.0, %v8077_v45  ;;  %8098 = vpow2.f32 %v6625_v29  ;;  %v6620_v19 = vmul.f32 -1.442695, %v4927_v0  ;;  %v6634_v43 = vmul.f32 -1.442695, %v4935_v39 }
 0x8dd   : > { %v8081_v26 = vpop.eup %8080  ;;  %8100 = vrcp.f32 %v5331_v22  ;;  %v5337_v56 = vadd.f32 1.0, %v8079_v36  ;;  %v6641_v22 = vmul.f32 -1.442695, %v4938_v15 }
 0x8de   : > { %v8083_v16 = vpop.eup %8082  ;;  %8102 = vrcp.f32 %v5332_v13  ;;  %v5338_v20 = vadd.f32 1.0, %v8081_v26 }
 0x8df   : > { %v8085_v9 = vpop.eup %8084  ;;  %8104 = vrcp.f32 %v5337_v56  ;;  %v5344_v18 = vadd.f32 1.0, %v8083_v16 }
 0x8e0   : > { %v8087_v1 = vpop.eup %8086  ;;  %8106 = vrcp.f32 %v5338_v20  ;;  %v5345_v52 = vadd.f32 1.0, %v8085_v9 }
 0x8e1   : > { %v8089_v51 = vpop.eup %8088  ;;  %8108 = vrcp.f32 %v5344_v18  ;;  %v5351_v32 = vadd.f32 1.0, %v8087_v1 }
 0x8e2   : > { %v8091_v49 = vpop.eup %8090  ;;  %8110 = vrcp.f32 %v5345_v52  ;;  %v5352_v48 = vadd.f32 1.0, %v8089_v51 }
 0x8e3   : > { %v8093_v34 = vpop.eup %8092  ;;  %8112 = vrcp.f32 %v5351_v32  ;;  %v5358_v4 = vadd.f32 1.0, %v8091_v49 }
 0x8e4   : > { %v8095_v14 = vpop.eup %8094  ;;  %8114 = vrcp.f32 %v5352_v48  ;;  %v5359_v5 = vadd.f32 1.0, %v8093_v34 }
 0x8e5   : > { %v8097_v27 = vpop.eup %8096  ;;  %8116 = vrcp.f32 %v5358_v4  ;;  %v5365_v57 = vadd.f32 1.0, %v8095_v14 }
 0x8e6   : > { %v8099_v2 = vpop.eup %8098  ;;  %8118 = vrcp.f32 %v5359_v5  ;;  %v5366_v33 = vadd.f32 1.0, %v8097_v27 }
 0x8e7   : > { %v8101_v47 = vpop.eup %8100  ;;  %8120 = vrcp.f32 %v5365_v57  ;;  %v5372_v12 = vadd.f32 1.0, %v8099_v2 }
 0x8e8   : > { %v8103_v46 = vpop.eup %8102  ;;  %v6738_v10 = vpack.c.bf16 %v8101_v47, %v8073_v11  ;;  %8122 = vrcp.f32 %v5366_v33  ;;  %v6627_v11 = vmul.f32 -1.442695, %v4930_v60 }
 0x8e9   : > { %v8105_v55 = vpop.eup %8104  ;;  %v6739_v31 = vpack.c.bf16 %v8103_v46, %v8103_v46  ;;  %8124 = vrcp.f32 %v5372_v12 }
 0x8ea   : > { %v8107_v6 = vpop.eup %8106  ;;  %5995 = vst [vmem:[%s9804_s25 + $0xd4] sm:$0xff] %v6738_v10  ;;  %8126 = vpow2.f32 %v6626_v37 }
 0x8eb   : > { %v8109_v44 = vpop.eup %8108  ;;  %5996 = vst [vmem:[%s9804_s25 + $0xdc] sm:$0xf] %v6739_v31  ;;  %v6742_v8 = vpack.c.bf16 %v8107_v6, %v8105_v55  ;;  %8128 = vpow2.f32 %v6632_v53 }
 0x8ec   : > { %v8111_v17 = vpop.eup %8110  ;;  %8130 = vpow2.f32 %v6633_v63 }
 0x8ed   : > { %v8113_v28 = vpop.eup %8112  ;;  %5999 = vst [vmem:[%s9804_s25 + $0xf0] sm:$0xff] %v6742_v8  ;;  %v6746_v62 = vpack.c.bf16 %v8111_v17, %v8109_v44  ;;  %8132 = vpow2.f32 %v6639_v61 }
 0x8ee   : > { %v8115_v59 = vpop.eup %8114  ;;  %8134 = vpow2.f32 %v6640_v35 }
 0x8ef   : > { %v8117_v30 = vpop.eup %8116  ;;  %6003 = vst [vmem:[%s9804_s25 + $0x10c] sm:$0xff] %v6746_v62  ;;  %v6750_v42 = vpack.c.bf16 %v8115_v59, %v8113_v28  ;;  %8136 = vpow2.f32 %v6592_v58 }
 0x8f0   : > { %v8119_v29 = vpop.eup %8118  ;;  %8138 = vpow2.f32 %v6599_v41 }
 0x8f1   : > { %v8121_v50 = vpop.eup %8120  ;;  %6007 = vst [vmem:[%s9804_s25 + $0x128] sm:$0xff] %v6750_v42  ;;  %v6754_v38 = vpack.c.bf16 %v8119_v29, %v8117_v30  ;;  %8140 = vpow2.f32 %v6606_v24 }
 0x8f2   : > { %v8123_v45 = vpop.eup %8122  ;;  %8142 = vpow2.f32 %v6613_v54 }
 0x8f3   : > { %v8125_v36 = vpop.eup %8124  ;;  %6011 = vst [vmem:[%s9804_s25 + $0x144] sm:$0xff] %v6754_v38  ;;  %v6758_v21 = vpack.c.bf16 %v8123_v45, %v8121_v50  ;;  %8144 = vpow2.f32 %v6620_v19 }
 0x8f4   : > { %v8127_v25 = vpop.eup %8126  ;;  %8146 = vpow2.f32 %v6627_v11 }
 0x8f5   : > { %v8129_v13 = vpop.eup %8128  ;;  %6015 = vst [vmem:[%s9804_s25 + $0x160] sm:$0xff] %v6758_v21  ;;  %v5373_v26 = vadd.f32 1.0, %v8127_v25  ;;  %8148 = vpow2.f32 %v6634_v43 }
 0x8f6   : > { %v8131_v56 = vpop.eup %8130  ;;  %v5379_v16 = vadd.f32 1.0, %v8129_v13  ;;  %8150 = vpow2.f32 %v6641_v22 }
 0x8f7   : > { %v8133_v20 = vpop.eup %8132  ;;  %8152 = vrcp.f32 %v5373_v26  ;;  %v5380_v9 = vadd.f32 1.0, %v8131_v56 }
 0x8f8   : > { %v8135_v18 = vpop.eup %8134  ;;  %8154 = vrcp.f32 %v5379_v16  ;;  %v5386_v1 = vadd.f32 1.0, %v8133_v20 }
 0x8f9   : > { %v8137_v52 = vpop.eup %8136  ;;  %8156 = vrcp.f32 %v5380_v9  ;;  %v5387_v51 = vadd.f32 1.0, %v8135_v18 }
 0x8fa   : > { %v8139_v32 = vpop.eup %8138  ;;  %8158 = vrcp.f32 %v5386_v1  ;;  %v5339_v49 = vadd.f32 1.0, %v8137_v52 }
 0x8fb   : > { %v8141_v48 = vpop.eup %8140  ;;  %8160 = vrcp.f32 %v5387_v51  ;;  %v5346_v34 = vadd.f32 1.0, %v8139_v32 }
 0x8fc   : > { %v8143_v4 = vpop.eup %8142  ;;  %8162 = vrcp.f32 %v5339_v49  ;;  %v5353_v14 = vadd.f32 1.0, %v8141_v48 }
 0x8fd   : > { %v8145_v5 = vpop.eup %8144  ;;  %8164 = vrcp.f32 %v5346_v34  ;;  %v5360_v27 = vadd.f32 1.0, %v8143_v4 }
 0x8fe   : > { %v8147_v57 = vpop.eup %8146  ;;  %8166 = vrcp.f32 %v5353_v14  ;;  %v5367_v2 = vadd.f32 1.0, %v8145_v5 }
 0x8ff   : > { %v8149_v33 = vpop.eup %8148  ;;  %8168 = vrcp.f32 %v5360_v27  ;;  %v5374_v37 = vadd.f32 1.0, %v8147_v57 }
 0x900   : > { %v8151_v47 = vpop.eup %8150  ;;  %8170 = vrcp.f32 %v5367_v2  ;;  %v5381_v12 = vadd.f32 1.0, %v8149_v33 }
 0x901   : > { %v8153_v53 = vpop.eup %8152  ;;  %8172 = vrcp.f32 %v5374_v37  ;;  %v5388_v7 = vadd.f32 1.0, %v8151_v47 }
 0x902   : > { %v8155_v46 = vpop.eup %8154  ;;  %v6762_v10 = vpack.c.bf16 %v8153_v53, %v8125_v36  ;;  %8174 = vrcp.f32 %v5381_v12 }
 0x903   : > { %v8157_v63 = vpop.eup %8156  ;;  %8176 = vrcp.f32 %v5388_v7 }
 0x904   : > { %v8159_v40 = vpop.eup %8158  ;;  %6019 = vst [vmem:[%s9804_s25 + $0x17c] sm:$0xff] %v6762_v10  ;;  %v6766_v55 = vpack.c.bf16 %v8157_v63, %v8155_v46 }
 0x905   : > { %v8161_v31 = vpop.eup %8160 }
 0x906   : > { %v8163_v61 = vpop.eup %8162  ;;  %6023 = vst [vmem:[%s9804_s25 + $0x198] sm:$0xff] %v6766_v55  ;;  %v6770_v23 = vpack.c.bf16 %v8161_v31, %v8159_v40 }
 0x907   : > { %v8165_v6 = vpop.eup %8164  ;;  %v6743_v35 = vpack.c.bf16 %v8163_v61, %v8163_v61 }
 0x908   : > { %v8167_v3 = vpop.eup %8166  ;;  %6027 = vst [vmem:[%s9804_s25 + $0x1b4] sm:$0xff] %v6770_v23  ;;  %v6747_v44 = vpack.c.bf16 %v8165_v6, %v8165_v6 }
 0x909   : > { %v8169_v8 = vpop.eup %8168  ;;  %6000 = vst [vmem:[%s9804_s25 + $0xf8] sm:$0xf] %v6743_v35  ;;  %v6751_v58 = vpack.c.bf16 %v8167_v3, %v8167_v3 }
 0x90a   : > { %v8171_v0 = vpop.eup %8170  ;;  %6004 = vst [vmem:[%s9804_s25 + $0x114] sm:$0xf] %v6747_v44  ;;  %v6755_v17 = vpack.c.bf16 %v8169_v8, %v8169_v8 }
 0x90b   : > { %v8173_v41 = vpop.eup %8172  ;;  %6008 = vst [vmem:[%s9804_s25 + $0x130] sm:$0xf] %v6751_v58  ;;  %v6759_v60 = vpack.c.bf16 %v8171_v0, %v8171_v0 }
 0x90c   : > { %v8175_v28 = vpop.eup %8174  ;;  %6012 = vst [vmem:[%s9804_s25 + $0x14c] sm:$0xf] %v6755_v17  ;;  %v6763_v62 = vpack.c.bf16 %v8173_v41, %v8173_v41 }
 0x90d   : > { %v8177_v24 = vpop.eup %8176  ;;  %6016 = vst [vmem:[%s9804_s25 + $0x168] sm:$0xf] %v6759_v60  ;;  %v6767_v39 = vpack.c.bf16 %v8175_v28, %v8175_v28 }
 0x90e   : > { %6020 = vst [vmem:[%s9804_s25 + $0x184] sm:$0xf] %v6763_v62  ;;  %v6771_v59 = vpack.c.bf16 %v8177_v24, %v8177_v24 }
 0x90f   : > { %6024 = vst [vmem:[%s9804_s25 + $0x1a0] sm:$0xf] %v6767_v39 }
 0x910   : > { %6028 = vst [vmem:[%s9804_s25 + $0x1bc] sm:$0xf] %v6771_v59 }
 0x911 PF: > { %s30_s0 = sadd.s32 1, %s8185_s0  }
 0x912   : > { %p27_p4 = scmp.ge.s32.totalorder %s30_s0, 4  }
 0x914   :  { %29 = sbr.rel (!%p27_p4) target bundleno = 5 (0x5), region = 137 }

</bundles_post_ra>
